<compile_context>
chip_gen: v5e
topology: v5e:2x2
jax: 0.10.0
libtpu: 0.0.40
codegen_flags: <defaults>
</compile_context>

<pallas_src>
import jax
import jax.numpy as jnp
from jax import lax
from jax.experimental import pallas as pl
from jax.experimental.pallas import tpu as pltpu

EPS = 1e-5
NEG_SLOPE = 0.01  # nn.LeakyReLU default negative_slope


# ----------------------------- Pallas kernel -------------------------------

def deconv_bn_lrelu_kernel(x_ref, w_ref, g_ref, gt_ref, gamma_ref, beta_ref,
                           o_ref):
    """Fused ConvTranspose2d(k=2,s=2,bias=False) + BatchNorm(train) + LeakyReLU.

    x_ref:     (R, K)   bf16   R = N*H rows (n, i), K = W*Cin
    w_ref:     (K, M)   bf16   kron(I_W, tap) weights, cols ordered (dy, j, dx, c)
    g_ref:     (M, C)   f32    one-hot column->channel reducer
    gt_ref:    (C, M)   f32    one-hot channel->column broadcaster
    gamma_ref: (1, C)   f32
    beta_ref:  (1, C)   f32
    o_ref:     (R, M)   f32    columns already in output (dy, ow, c) order, so
                               the wrapper tail is reshape-only (no transpose).
    """
    # Main matmul: bf16 operands, f32 accumulation (native MXU path).
    y = jnp.dot(x_ref[...], w_ref[...],
                preferred_element_type=jnp.float32)              # (R, M) f32

    g = g_ref[...]
    gt = gt_ref[...]
    R, M = y.shape
    C = g.shape[1]
    inv_count = 1.0 / float(R * (M // C))        # count = N * (2H) * (2W)

    # ---- BatchNorm batch statistics (training mode, two-pass variance) ----
    # Row-first reduction (sublane reduce), then tiny one-hot gather.
    row_sum = jnp.sum(y, axis=0, keepdims=True)                          # (1, M)
    mean = jnp.dot(row_sum, g, preferred_element_type=jnp.float32) * inv_count  # (1, C)
    mean_cols = jnp.dot(mean, gt, preferred_element_type=jnp.float32)    # (1, M)
    d = y - mean_cols
    row_ss = jnp.sum(d * d, axis=0, keepdims=True)                       # (1, M)
    var = jnp.dot(row_ss, g, preferred_element_type=jnp.float32) * inv_count    # (1, C)

    # ---- folded BN affine: v = y*scale + (beta - mean*scale) ----
    scale = gamma_ref[...] * lax.rsqrt(var + EPS)                        # EUP rsqrt
    bias = beta_ref[...] - mean * scale
    sb_cols = jnp.dot(jnp.concatenate([scale, bias], axis=0), gt,
                      preferred_element_type=jnp.float32)                # (2, M)
    v = y * sb_cols[0:1, :] + sb_cols[1:2, :]

    # LeakyReLU (slope < 1 -> max form, no predicate mask); single 512-lane store.
    o_ref[...] = jnp.maximum(v, NEG_SLOPE * v)


# ------------------------------- wrapper ------------------------------------

def deconv_block(x_nchw, params):
    """Full DeConvBlock forward. Input/output are NCHW like the PyTorch module."""
    wt = params["w"].astype(jnp.float32)          # (Cin, Cout, 2, 2) PyTorch layout
    gamma = params["gamma"].astype(jnp.float32)
    beta = params["beta"].astype(jnp.float32)

    N, Cin, H, W = x_nchw.shape
    Cout = wt.shape[1]
    Ho, Wo = 2 * H, 2 * W
    R, K = N * H, W * Cin
    M = 2 * Wo * Cout                              # columns ordered (dy, j, dx, c)

    # NCHW -> NHWC -> (N*H, W*Cin); bf16 operands for the MXU.
    x2 = jnp.transpose(x_nchw, (0, 2, 3, 1)).reshape(R, K).astype(jnp.bfloat16)

    # Tap blocks: B[dy][ci, dx*Cout + c] = wt[ci, c, dy, dx].  kron(I_W, B[dy])
    # folds the width axis so the kernel output is lane-dense in (dy, ow, c).
    # At large W this dense weight is W-fold redundant: width-tile it with a
    # grid (>=128 output lanes / >=512 on v5e per step) instead -- not needed
    # at this toy shape.
    b = jnp.transpose(wt, (2, 0, 3, 1)).reshape(2, Cin, 2 * Cout)
    eye = jnp.eye(W, dtype=jnp.float32)
    wkron = jnp.einsum("jk,dab->djakb", eye, b).reshape(2, K, Wo * Cout)
    wbig = jnp.concatenate([wkron[0], wkron[1]], axis=1).astype(jnp.bfloat16)  # (K, M)

    # One-hot channel gather / broadcast matrices (kept f32: stats stay f32).
    ch = jnp.arange(M, dtype=jnp.int32) % Cout
    gt = (ch[None, :] == jnp.arange(Cout, dtype=jnp.int32)[:, None]
          ).astype(jnp.float32)                                 # (Cout, M)
    g = gt.T                                                    # (M, Cout)

    cost = pl.CostEstimate(
        flops=2 * R * K * M            # main MXU matmul
              + 6 * R * M              # stats + affine + lrelu elementwise
              + 2 * (2 * M * Cout + 2 * Cout * M),   # tiny gather/broadcast matmuls
        transcendentals=Cout,          # rsqrt
        bytes_accessed=(x2.size * 2 + wbig.size * 2
                        + (g.size + gt.size + 2 * Cout) * 4 + R * M * 4),
    )

    vmem = pl.BlockSpec(memory_space=pltpu.MemorySpace.VMEM)
    o = pl.pallas_call(
        deconv_bn_lrelu_kernel,
        out_shape=jax.ShapeDtypeStruct((R, M), jnp.float32),
        in_specs=[vmem] * 6,
        out_specs=vmem,
        cost_estimate=cost,
    )(x2, wbig, g, gt, gamma.reshape(1, Cout), beta.reshape(1, Cout))

    # Columns are already (dy, j, dx, c), so (R, M) -> (N, H, 2, W, 2, C) ->
    # (N, Ho, Wo, C) is a pure reshape (no interleave transpose, no extra HBM
    # pass).  Only the NHWC -> NCHW API transpose remains.
    o = o.reshape(N, Ho, Wo, Cout)
    return jnp.transpose(o, (0, 3, 1, 2))
    # TODO(synk): BatchNorm running_mean/running_var buffer updates are not
    # modeled (they do not affect this forward pass).


# ----------------------------- pure-JAX reference ---------------------------

def ref_deconv_block(x, wt, gamma, beta):
    N, Cin, H, W = x.shape
    Cout = wt.shape[1]
    # ConvTranspose2d(k=2, s=2, p=0, bias=False):
    #   out[n, c, 2i+dy, 2j+dx] = sum_ci x[n, ci, i, j] * wt[ci, c, dy, dx]
    y = jnp.einsum("naij,abuv->nbiujv", x, wt).reshape(N, Cout, 2 * H, 2 * W)
    mean = y.mean(axis=(0, 2, 3), keepdims=True)
    var = y.var(axis=(0, 2, 3), keepdims=True)      # biased (BN training mode)
    yn = (y - mean) / jnp.sqrt(var + EPS)
    yn = yn * gamma.reshape(1, -1, 1, 1) + beta.reshape(1, -1, 1, 1)
    return jnp.where(yn >= 0, yn, NEG_SLOPE * yn)


# --------------------------------- main --------------------------------------

if __name__ == "__main__":
    N, CIN, COUT, H, W = 2, 4, 8, 16, 16
    key = jax.random.PRNGKey(0)
    k = jax.random.split(key, 4)

    x = jax.random.normal(k[0], (N, CIN, H, W), jnp.float32)
    params = {
        "w": 0.3 * jax.random.normal(k[1], (CIN, COUT, 2, 2), jnp.float32),
        "gamma": 1.0 + 0.1 * jax.random.normal(k[2], (COUT,), jnp.float32),
        "beta": 0.1 * jax.random.normal(k[3], (COUT,), jnp.float32),
    }

    fwd = jax.jit(deconv_block)
    out = jax.block_until_ready(fwd(x, params))
    ref = jax.block_until_ready(
        ref_deconv_block(x, params["w"], params["gamma"], params["beta"]))

    assert out.shape == (N, COUT, 2 * H, 2 * W), out.shape
    max_err = float(jnp.max(jnp.abs(out - ref)))
    # Tolerance loosened vs. the pure-f32 version: operands are rounded to bf16
    # before the MXU (accumulation and BN stats remain f32).
    assert jnp.allclose(out, ref, atol=3e-2, rtol=3e-2), max_err
    print("KERNEL_OK")
</pallas_src>

<mosaic_0001>
module attributes {stable_mosaic.version = 11 : i64} {
  func.func @deconv_bn_lrelu_kernel(%arg0: memref<32x64xbf16, #tpu.memory_space<vmem>>, %arg1: memref<64x512xbf16, #tpu.memory_space<vmem>>, %arg2: memref<512x8xf32, #tpu.memory_space<vmem>>, %arg3: memref<8x512xf32, #tpu.memory_space<vmem>>, %arg4: memref<1x8xf32, #tpu.memory_space<vmem>>, %arg5: memref<1x8xf32, #tpu.memory_space<vmem>>, %arg6: memref<32x512xf32, #tpu.memory_space<vmem>>) attributes {dimension_semantics = [], scalar_prefetch = 0 : i64, scratch_operands = 0 : i64, tpu.core_type = #tpu.core_type<tc>} {
    %c0 = arith.constant 0 : index
    %c0_0 = arith.constant 0 : index
    %0 = vector.load %arg0[%c0, %c0_0] : memref<32x64xbf16, #tpu.memory_space<vmem>>, vector<32x64xbf16>
    %c0_1 = arith.constant 0 : index
    %c0_2 = arith.constant 0 : index
    %1 = vector.load %arg1[%c0_1, %c0_2] : memref<64x512xbf16, #tpu.memory_space<vmem>>, vector<64x512xbf16>
    %cst = arith.constant dense<0.000000e+00> : vector<32x512xf32>
    %2 = tpu.matmul %0, %1, %cst {dimension_numbers = #tpu.dot_dimension_numbers<[1], [0], [0], [1], [0, 0, 1, 1], [], []>} : vector<32x64xbf16>, vector<64x512xbf16>, vector<32x512xf32> -> vector<32x512xf32>
    %c0_3 = arith.constant 0 : index
    %c0_4 = arith.constant 0 : index
    %3 = vector.load %arg2[%c0_3, %c0_4] : memref<512x8xf32, #tpu.memory_space<vmem>>, vector<512x8xf32>
    %c0_5 = arith.constant 0 : index
    %c0_6 = arith.constant 0 : index
    %4 = vector.load %arg3[%c0_5, %c0_6] : memref<8x512xf32, #tpu.memory_space<vmem>>, vector<8x512xf32>
    %cst_7 = arith.constant dense<0.000000e+00> : vector<512xf32>
    %5 = vector.multi_reduction <add>, %2, %cst_7 [0] : vector<32x512xf32> to vector<512xf32>
    %6 = vector.shape_cast %5 : vector<512xf32> to vector<1x512xf32>
    %cst_8 = arith.constant dense<0.000000e+00> : vector<1x8xf32>
    %7 = tpu.matmul %6, %3, %cst_8 {dimension_numbers = #tpu.dot_dimension_numbers<[1], [0], [0], [1], [0, 0, 1, 1], [], []>} : vector<1x512xf32>, vector<512x8xf32>, vector<1x8xf32> -> vector<1x8xf32>
    %cst_9 = arith.constant 4.8828125E-4 : f32
    %8 = vector.broadcast %cst_9 : f32 to vector<1x8xf32>
    %9 = arith.mulf %7, %8 : vector<1x8xf32>
    %cst_10 = arith.constant dense<0.000000e+00> : vector<1x512xf32>
    %10 = tpu.matmul %9, %4, %cst_10 {dimension_numbers = #tpu.dot_dimension_numbers<[1], [0], [0], [1], [0, 0, 1, 1], [], []>} : vector<1x8xf32>, vector<8x512xf32>, vector<1x512xf32> -> vector<1x512xf32>
    %11 = vector.broadcast %10 : vector<1x512xf32> to vector<32x512xf32>
    %12 = arith.subf %2, %11 : vector<32x512xf32>
    %13 = arith.mulf %12, %12 : vector<32x512xf32>
    %cst_11 = arith.constant dense<0.000000e+00> : vector<512xf32>
    %14 = vector.multi_reduction <add>, %13, %cst_11 [0] : vector<32x512xf32> to vector<512xf32>
    %15 = vector.shape_cast %14 : vector<512xf32> to vector<1x512xf32>
    %cst_12 = arith.constant dense<0.000000e+00> : vector<1x8xf32>
    %16 = tpu.matmul %15, %3, %cst_12 {dimension_numbers = #tpu.dot_dimension_numbers<[1], [0], [0], [1], [0, 0, 1, 1], [], []>} : vector<1x512xf32>, vector<512x8xf32>, vector<1x8xf32> -> vector<1x8xf32>
    %cst_13 = arith.constant 4.8828125E-4 : f32
    %17 = vector.broadcast %cst_13 : f32 to vector<1x8xf32>
    %18 = arith.mulf %16, %17 : vector<1x8xf32>
    %c0_14 = arith.constant 0 : index
    %c0_15 = arith.constant 0 : index
    %19 = vector.load %arg4[%c0_14, %c0_15] : memref<1x8xf32, #tpu.memory_space<vmem>>, vector<1x8xf32>
    %cst_16 = arith.constant 9.99999974E-6 : f32
    %20 = vector.broadcast %cst_16 : f32 to vector<1x8xf32>
    %21 = arith.addf %18, %20 : vector<1x8xf32>
    %22 = math.rsqrt %21 : vector<1x8xf32>
    %23 = arith.mulf %19, %22 : vector<1x8xf32>
    %c0_17 = arith.constant 0 : index
    %c0_18 = arith.constant 0 : index
    %24 = vector.load %arg5[%c0_17, %c0_18] : memref<1x8xf32, #tpu.memory_space<vmem>>, vector<1x8xf32>
    %25 = arith.mulf %9, %23 : vector<1x8xf32>
    %26 = arith.subf %24, %25 : vector<1x8xf32>
    %27 = tpu.concatenate %23, %26 in 0 : vector<1x8xf32>, vector<1x8xf32> -> vector<2x8xf32>
    %cst_19 = arith.constant dense<0.000000e+00> : vector<2x512xf32>
    %28 = tpu.matmul %27, %4, %cst_19 {dimension_numbers = #tpu.dot_dimension_numbers<[1], [0], [0], [1], [0, 0, 1, 1], [], []>} : vector<2x8xf32>, vector<8x512xf32>, vector<2x512xf32> -> vector<2x512xf32>
    %29 = vector.extract_strided_slice %28 {offsets = [0, 0], sizes = [1, 512], strides = [1, 1]} : vector<2x512xf32> to vector<1x512xf32>
    %30 = vector.broadcast %29 : vector<1x512xf32> to vector<32x512xf32>
    %31 = arith.mulf %2, %30 : vector<32x512xf32>
    %32 = vector.extract_strided_slice %28 {offsets = [1, 0], sizes = [1, 512], strides = [1, 1]} : vector<2x512xf32> to vector<1x512xf32>
    %33 = vector.broadcast %32 : vector<1x512xf32> to vector<32x512xf32>
    %34 = arith.addf %31, %33 : vector<32x512xf32>
    %cst_20 = arith.constant 0.00999999977 : f32
    %35 = vector.broadcast %cst_20 : f32 to vector<32x512xf32>
    %36 = arith.mulf %35, %34 : vector<32x512xf32>
    %37 = arith.maximumf %34, %36 : vector<32x512xf32>
    %c0_21 = arith.constant 0 : index
    %c0_22 = arith.constant 0 : index
    %38 = vector.load %arg6[%c0_21, %c0_22] : memref<32x512xf32, #tpu.memory_space<vmem>>, vector<32x512xf32>
    tpu.vector_store %arg6[%c0_21, %c0_22], %37 {strides = array<i32>} : memref<32x512xf32, #tpu.memory_space<vmem>>, vector<32x512xf32>,
    return
  }
}

</mosaic_0001>

<bundles_post_ra>
// kernel: squeeze.1
= control target key start
LH: loop header
LB: loop body
LE: loop exit
PB: predicated region body
PF: predicated region fallthrough
CT: control target
= control target key end

     0   :  { %s7429_s0 = inlined_call_operand.vmem [shape: bf16[1,16,4,16,16], index: 0, kind: input, shape index: {}]   ;;  %s7430_s1 = inlined_call_operand.vmem [shape: bf16[64,256], index: 1, kind: output, shape index: {}]  }
   0x1   :  { %7435 = sst [smem:[#allocation91_spill]] %s7430_s1 }
   0x2   :  { %v5318_v0 = vld [vmem:[%s7429_s0 + $0xb8] sm:$0xff]   ;;  %v5658_v1 = vld [vmem:[%s7429_s0 + $0xb0] sm:$0xff]   ;;  %v5663_v2 = vld [vmem:[%s7429_s0 + $0xa8] sm:$0xff]   ;;  %s2274_s9 = smov 3  ;;  %s2277_s10 = smov 12  ;;  %vm2165_vm0 = vcmask 1043458  }
   0x3   :  { %v5145_v3 = vunpack.c.h.bf16 %v5318_v0  ;;  %v5149_v4 = vunpack.c.h.bf16 %v5658_v1  ;;  %v5153_v5 = vunpack.c.h.bf16 %v5663_v2  ;;  %v5670_v6 = vld [vmem:[%s7429_s0 + $0xa0] sm:$0xff]   ;;  %v5675_v7 = vld [vmem:[%s7429_s0 + $0x98] sm:$0xff]   ;;  %v5680_v8 = vld [vmem:[%s7429_s0 + $0x90] sm:$0xff]   ;;  %v5144_v32 = vunpack.c.l.bf16 %v5318_v0  ;;  %s2282_s11 = smov 48  ;;  %s2251_s12 = smov 3 }
   0x4   :  { %v5157_v9 = vunpack.c.h.bf16 %v5670_v6  ;;  %v5686_v10 = vld [vmem:[%s7429_s0 + $0x88] sm:$0xff]   ;;  %v5161_v11 = vunpack.c.h.bf16 %v5675_v7  ;;  %v5692_v12 = vld [vmem:[%s7429_s0 + $0x80] sm:$0xff]   ;;  %v5165_v13 = vunpack.c.h.bf16 %v5680_v8  ;;  %v5698_v14 = vld [vmem:[%s7429_s0 + $0x38] sm:$0xff]   ;;  %v5148_v33 = vunpack.c.l.bf16 %v5658_v1  ;;  %s2254_s13 = smov 12  ;;  %s2259_s14 = smov 48 }
   0x5   :  { %1218 = vst [vmem:[#allocation1 + $0x178] sm:$0xff] %v5145_v3  ;;  %v5169_v15 = vunpack.c.h.bf16 %v5686_v10  ;;  %v5704_v16 = vld [vmem:[%s7429_s0 + $0x30] sm:$0xff]   ;;  %v5173_v17 = vunpack.c.h.bf16 %v5692_v12  ;;  %v5710_v18 = vld [vmem:[%s7429_s0 + $0x28] sm:$0xff]   ;;  %v5209_v19 = vunpack.c.h.bf16 %v5698_v14  ;;  %v5716_v20 = vld [vmem:[%s7429_s0 + $0x20] sm:$0xff]   ;;  %v5152_v36 = vunpack.c.l.bf16 %v5663_v2  ;;  %s2287_s15 = smov 192  ;;  %s2264_s16 = smov 192 }
   0x6   :  { %1248 = vst [vmem:[#allocation1 + $0x168] sm:$0xff] %v5149_v4  ;;  %v5213_v21 = vunpack.c.h.bf16 %v5704_v16  ;;  %v5722_v22 = vld [vmem:[%s7429_s0 + $0x18] sm:$0xff]   ;;  %v5217_v23 = vunpack.c.h.bf16 %v5710_v18  ;;  %v5728_v24 = vld [vmem:[%s7429_s0 + $0x10] sm:$0xff]   ;;  %v5221_v25 = vunpack.c.h.bf16 %v5716_v20  ;;  %v5734_v26 = vld [vmem:[%s7429_s0 + $0x8] sm:$0xff]   ;;  %v5156_v37 = vunpack.c.l.bf16 %v5670_v6  ;;  %s5751_s17 = smov 3  ;;  %s5754_s18 = smov 12 }
   0x7   :  { %1278 = vst [vmem:[#allocation1 + $0x158] sm:$0xff] %v5153_v5  ;;  %v5225_v27 = vunpack.c.h.bf16 %v5722_v22  ;;  %v5740_v28 = vld [vmem:[%s7429_s0] sm:$0xff]   ;;  %v5229_v29 = vunpack.c.h.bf16 %v5728_v24  ;;  %v5233_v30 = vunpack.c.h.bf16 %v5734_v26  ;;  %v5160_v38 = vunpack.c.l.bf16 %v5675_v7  ;;  %s5756_s19 = smov 48  ;;  %s5760_s20 = smov 192  ;;  %v5793_v61 = vld [vmem:[%s7429_s0 + $0x1b8] sm:$0xff]   ;;  %v5803_v63 = vld [vmem:[%s7429_s0 + $0x1b0] sm:$0xff]  }
   0x8   :  { %1308 = vst [vmem:[#allocation1 + $0x148] sm:$0xff] %v5157_v9  ;;  %v5237_v31 = vunpack.c.h.bf16 %v5740_v28  ;;  %vm2170_vm1 = vcmask 1045508   ;;  %v5164_v41 = vunpack.c.l.bf16 %v5680_v8  ;;  %v5168_v42 = vunpack.c.l.bf16 %v5686_v10  ;;  %s5762_s21 = smov 3  ;;  %s5765_s22 = smov 12  ;;  %v5814_v1 = vld [vmem:[%s7429_s0 + $0x1a8] sm:$0xff]   ;;  %v5824_v3 = vld [vmem:[%s7429_s0 + $0x1a0] sm:$0xff]  }
   0x9   :  { %1338 = vst [vmem:[#allocation1 + $0x138] sm:$0xff] %v5161_v11  ;;  %vm2175_vm2 = vcmask 1047558   ;;  %v5172_v45 = vunpack.c.l.bf16 %v5692_v12  ;;  %v5208_v46 = vunpack.c.l.bf16 %v5698_v14  ;;  %s5767_s23 = smov 48  ;;  %v5212_v50 = vunpack.c.l.bf16 %v5704_v16  ;;  %s5773_s24 = smov 192  ;;  %v5834_v5 = vld [vmem:[%s7429_s0 + $0x198] sm:$0xff]   ;;  %v5839_v6 = vld [vmem:[%s7429_s0 + $0x190] sm:$0xff]  }
   0xa   :  { %1368 = vst [vmem:[#allocation1 + $0x128] sm:$0xff] %v5165_v13  ;;  %v5216_v54 = vunpack.c.l.bf16 %v5710_v18  ;;  %s5775_s25 = smov 3  ;;  %v5220_v56 = vunpack.c.l.bf16 %v5716_v20  ;;  %s5779_s26 = smov 12  ;;  %v5224_v58 = vunpack.c.l.bf16 %v5722_v22  ;;  %v5228_v60 = vunpack.c.l.bf16 %v5728_v24  ;;  %v5859_v12 = vld [vmem:[%s7429_s0 + $0x188] sm:$0xff]   ;;  %v5871_v16 = vld [vmem:[%s7429_s0 + $0x180] sm:$0xff]  }
   0xb   :  { %1398 = vst [vmem:[#allocation1 + $0x118] sm:$0xff] %v5169_v15  ;;  %s5781_s27 = smov 48  ;;  %s5785_s28 = smov 192  ;;  %v5232_v62 = vunpack.c.l.bf16 %v5734_v26  ;;  %v5236_v0 = vunpack.c.l.bf16 %v5740_v28  ;;  %v5017_v2 = vunpack.c.h.bf16 %v5793_v61  ;;  %v5021_v4 = vunpack.c.h.bf16 %v5803_v63  ;;  %v5917_v26 = vld [vmem:[%s7429_s0 + $0x118] sm:$0xff]  }
   0xc   :  { %1428 = vst [vmem:[#allocation1 + $0x108] sm:$0xff] %v5173_v17  ;;  %s5787_s29 = smov 3  ;;  %s5795_s3 = smov 12  ;;  %v5025_v9 = vunpack.c.h.bf16 %v5814_v1  ;;  %v5029_v10 = vunpack.c.h.bf16 %v5824_v3  ;;  %v5033_v11 = vunpack.c.h.bf16 %v5834_v5  ;;  %v5037_v15 = vunpack.c.h.bf16 %v5839_v6  ;;  %v5880_v17 = vld [vmem:[%s7429_s0 + $0x138] sm:$0xff]  }
   0xd   :  { %1698 = vst [vmem:[#allocation1 + $0x78] sm:$0xff] %v5209_v19  ;;  %s5797_s4 = smov 48  ;;  %s5805_s7 = smov 192  ;;  %v5041_v18 = vunpack.c.h.bf16 %v5859_v12  ;;  %v5890_v19 = vld [vmem:[%s7429_s0 + $0x130] sm:$0xff]   ;;  %v5045_v22 = vunpack.c.h.bf16 %v5871_v16  ;;  %v5081_v24 = vunpack.c.h.bf16 %v5880_v17  ;;  %vm1924_vm3 = vcmask 1047556  }
   0xe   :  { %1728 = vst [vmem:[#allocation1 + $0x68] sm:$0xff] %v5213_v21  ;;  %s5807_s8 = smov 3  ;;  %s5828_s30 = smov 3  ;;  %vm1926_vm4 = vcmask 130048   ;;  %vm2179_vm5 = vcmask 1048448   ;;  %vm2546_vm6 = vcmask 917248  }
   0xf   :  { %1758 = vst [vmem:[#allocation1 + $0x58] sm:$0xff] %v5217_v23  ;;  %s5861_s6 = smov 48  ;;  %s5873_s5 = smov 3  ;;  %v5902_v23 = vld [vmem:[%s7429_s0 + $0x128] sm:$0xff]   ;;  %vm2913_vm7 = vcmask 786048   ;;  %vm3280_vm8 = vcmask 654848  }
  0x10   :  { %1788 = vst [vmem:[#allocation1 + $0x48] sm:$0xff] %v5221_v25  ;;  %s5884_s2 = smov 192  ;;  %s5892_s1 = smov 3  ;;  %v5912_v25 = vld [vmem:[%s7429_s0 + $0x120] sm:$0xff]   ;;  %vm3647_vm9 = vcmask 523648   ;;  %vm4014_vm10 = vcmask 392448  }
  0x11   :  { %1818 = vst [vmem:[#allocation1 + $0x38] sm:$0xff] %v5225_v27  ;;  %7437 = sst [smem:[#allocation3_spill]] %s5892_s1  ;;  %s5977_s1 = smov 12  ;;  %vm4381_vm11 = vcmask 261248  }
  0x12   :  { %1848 = vst [vmem:[#allocation1 + $0x28] sm:$0xff] %v5229_v29 }
  0x13   :  { %1878 = vst [vmem:[#allocation1 + $0x18] sm:$0xff] %v5233_v30  ;;  %v2275_v34 = vld [vmem:[#allocation1 + $0x10f] ss:$16 sm:%s2274_s9]   ;;  %s7431_s9 = smov 112   ;;  %v5085_v30 = vunpack.c.h.bf16 %v5890_v19 }
  0x14   :  { %v2278_v35 = vld [vmem:[#allocation1 + $0x10f] ss:$16 sm:%s2277_s10]   ;;  %1908 = vst [vmem:[#allocation1 + $0x8] sm:$0xff] %v5237_v31  ;;  %s5863_s10 = smov 192 }
  0x15   :  { %1233 = vst [vmem:[#allocation1 + $0x170] sm:$0xff] %v5144_v32  ;;  %v2280_v39 = vsel %vm2165_vm0, %v2278_v35, %v2275_v34  ;;  %v2283_v40 = vld [vmem:[#allocation1 + $0x10f] ss:$16 sm:%s2282_s11]   ;;  %s5841_s11 = smov 12  ;;  %7436 = sst [smem:[#allocation2_spill]] %s5863_s10  ;;  %v5089_v34 = vunpack.c.h.bf16 %v5902_v23  ;;  %v5934_v35 = vld [vmem:[%s7429_s0 + $0x110] sm:$0xff]  }
  0x16   :  { %1263 = vst [vmem:[#allocation1 + $0x160] sm:$0xff] %v5148_v33  ;;  %v2285_v43 = vsel %vm2170_vm1, %v2283_v40, %v2280_v39  ;;  %v2288_v44 = vld [vmem:[#allocation1 + $0x10f] ss:$16 sm:%s2287_s15]   ;;  %s5853_s15 = smov 12  ;;  %s5894_s10 = smov 12  ;;  %v5097_v40 = vunpack.c.h.bf16 %v5917_v26 }
  0x17   :  { %1293 = vst [vmem:[#allocation1 + $0x150] sm:$0xff] %v5152_v36  ;;  %v2290_v53 = vsel %vm2175_vm2, %v2288_v44, %v2285_v43  ;;  %7438 = sst [smem:[#allocation4_spill]] %s5894_s10  ;;  %s5904_s10 = smov 48  ;;  %v5101_v43 = vunpack.c.h.bf16 %v5934_v35 }
  0x18   :  { %1323 = vst [vmem:[#allocation1 + $0x140] sm:$0xff] %v5156_v37  ;;  %7439 = sst [smem:[#allocation5_spill]] %s5904_s10  ;;  %s5919_s10 = smov 3  ;;  %v5093_v37 = vunpack.c.h.bf16 %v5912_v25 }
  0x19   :  { %1353 = vst [vmem:[#allocation1 + $0x130] sm:$0xff] %v5160_v38  ;;  %7441 = sst [smem:[#allocation7_spill]] %s5919_s10  ;;  %v5945_v38 = vld [vmem:[%s7429_s0 + $0x108] sm:$0xff]   ;;  %s5994_s10 = smov 192 }
  0x1a   :  { %1383 = vst [vmem:[#allocation1 + $0x120] sm:$0xff] %v5164_v41  ;;  %v5956_v41 = vld [vmem:[%s7429_s0 + $0x100] sm:$0xff]   ;;  %v5105_v44 = vunpack.c.h.bf16 %v5945_v38  ;;  %7454 = sst [smem:[#allocation19_spill]] %s5994_s10  ;;  %s5997_s10 = smov 3 }
  0x1b   :  { %v2252_v47 = vld [vmem:[#allocation1 + $0xf] ss:$16 sm:%s2251_s12]   ;;  %1413 = vst [vmem:[#allocation1 + $0x110] sm:$0xff] %v5168_v42  ;;  %s5816_s12 = smov 12  ;;  %7455 = sst [smem:[#allocation20_spill]] %s5997_s10 }
  0x1c   :  { %v2255_v48 = vld [vmem:[#allocation1 + $0xf] ss:$16 sm:%s2254_s13]   ;;  %1443 = vst [vmem:[#allocation1 + $0x100] sm:$0xff] %v5172_v45  ;;  %s5818_s13 = smov 48  ;;  %v5109_v45 = vunpack.c.h.bf16 %v5956_v41  ;;  %s5999_s10 = smov 12 }
  0x1d   :  { %v2260_v49 = vld [vmem:[#allocation1 + $0xf] ss:$16 sm:%s2259_s14]   ;;  %v2257_v51 = vsel %vm2165_vm0, %v2255_v48, %v2252_v47  ;;  %1713 = vst [vmem:[#allocation1 + $0x70] sm:$0xff] %v5208_v46  ;;  %s5843_s14 = smov 48  ;;  %v5016_v46 = vunpack.c.l.bf16 %v5793_v61  ;;  %v5020_v47 = vunpack.c.l.bf16 %v5803_v63 }
  0x1e   :  { %v2265_v52 = vld [vmem:[#allocation1 + $0xf] ss:$16 sm:%s2264_s16]   ;;  %v2262_v55 = vsel %vm2170_vm1, %v2260_v49, %v2257_v51  ;;  %1743 = vst [vmem:[#allocation1 + $0x60] sm:$0xff] %v5212_v50  ;;  %s5826_s16 = smov 192  ;;  %v5024_v50 = vunpack.c.l.bf16 %v5814_v1  ;;  %v5028_v51 = vunpack.c.l.bf16 %v5824_v3 }
  0x1f   :  { %v2267_v57 = vsel %vm2175_vm2, %v2265_v52, %v2262_v55  ;;  %1773 = vst [vmem:[#allocation1 + $0x50] sm:$0xff] %v5216_v54  ;;  %v5032_v52 = vunpack.c.l.bf16 %v5834_v5  ;;  %v5036_v55 = vunpack.c.l.bf16 %v5839_v6  ;;  %v5092_v6 = vunpack.c.l.bf16 %v5912_v25 }
  0x20   :  { %v5365_v59 = vpack.i.bf16 %v2290_v53, %v2267_v57  ;;  %1803 = vst [vmem:[#allocation1 + $0x40] sm:$0xff] %v5220_v56  ;;  %v5040_v56 = vunpack.c.l.bf16 %v5859_v12  ;;  %v5104_v12 = vunpack.c.l.bf16 %v5945_v38 }
  0x21   :  { %1833 = vst [vmem:[#allocation1 + $0x30] sm:$0xff] %v5224_v58 }
  0x22   :  { %5366 = vrot.lane.b32.xlu1 %v5365_v59, %s7431_s9  ;;  %1863 = vst [vmem:[#allocation1 + $0x20] sm:$0xff] %v5228_v60  ;;  %s5882_s9 = smov 48  ;;  %v5044_v59 = vunpack.c.l.bf16 %v5871_v16  ;;  %v5080_v60 = vunpack.c.l.bf16 %v5880_v17  ;;  %v6088_v17 = vld [vmem:[%s7429_s0 + $0xe0] sm:$0xff]  }
  0x23   :  { %1893 = vst [vmem:[#allocation1 + $0x10] sm:$0xff] %v5232_v62  ;;  %v2183_v7 = vld [vmem:[#allocation1 + $0x107] ss:$16 sm:%s5762_s21]   ;;  %s5848_s21 = smov 192 }
  0x24   :  { %v2186_v8 = vld [vmem:[#allocation1 + $0x107] ss:$16 sm:%s5765_s22]   ;;  %1921 = vst [vmem:[#allocation1] sm:$0xff] %v5236_v0  ;;  %s5851_s22 = smov 3  ;;  %v5084_v0 = vunpack.c.l.bf16 %v5890_v19  ;;  %v6098_v19 = vld [vmem:[%s7429_s0 + $0xd8] sm:$0xff]  }
  0x25   :  { %258 = vst [vmem:[#allocation1 + $0x378] sm:$0xff] %v5017_v2  ;;  %v2188_v13 = vsel %vm2165_vm0, %v2186_v8, %v2183_v7  ;;  %v2191_v14 = vld [vmem:[#allocation1 + $0x107] ss:$16 sm:%s5767_s23]   ;;  %s5875_s23 = smov 12  ;;  %v5096_v8 = vunpack.c.l.bf16 %v5917_v26  ;;  %v5129_v25 = vunpack.c.h.bf16 %v6098_v19  ;;  %v6123_v26 = vld [vmem:[%s7429_s0 + $0xc8] sm:$0xff]   ;;  %v5128_v19 = vunpack.c.l.bf16 %v6098_v19 }
  0x26   :  { %288 = vst [vmem:[#allocation1 + $0x368] sm:$0xff] %v5021_v4  ;;  %v2193_v20 = vsel %vm2170_vm1, %v2191_v14, %v2188_v13  ;;  %v2196_v21 = vld [vmem:[#allocation1 + $0x107] ss:$16 sm:%s5773_s24]   ;;  %s5906_s24 = smov 192  ;;  %v5088_v4 = vunpack.c.l.bf16 %v5902_v23  ;;  %v5108_v14 = vunpack.c.l.bf16 %v5956_v41 }
  0x27   :  { %318 = vst [vmem:[#allocation1 + $0x358] sm:$0xff] %v5025_v9  ;;  %7440 = sst [smem:[#allocation6_spill]] %s5906_s24  ;;  %s5921_s24 = smov 12  ;;  %v2198_v33 = vsel %vm2175_vm2, %v2196_v21, %v2193_v20  ;;  %v6067_v13 = vld [vmem:[%s7429_s0 + $0xf0] sm:$0xff]  }
  0x28   :  { %348 = vst [vmem:[#allocation1 + $0x348] sm:$0xff] %v5029_v10  ;;  %7442 = sst [smem:[#allocation8_spill]] %s5921_s24  ;;  %s5984_s24 = smov 3  ;;  %v5100_v10 = vunpack.c.l.bf16 %v5934_v35  ;;  %v6103_v20 = vld [vmem:[%s7429_s0 + $0xd0] sm:$0xff]  }
  0x29   :  { %378 = vst [vmem:[#allocation1 + $0x338] sm:$0xff] %v5033_v11  ;;  %v6057_v11 = vld [vmem:[%s7429_s0 + $0xf8] sm:$0xff]  }
  0x2a   :  { %408 = vst [vmem:[#allocation1 + $0x328] sm:$0xff] %v5037_v15  ;;  %v6078_v15 = vld [vmem:[%s7429_s0 + $0xe8] sm:$0xff]   ;;  %v5113_v16 = vunpack.c.h.bf16 %v6057_v11  ;;  %v5112_v11 = vunpack.c.l.bf16 %v6057_v11 }
  0x2b   :  { %v2161_v27 = vld [vmem:[#allocation1 + $0x7] ss:$16 sm:%s5751_s17]   ;;  %438 = vst [vmem:[#allocation1 + $0x318] sm:$0xff] %v5041_v18  ;;  %s5947_s17 = smov 3  ;;  %v5117_v18 = vunpack.c.h.bf16 %v6067_v13  ;;  %v5121_v23 = vunpack.c.h.bf16 %v6078_v15  ;;  %v5116_v13 = vunpack.c.l.bf16 %v6067_v13  ;;  %v5120_v15 = vunpack.c.l.bf16 %v6078_v15 }
  0x2c   :  { %v2164_v28 = vld [vmem:[#allocation1 + $0x7] ss:$16 sm:%s5754_s18]   ;;  %468 = vst [vmem:[#allocation1 + $0x308] sm:$0xff] %v5045_v22  ;;  %7445 = sst [smem:[#allocation11_spill]] %s5947_s17  ;;  %s5949_s18 = smov 12 }
  0x2d   :  { %v2169_v29 = vld [vmem:[#allocation1 + $0x7] ss:$16 sm:%s5756_s19]   ;;  %v2166_v31 = vsel %vm2165_vm0, %v2164_v28, %v2161_v27  ;;  %s5936_s19 = smov 48  ;;  %7446 = sst [smem:[#allocation12_spill]] %s5949_s18  ;;  %738 = vst [vmem:[#allocation1 + $0x278] sm:$0xff] %v5081_v24  ;;  %v5125_v24 = vunpack.c.h.bf16 %v6088_v17  ;;  %v5124_v17 = vunpack.c.l.bf16 %v6088_v17 }
  0x2e   :  { %v2174_v32 = vld [vmem:[#allocation1 + $0x7] ss:$16 sm:%s5760_s20]   ;;  %7443 = sst [smem:[#allocation9_spill]] %s5936_s19  ;;  %s5938_s20 = smov 192  ;;  %v2171_v36 = vsel %vm2170_vm1, %v2169_v29, %v2166_v31  ;;  %768 = vst [vmem:[#allocation1 + $0x268] sm:$0xff] %v5085_v30  ;;  %v5133_v29 = vunpack.c.h.bf16 %v6103_v20  ;;  %v6144_v31 = vld [vmem:[%s7429_s0 + $0x78] sm:$0xff]   ;;  %v5132_v20 = vunpack.c.l.bf16 %v6103_v20 }
  0x2f   :  { %7444 = sst [smem:[#allocation10_spill]] %s5938_s20  ;;  %v2176_v39 = vsel %vm2175_vm2, %v2174_v32, %v2171_v36  ;;  %s5958_s17 = smov 48  ;;  %798 = vst [vmem:[#allocation1 + $0x258] sm:$0xff] %v5089_v34  ;;  %v6135_v30 = vld [vmem:[%s7429_s0 + $0xc0] sm:$0xff]   ;;  %v5137_v32 = vunpack.c.h.bf16 %v6123_v26  ;;  %v5177_v38 = vunpack.c.h.bf16 %v6144_v31  ;;  %v5136_v26 = vunpack.c.l.bf16 %v6123_v26 }
  0x30   :  { %7447 = sst [smem:[#allocation13_spill]] %s5958_s17  ;;  %s5960_s18 = smov 192  ;;  %v5355_v42 = vpack.i.bf16 %v2198_v33, %v2176_v39  ;;  %828 = vst [vmem:[#allocation1 + $0x248] sm:$0xff] %v5093_v37  ;;  %v6154_v33 = vld [vmem:[%s7429_s0 + $0x70] sm:$0xff]   ;;  %v5141_v36 = vunpack.c.h.bf16 %v6135_v30  ;;  %v6166_v37 = vld [vmem:[%s7429_s0 + $0x68] sm:$0xff]   ;;  %v6176_v39 = vld [vmem:[%s7429_s0 + $0x60] sm:$0xff]   ;;  %v5140_v30 = vunpack.c.l.bf16 %v6135_v30  ;;  %v5176_v31 = vunpack.c.l.bf16 %v6144_v31 }
  0x31   :  { %7448 = sst [smem:[#allocation14_spill]] %s5960_s18  ;;  %s5963_s18 = smov 3  ;;  %858 = vst [vmem:[#allocation1 + $0x238] sm:$0xff] %v5097_v40  ;;  %v6181_v40 = vld [vmem:[%s7429_s0 + $0x58] sm:$0xff]  }
  0x32   :  { %7449 = sst [smem:[#allocation15_spill]] %s5963_s18  ;;  %s5965_s17 = smov 12  ;;  %888 = vst [vmem:[#allocation1 + $0x228] sm:$0xff] %v5101_v43 }
  0x33   :  { %7450 = sst [smem:[#allocation16_spill]] %s5965_s17  ;;  %s5968_s17 = smov 48  ;;  %918 = vst [vmem:[#allocation1 + $0x218] sm:$0xff] %v5105_v44  ;;  %v2321_v48 = vld [vmem:[#allocation1 + $0x30f] ss:$16 sm:%s5787_s29]   ;;  %v5181_v44 = vunpack.c.h.bf16 %v6154_v33  ;;  %v5180_v33 = vunpack.c.l.bf16 %v6154_v33 }
  0x34   :  { %7451 = sst [smem:[#allocation17_spill]] %s5968_s17  ;;  %s5970_s17 = smov 192  ;;  %v2324_v49 = vld [vmem:[#allocation1 + $0x30f] ss:$16 sm:%s5795_s3]   ;;  %948 = vst [vmem:[#allocation1 + $0x208] sm:$0xff] %v5109_v45 }
  0x35   :  { %7452 = sst [smem:[#allocation18_spill]] %s5970_s17  ;;  %s7453_s17 = smov 112   ;;  %273 = vst [vmem:[#allocation1 + $0x370] sm:$0xff] %v5016_v46  ;;  %v2326_v53 = vsel %vm2165_vm0, %v2324_v49, %v2321_v48  ;;  %v2329_v54 = vld [vmem:[#allocation1 + $0x30f] ss:$16 sm:%s5797_s4]   ;;  %v5185_v48 = vunpack.c.h.bf16 %v6166_v37  ;;  %v6198_v49 = vld [vmem:[%s7429_s0 + $0x50] sm:$0xff]   ;;  %v5184_v37 = vunpack.c.l.bf16 %v6166_v37 }
  0x36   :  { %5356 = vrot.lane.b32.xlu0 %v5355_v42, %s7453_s17  ;;  %s5974_s18 = smov 3  ;;  %s5979_s20 = smov 48  ;;  %303 = vst [vmem:[#allocation1 + $0x360] sm:$0xff] %v5020_v47  ;;  %v2331_v57 = vsel %vm2170_vm1, %v2329_v54, %v2326_v53  ;;  %v2334_v58 = vld [vmem:[#allocation1 + $0x30f] ss:$16 sm:%s5805_s7]   ;;  %v5193_v54 = vunpack.c.h.bf16 %v6181_v40  ;;  %v5192_v40 = vunpack.c.l.bf16 %v6181_v40 }
  0x37   :  { %s5982_s19 = smov 192  ;;  %s5989_s29 = smov 12  ;;  %333 = vst [vmem:[#allocation1 + $0x350] sm:$0xff] %v5024_v50  ;;  %v2336_v3 = vsel %vm2175_vm2, %v2334_v58, %v2331_v57  ;;  %v5197_v57 = vunpack.c.h.bf16 %v6198_v49  ;;  %v6228_v58 = vld [vmem:[%s7429_s0 + $0x1f8] sm:$0xff]   ;;  %v5196_v49 = vunpack.c.l.bf16 %v6198_v49 }
  0x38   :  { %s5992_s3 = smov 48  ;;  %s6004_s4 = smov 48  ;;  %363 = vst [vmem:[#allocation1 + $0x340] sm:$0xff] %v5028_v51  ;;  %v5189_v51 = vunpack.c.h.bf16 %v6176_v39  ;;  %v5188_v39 = vunpack.c.l.bf16 %v6176_v39 }
  0x39   :  { %7456 = sst [smem:[#allocation21_spill]] %s6004_s4  ;;  %s6006_s4 = smov 192  ;;  %393 = vst [vmem:[#allocation1 + $0x330] sm:$0xff] %v5032_v52  ;;  %v6207_v52 = vld [vmem:[%s7429_s0 + $0x48] sm:$0xff]  }
  0x3a   :  { %7457 = sst [smem:[#allocation22_spill]] %s6006_s4  ;;  %s6008_s4 = smov 3  ;;  %423 = vst [vmem:[#allocation1 + $0x320] sm:$0xff] %v5036_v55  ;;  %v6218_v55 = vld [vmem:[%s7429_s0 + $0x40] sm:$0xff]  }
  0x3b   :  { %7458 = sst [smem:[#allocation23_spill]] %s6008_s4  ;;  %s6010_s4 = smov 12  ;;  %v2298_v61 = vld [vmem:[#allocation1 + $0x20f] ss:$16 sm:%s5775_s25]   ;;  %453 = vst [vmem:[#allocation1 + $0x310] sm:$0xff] %v5040_v56 }
  0x3c   :  { %7459 = sst [smem:[#allocation24_spill]] %s6010_s4  ;;  %s6013_s4 = smov 48  ;;  %v2301_v62 = vld [vmem:[#allocation1 + $0x20f] ss:$16 sm:%s5779_s26]   ;;  %483 = vst [vmem:[#allocation1 + $0x300] sm:$0xff] %v5044_v59  ;;  %v5201_v59 = vunpack.c.h.bf16 %v6207_v52  ;;  %v5200_v52 = vunpack.c.l.bf16 %v6207_v52 }
  0x3d   :  { %7460 = sst [smem:[#allocation25_spill]] %s6013_s4  ;;  %s6015_s4 = smov 192  ;;  %v2306_v63 = vld [vmem:[#allocation1 + $0x20f] ss:$16 sm:%s5781_s27]   ;;  %v2303_v1 = vsel %vm2165_vm0, %v2301_v62, %v2298_v61  ;;  %753 = vst [vmem:[#allocation1 + $0x270] sm:$0xff] %v5080_v60  ;;  %v6238_v60 = vld [vmem:[%s7429_s0 + $0x1f0] sm:$0xff]   ;;  %v5205_v61 = vunpack.c.h.bf16 %v6218_v55  ;;  %v5204_v55 = vunpack.c.l.bf16 %v6218_v55 }
  0x3e   :  { %s6020_s7 = smov 3  ;;  %v2311_v2 = vld [vmem:[#allocation1 + $0x20f] ss:$16 sm:%s5785_s28]   ;;  %s6037_s25 = smov 3  ;;  %v2308_v5 = vsel %vm2170_vm1, %v2306_v63, %v2303_v1  ;;  %783 = vst [vmem:[#allocation1 + $0x260] sm:$0xff] %v5084_v0  ;;  %v4985_v63 = vunpack.c.h.bf16 %v6228_v58  ;;  %v6259_v0 = vld [vmem:[%s7429_s0 + $0x1e0] sm:$0xff]   ;;  %v4989_v1 = vunpack.c.h.bf16 %v6238_v60  ;;  %v4984_v58 = vunpack.c.l.bf16 %v6228_v58 }
  0x3f   :  { %7461 = sst [smem:[#allocation26_spill]] %s6020_s7  ;;  %s6022_s7 = smov 12  ;;  %v2313_v7 = vsel %vm2175_vm2, %v2311_v2, %v2308_v5  ;;  %813 = vst [vmem:[#allocation1 + $0x250] sm:$0xff] %v5088_v4  ;;  %v6249_v62 = vld [vmem:[%s7429_s0 + $0x1e8] sm:$0xff]   ;;  %v6269_v2 = vld [vmem:[%s7429_s0 + $0x1d8] sm:$0xff]   ;;  %v4988_v60 = vunpack.c.l.bf16 %v6238_v60 }
  0x40   :  { %7462 = sst [smem:[#allocation27_spill]] %s6022_s7  ;;  %s6025_s7 = smov 48  ;;  %v5370_v9 = vpack.i.bf16 %v2336_v3, %v2313_v7  ;;  %843 = vst [vmem:[#allocation1 + $0x240] sm:$0xff] %v5092_v6  ;;  %v6274_v3 = vld [vmem:[%s7429_s0 + $0x1d0] sm:$0xff]   ;;  %v4993_v6 = vunpack.c.h.bf16 %v6249_v62  ;;  %v4997_v7 = vunpack.c.h.bf16 %v6259_v0  ;;  %v4992_v62 = vunpack.c.l.bf16 %v6249_v62 }
  0x41   :  { %7463 = sst [smem:[#allocation28_spill]] %s6025_s7  ;;  %s6027_s7 = smov 192  ;;  %873 = vst [vmem:[#allocation1 + $0x230] sm:$0xff] %v5096_v8  ;;  %v5001_v8 = vunpack.c.h.bf16 %v6269_v2  ;;  %v4996_v0 = vunpack.c.l.bf16 %v6259_v0  ;;  %v5000_v2 = vunpack.c.l.bf16 %v6269_v2 }
  0x42   :  { %7464 = sst [smem:[#allocation29_spill]] %s6027_s7  ;;  %s6039_s26 = smov 12  ;;  %5371 = vrot.lane.b32.xlu1 %v5370_v9, %s7453_s17  ;;  %903 = vst [vmem:[#allocation1 + $0x220] sm:$0xff] %v5100_v10  ;;  %v6294_v9 = vld [vmem:[%s7429_s0 + $0x1c8] sm:$0xff]  }
  0x43   :  { %s6043_s27 = smov 48  ;;  %s6045_s28 = smov 192  ;;  %933 = vst [vmem:[#allocation1 + $0x210] sm:$0xff] %v5104_v12  ;;  %v2229_v21 = vld [vmem:[#allocation1 + $0x307] ss:$16 sm:%s5828_s30]  }
  0x44   :  { %7465 = sst [smem:[#allocation30_spill]] %s6045_s28  ;;  %s6049_s7 = smov 3  ;;  %v2232_v22 = vld [vmem:[#allocation1 + $0x307] ss:$16 sm:%s5841_s11]   ;;  %963 = vst [vmem:[#allocation1 + $0x200] sm:$0xff] %v5108_v14  ;;  %v5005_v14 = vunpack.c.h.bf16 %v6274_v3  ;;  %v5004_v3 = vunpack.c.l.bf16 %v6274_v3 }
  0x45   :  { %7466 = sst [smem:[#allocation31_spill]] %s6049_s7  ;;  %s6051_s7 = smov 12  ;;  %978 = vst [vmem:[#allocation1 + $0x1f8] sm:$0xff] %v5113_v16  ;;  %v2234_v27 = vsel %vm2165_vm0, %v2232_v22, %v2229_v21  ;;  %v2237_v28 = vld [vmem:[#allocation1 + $0x307] ss:$16 sm:%s5843_s14]   ;;  %v5009_v21 = vunpack.c.h.bf16 %v6294_v9  ;;  %v5008_v9 = vunpack.c.l.bf16 %v6294_v9 }
  0x46   :  { %7467 = sst [smem:[#allocation32_spill]] %s6051_s7  ;;  %s6059_s7 = smov 48  ;;  %1008 = vst [vmem:[#allocation1 + $0x1e8] sm:$0xff] %v5117_v18  ;;  %v2239_v34 = vsel %vm2170_vm1, %v2237_v28, %v2234_v27  ;;  %v2242_v35 = vld [vmem:[#allocation1 + $0x307] ss:$16 sm:%s5848_s21]   ;;  %v6315_v18 = vld [vmem:[%s7429_s0 + $0x178] sm:$0xff]  }
  0x47   :  { %7468 = sst [smem:[#allocation33_spill]] %s6059_s7  ;;  %s6061_s28 = smov 192  ;;  %1038 = vst [vmem:[#allocation1 + $0x1d8] sm:$0xff] %v5121_v23  ;;  %v2244_v47 = vsel %vm2175_vm2, %v2242_v35, %v2239_v34  ;;  %v6306_v16 = vld [vmem:[%s7429_s0 + $0x1c0] sm:$0xff]   ;;  %v6325_v22 = vld [vmem:[%s7429_s0 + $0x170] sm:$0xff]   ;;  %v6337_v27 = vld [vmem:[%s7429_s0 + $0x168] sm:$0xff]   ;;  %v5049_v28 = vunpack.c.h.bf16 %v6315_v18  ;;  %v5048_v18 = vunpack.c.l.bf16 %v6315_v18 }
  0x48   :  { %7469 = sst [smem:[#allocation34_spill]] %s6061_s28  ;;  %s6069_s7 = smov 3  ;;  %1068 = vst [vmem:[#allocation1 + $0x1c8] sm:$0xff] %v5125_v24  ;;  %v6357_v34 = vld [vmem:[%s7429_s0 + $0x150] sm:$0xff]  }
  0x49   :  { %7470 = sst [smem:[#allocation35_spill]] %s6069_s7  ;;  %s6071_s28 = smov 12  ;;  %1098 = vst [vmem:[#allocation1 + $0x1b8] sm:$0xff] %v5129_v25  ;;  %v5013_v25 = vunpack.c.h.bf16 %v6306_v16  ;;  %v5012_v16 = vunpack.c.l.bf16 %v6306_v16 }
  0x4a   :  { %7471 = sst [smem:[#allocation36_spill]] %s6071_s28  ;;  %s6080_s7 = smov 48  ;;  %1128 = vst [vmem:[#allocation1 + $0x1a8] sm:$0xff] %v5133_v29  ;;  %v6347_v29 = vld [vmem:[%s7429_s0 + $0x160] sm:$0xff]  }
  0x4b   :  { %7472 = sst [smem:[#allocation37_spill]] %s6080_s7  ;;  %s6082_s28 = smov 192  ;;  %v2206_v41 = vld [vmem:[#allocation1 + $0x207] ss:$16 sm:%s5807_s8]   ;;  %1158 = vst [vmem:[#allocation1 + $0x198] sm:$0xff] %v5137_v32  ;;  %v6352_v32 = vld [vmem:[%s7429_s0 + $0x158] sm:$0xff]  }
  0x4c   :  { %7473 = sst [smem:[#allocation38_spill]] %s6082_s28  ;;  %s6090_s7 = smov 3  ;;  %v2209_v42 = vld [vmem:[#allocation1 + $0x207] ss:$16 sm:%s5816_s12]   ;;  %1188 = vst [vmem:[#allocation1 + $0x188] sm:$0xff] %v5141_v36 }
  0x4d   :  { %7474 = sst [smem:[#allocation39_spill]] %s6090_s7  ;;  %s6092_s28 = smov 12  ;;  %v2214_v43 = vld [vmem:[#allocation1 + $0x207] ss:$16 sm:%s5818_s13]   ;;  %v2211_v45 = vsel %vm2165_vm0, %v2209_v42, %v2206_v41  ;;  %1458 = vst [vmem:[#allocation1 + $0xf8] sm:$0xff] %v5177_v38  ;;  %v5053_v41 = vunpack.c.h.bf16 %v6325_v22  ;;  %v6370_v42 = vld [vmem:[%s7429_s0 + $0x148] sm:$0xff]   ;;  %v5052_v22 = vunpack.c.l.bf16 %v6325_v22 }
  0x4e   :  { %7475 = sst [smem:[#allocation40_spill]] %s6092_s28  ;;  %s6105_s7 = smov 48  ;;  %v2219_v46 = vld [vmem:[#allocation1 + $0x207] ss:$16 sm:%s5826_s16]   ;;  %v2216_v50 = vsel %vm2170_vm1, %v2214_v43, %v2211_v45  ;;  %1488 = vst [vmem:[#allocation1 + $0xe8] sm:$0xff] %v5181_v44 }
  0x4f   :  { %7476 = sst [smem:[#allocation41_spill]] %s6105_s7  ;;  %s6107_s28 = smov 192  ;;  %v2221_v53 = vsel %vm2175_vm2, %v2219_v46, %v2216_v50  ;;  %1518 = vst [vmem:[#allocation1 + $0xd8] sm:$0xff] %v5185_v48  ;;  %v5057_v46 = vunpack.c.h.bf16 %v6337_v27  ;;  %v5061_v50 = vunpack.c.h.bf16 %v6347_v29  ;;  %v5056_v27 = vunpack.c.l.bf16 %v6337_v27 }
  0x50   :  { %7477 = sst [smem:[#allocation42_spill]] %s6107_s28  ;;  %s6112_s30 = smov 3  ;;  %v5360_v56 = vpack.i.bf16 %v2244_v47, %v2221_v53  ;;  %1548 = vst [vmem:[#allocation1 + $0xc8] sm:$0xff] %v5189_v51  ;;  %v6379_v47 = vld [vmem:[%s7429_s0 + $0x140] sm:$0xff]   ;;  %v5060_v29 = vunpack.c.l.bf16 %v6347_v29 }
  0x51   :  { %7478 = sst [smem:[#allocation43_spill]] %s6112_s30  ;;  %s6115_s11 = smov 12  ;;  %1578 = vst [vmem:[#allocation1 + $0xb8] sm:$0xff] %v5193_v54  ;;  %v2573_v51 = vld [vmem:[#allocation1 + $0x206] ss:$16 sm:%s5974_s18]  }
  0x52   :  { %7479 = sst [smem:[#allocation44_spill]] %s6115_s11  ;;  %s6117_s28 = smov 48  ;;  %5361 = vrot.lane.b32.xlu0 %v5360_v56, %s7453_s17  ;;  %1608 = vst [vmem:[#allocation1 + $0xa8] sm:$0xff] %v5197_v57  ;;  %v2576_v53 = vld [vmem:[#allocation1 + $0x206] ss:$16 sm:%s5977_s1]   ;;  %v5065_v56 = vunpack.c.h.bf16 %v6352_v32  ;;  %v5064_v32 = vunpack.c.l.bf16 %v6352_v32 }
  0x53   :  { %7480 = sst [smem:[#allocation45_spill]] %s6117_s28  ;;  %s6125_s7 = smov 192  ;;  %1638 = vst [vmem:[#allocation1 + $0x98] sm:$0xff] %v5201_v59  ;;  %v2459_v4 = vld [vmem:[#allocation1 + $0x18f] ss:$16 sm:%s5873_s5]   ;;  %v2578_v57 = vsel %vm2165_vm0, %v2576_v53, %v2573_v51 }
  0x54   :  { %7481 = sst [smem:[#allocation46_spill]] %s6125_s7  ;;  %s6127_s28 = smov 3  ;;  %v2462_v5 = vld [vmem:[#allocation1 + $0x18f] ss:$16 sm:%s5875_s23]   ;;  %1668 = vst [vmem:[#allocation1 + $0x88] sm:$0xff] %v5205_v61 }
  0x55   :  { %s6137_s7 = smov 12  ;;  %s6139_s14 = smov 48  ;;  %18 = vst [vmem:[#allocation1 + $0x3f8] sm:$0xff] %v4985_v63  ;;  %v2464_v10 = vsel %vm2165_vm0, %v2462_v5, %v2459_v4  ;;  %v2467_v12 = vld [vmem:[#allocation1 + $0x18f] ss:$16 sm:%s5882_s9]  }
  0x56   :  { %7482 = sst [smem:[#allocation47_spill]] %s6139_s14  ;;  %s6146_s30 = smov 192  ;;  %48 = vst [vmem:[#allocation1 + $0x3e8] sm:$0xff] %v4989_v1  ;;  %v2469_v23 = vsel %vm2170_vm1, %v2467_v12, %v2464_v10  ;;  %v2472_v24 = vld [vmem:[#allocation1 + $0x18f] ss:$16 sm:%s5884_s2]   ;;  %v5069_v1 = vunpack.c.h.bf16 %v6357_v34  ;;  %v5068_v34 = vunpack.c.l.bf16 %v6357_v34 }
  0x57   :  { %7483 = sst [smem:[#allocation48_spill]] %s6146_s30  ;;  %s6148_s11 = smov 3  ;;  %78 = vst [vmem:[#allocation1 + $0x3d8] sm:$0xff] %v4993_v6  ;;  %v2474_v45 = vsel %vm2175_vm2, %v2472_v24, %v2469_v23  ;;  %v2581_v59 = vld [vmem:[#allocation1 + $0x206] ss:$16 sm:%s5979_s20]  }
  0x58   :  { %s6156_s14 = smov 12  ;;  %s6158_s30 = smov 48  ;;  %108 = vst [vmem:[#allocation1 + $0x3c8] sm:$0xff] %v4997_v7  ;;  %v2596_v61 = vld [vmem:[#allocation1 + $0x306] ss:$16 sm:%s5984_s24]   ;;  %v2583_v4 = vsel %vm2170_vm1, %v2581_v59, %v2578_v57  ;;  %v5073_v7 = vunpack.c.h.bf16 %v6370_v42  ;;  %v5072_v42 = vunpack.c.l.bf16 %v6370_v42 }
  0x59   :  { %7484 = sst [smem:[#allocation49_spill]] %s6158_s30  ;;  %s6168_s30 = smov 192  ;;  %138 = vst [vmem:[#allocation1 + $0x3b8] sm:$0xff] %v5001_v8  ;;  %v2586_v5 = vld [vmem:[#allocation1 + $0x206] ss:$16 sm:%s5982_s19]  }
  0x5a   :  { %7485 = sst [smem:[#allocation50_spill]] %s6168_s30  ;;  %s6170_s21 = smov 3  ;;  %168 = vst [vmem:[#allocation1 + $0x3a8] sm:$0xff] %v5005_v14  ;;  %v2599_v6 = vld [vmem:[#allocation1 + $0x306] ss:$16 sm:%s5989_s29]   ;;  %v5077_v14 = vunpack.c.h.bf16 %v6379_v47  ;;  %v2588_v23 = vsel %vm2175_vm2, %v2586_v5, %v2583_v4  ;;  %v5076_v47 = vunpack.c.l.bf16 %v6379_v47 }
  0x5b   :  { %7486 = sst [smem:[#allocation51_spill]] %s6170_s21  ;;  %s6183_s30 = smov 12  ;;  %v2436_v35 = vld [vmem:[#allocation1 + $0x8f] ss:$16 sm:%s5851_s22]   ;;  %198 = vst [vmem:[#allocation1 + $0x398] sm:$0xff] %v5009_v21  ;;  %v2601_v8 = vsel %vm2165_vm0, %v2599_v6, %v2596_v61 }
  0x5c   :  { %s6185_s21 = smov 48  ;;  %s6200_s13 = smov 192  ;;  %v2439_v36 = vld [vmem:[#allocation1 + $0x8f] ss:$16 sm:%s5853_s15]   ;;  %228 = vst [vmem:[#allocation1 + $0x388] sm:$0xff] %v5013_v25 }
  0x5d   :  { %7487 = sst [smem:[#allocation52_spill]] %s6185_s21  ;;  %s6209_s12 = smov 3  ;;  %v2444_v38 = vld [vmem:[#allocation1 + $0x8f] ss:$16 sm:%s5861_s6]   ;;  %v2441_v43 = vsel %vm2165_vm0, %v2439_v36, %v2436_v35  ;;  %498 = vst [vmem:[#allocation1 + $0x2f8] sm:$0xff] %v5049_v28 }
  0x5e   :  { %7488 = sst [smem:[#allocation53_spill]] %s6200_s13  ;;  %s6211_s16 = smov 12  ;;  %v2446_v48 = vsel %vm2170_vm1, %v2444_v38, %v2441_v43  ;;  %528 = vst [vmem:[#allocation1 + $0x2e8] sm:$0xff] %v5053_v41  ;;  %v2604_v10 = vld [vmem:[#allocation1 + $0x306] ss:$16 sm:%s5992_s3]  }
  0x5f   :  { %s6220_s13 = smov 48  ;;  %s6222_s8 = smov 192  ;;  %558 = vst [vmem:[#allocation1 + $0x2d8] sm:$0xff] %v5057_v46  ;;  %v2606_v21 = vsel %vm2170_vm1, %v2604_v10, %v2601_v8  ;;  %v2622_v43 = vld [vmem:[#allocation1 + $0xe] ss:$16 sm:%s5999_s10]  }
  0x60   :  { %7489 = sst [smem:[#allocation54_spill]] %s6220_s13  ;;  %s6230_s13 = smov 3  ;;  %588 = vst [vmem:[#allocation1 + $0x2c8] sm:$0xff] %v5061_v50 }
  0x61   :  { %7490 = sst [smem:[#allocation55_spill]] %s6222_s8  ;;  %s6232_s8 = smov 12  ;;  %618 = vst [vmem:[#allocation1 + $0x2b8] sm:$0xff] %v5065_v56 }
  0x62   :  { %7491 = sst [smem:[#allocation56_spill]] %s6230_s13  ;;  %s6240_s21 = smov 48  ;;  %648 = vst [vmem:[#allocation1 + $0x2a8] sm:$0xff] %v5069_v1 }
  0x63   :  { %7492 = sst [smem:[#allocation57_spill]] %s6232_s8  ;;  %s6242_s8 = smov 192  ;;  %678 = vst [vmem:[#allocation1 + $0x298] sm:$0xff] %v5073_v7 }
  0x64   :  { %7493 = sst [smem:[#allocation58_spill]] %s6240_s21  ;;  %s6251_s21 = smov 3  ;;  %708 = vst [vmem:[#allocation1 + $0x288] sm:$0xff] %v5077_v14 }
  0x65   :  { %7494 = sst [smem:[#allocation59_spill]] %s6242_s8  ;;  %s6253_s8 = smov 12  ;;  %993 = vst [vmem:[#allocation1 + $0x1f0] sm:$0xff] %v5112_v11 }
  0x66   :  { %7495 = sst [smem:[#allocation60_spill]] %s6251_s21  ;;  %s6261_s21 = smov 48  ;;  %1023 = vst [vmem:[#allocation1 + $0x1e0] sm:$0xff] %v5116_v13 }
  0x67   :  { %7496 = sst [smem:[#allocation61_spill]] %s6253_s8  ;;  %s6263_s8 = smov 192  ;;  %1053 = vst [vmem:[#allocation1 + $0x1d0] sm:$0xff] %v5120_v15 }
  0x68   :  { %7497 = sst [smem:[#allocation62_spill]] %s6261_s21  ;;  %s6276_s21 = smov 3  ;;  %1083 = vst [vmem:[#allocation1 + $0x1c0] sm:$0xff] %v5124_v17 }
  0x69   :  { %7498 = sst [smem:[#allocation63_spill]] %s6263_s8  ;;  %s6278_s8 = smov 12  ;;  %1113 = vst [vmem:[#allocation1 + $0x1b0] sm:$0xff] %v5128_v19 }
  0x6a   :  { %s6283_s5 = smov 48  ;;  %s6286_s23 = smov 192  ;;  %1143 = vst [vmem:[#allocation1 + $0x1a0] sm:$0xff] %v5132_v20 }
  0x6b   :  { %7499 = sst [smem:[#allocation64_spill]] %s6286_s23  ;;  %s6288_s23 = smov 3  ;;  %1173 = vst [vmem:[#allocation1 + $0x190] sm:$0xff] %v5136_v26  ;;  %v2852_v26 = vld [vmem:[#allocation1 + $0x28e] ss:$16 sm:%s6137_s7]  }
  0x6c   :  { %7500 = sst [smem:[#allocation65_spill]] %s6288_s23  ;;  %s6296_s13 = smov 12  ;;  %1203 = vst [vmem:[#allocation1 + $0x180] sm:$0xff] %v5140_v30 }
  0x6d   :  { %s6298_s23 = smov 48  ;;  %s6310_s9 = smov 3  ;;  %1473 = vst [vmem:[#allocation1 + $0xf0] sm:$0xff] %v5176_v31 }
  0x6e   :  { %7501 = sst [smem:[#allocation66_spill]] %s6298_s23  ;;  %s6308_s23 = smov 192  ;;  %1503 = vst [vmem:[#allocation1 + $0xe0] sm:$0xff] %v5180_v33 }
  0x6f   :  { %7502 = sst [smem:[#allocation67_spill]] %s6308_s23  ;;  %s6317_s23 = smov 12  ;;  %1533 = vst [vmem:[#allocation1 + $0xd0] sm:$0xff] %v5184_v37 }
  0x70   :  { %7503 = sst [smem:[#allocation68_spill]] %s6310_s9  ;;  %s6319_s9 = smov 48  ;;  %1563 = vst [vmem:[#allocation1 + $0xc0] sm:$0xff] %v5188_v39 }
  0x71   :  { %7504 = sst [smem:[#allocation69_spill]] %s6317_s23  ;;  %s6327_s23 = smov 192  ;;  %1593 = vst [vmem:[#allocation1 + $0xb0] sm:$0xff] %v5192_v40 }
  0x72   :  { %7505 = sst [smem:[#allocation70_spill]] %s6319_s9  ;;  %s6329_s9 = smov 3  ;;  %1623 = vst [vmem:[#allocation1 + $0xa0] sm:$0xff] %v5196_v49 }
  0x73   :  { %7506 = sst [smem:[#allocation71_spill]] %s6327_s23  ;;  %s6339_s2 = smov 12  ;;  %1653 = vst [vmem:[#allocation1 + $0x90] sm:$0xff] %v5200_v52  ;;  %v2734_v13 = vld [vmem:[#allocation1 + $0x186] ss:$16 sm:%s6037_s25]  }
  0x74   :  { %7507 = sst [smem:[#allocation72_spill]] %s6329_s9  ;;  %s6359_s9 = smov 192  ;;  %1683 = vst [vmem:[#allocation1 + $0x80] sm:$0xff] %v5204_v55 }
  0x75   :  { %s7508_s23 = sld [smem:[#allocation2_spill]]  ;;  %s6381_s0 = smov 12  ;;  %33 = vst [vmem:[#allocation1 + $0x3f0] sm:$0xff] %v4984_v58  ;;  %v2986_v58 = vld [vmem:[#allocation1 + $0xd] ss:$16 sm:%s6276_s21]  }
  0x76   :  { %7509 = sst [smem:[#allocation2_spill]] %s6339_s2  ;;  %s6341_s2 = smov 48  ;;  %63 = vst [vmem:[#allocation1 + $0x3e0] sm:$0xff] %v4988_v60 }
  0x77   :  { %7510 = sst [smem:[#allocation73_spill]] %s6341_s2  ;;  %s6361_s2 = smov 3  ;;  %93 = vst [vmem:[#allocation1 + $0x3d0] sm:$0xff] %v4992_v62 }
  0x78   :  { %7511 = sst [smem:[#allocation74_spill]] %s6359_s9  ;;  %s6383_s22 = smov 48  ;;  %123 = vst [vmem:[#allocation1 + $0x3c0] sm:$0xff] %v4996_v0  ;;  %v2917_v0 = vld [vmem:[#allocation1 + $0x105] ss:$16 sm:%s6209_s12]  }
  0x79   :  { %7512 = sst [smem:[#allocation75_spill]] %s6383_s22  ;;  %s6389_s1 = smov 192  ;;  %153 = vst [vmem:[#allocation1 + $0x3b0] sm:$0xff] %v5000_v2 }
  0x7a   :  { %7513 = sst [smem:[#allocation76_spill]] %s6389_s1  ;;  %s6396_s24 = smov 3  ;;  %183 = vst [vmem:[#allocation1 + $0x3a0] sm:$0xff] %v5004_v3 }
  0x7b   :  { %v2449_v44 = vld [vmem:[#allocation1 + $0x8f] ss:$16 sm:%s7508_s23]   ;;  %s7514_s18 = sld [smem:[#allocation19_spill]]  ;;  %s6402_s19 = smov 12  ;;  %213 = vst [vmem:[#allocation1 + $0x390] sm:$0xff] %v5008_v9 }
  0x7c   :  { %v2451_v54 = vsel %vm2175_vm2, %v2449_v44, %v2446_v48  ;;  %s6408_s20 = smov 48  ;;  %s7516_s29 = sld [smem:[#allocation7_spill]]  ;;  %243 = vst [vmem:[#allocation1 + $0x380] sm:$0xff] %v5012_v16 }
  0x7d   :  { %v5385_v63 = vpack.i.bf16 %v2474_v45, %v2451_v54  ;;  %7515 = sst [smem:[#allocation19_spill]] %s6408_s20  ;;  %s6413_s15 = smov 192  ;;  %513 = vst [vmem:[#allocation1 + $0x2f0] sm:$0xff] %v5048_v18 }
  0x7e   :  { %s7517_s3 = sld [smem:[#allocation8_spill]]  ;;  %s6415_s6 = smov 3  ;;  %543 = vst [vmem:[#allocation1 + $0x2e0] sm:$0xff] %v5052_v22 }
  0x7f   :  { %5386 = vrot.lane.b32.xlu0 %v5385_v63, %s7453_s17  ;;  %7518 = sst [smem:[#allocation7_spill]] %s6413_s15  ;;  %s6420_s23 = smov 12  ;;  %573 = vst [vmem:[#allocation1 + $0x2d0] sm:$0xff] %v5056_v27 }
  0x80   :  { %s6425_s15 = smov 192  ;;  %s6427_s1 = smov 3  ;;  %603 = vst [vmem:[#allocation1 + $0x2c0] sm:$0xff] %v5060_v29 }
  0x81   :  { %v2609_v12 = vld [vmem:[#allocation1 + $0x306] ss:$16 sm:%s7514_s18]   ;;  %s6422_s18 = smov 48  ;;  %7519 = sst [smem:[#allocation8_spill]] %s6425_s15  ;;  %633 = vst [vmem:[#allocation1 + $0x2b0] sm:$0xff] %v5064_v32 }
  0x82   :  { %v2611_v24 = vsel %vm2175_vm2, %v2609_v12, %v2606_v21  ;;  %7520 = sst [smem:[#allocation77_spill]] %s6427_s1  ;;  %v2505_v25 = vld [vmem:[#allocation1 + $0x38f] ss:$16 sm:%s7516_s29]   ;;  %s6432_s29 = smov 12  ;;  %v2655_v12 = vld [vmem:[#allocation1 + $0x10e] ss:$16 sm:%s6015_s4]  }
  0x83   :  { %s7521_s9 = sld [smem:[#allocation9_spill]]  ;;  %v5400_v35 = vpack.i.bf16 %v2611_v24, %v2588_v23  ;;  %s6435_s20 = smov 48  ;;  %663 = vst [vmem:[#allocation1 + $0x2a0] sm:$0xff] %v5068_v34 }
  0x84   :  { %v2508_v28 = vld [vmem:[#allocation1 + $0x38f] ss:$16 sm:%s7517_s3]   ;;  %7522 = sst [smem:[#allocation9_spill]] %s6432_s29  ;;  %s6437_s22 = smov 192  ;;  %693 = vst [vmem:[#allocation1 + $0x290] sm:$0xff] %v5072_v42 }
  0x85   :  { %s7523_s3 = sld [smem:[#allocation20_spill]]  ;;  %v2510_v36 = vsel %vm2165_vm0, %v2508_v28, %v2505_v25  ;;  %s7536_s29 = smov 96   ;;  %v2737_v25 = vld [vmem:[#allocation1 + $0x186] ss:$16 sm:%s6039_s26]   ;;  %723 = vst [vmem:[#allocation1 + $0x280] sm:$0xff] %v5076_v47 }
  0x86   :  { %7524 = sst [smem:[#allocation20_spill]] %s6435_s20  ;;  %s6447_s20 = smov 48  ;;  %v2739_v17 = vsel %vm2165_vm0, %v2737_v25, %v2734_v13  ;;  %v2898_v25 = vld [vmem:[#allocation1 + $0x5] ss:$16 sm:%s6183_s30]  }
  0x87   :  { %7525 = sst [smem:[#allocation78_spill]] %s6437_s22  ;;  %s6440_s22 = smov 3  ;;  %5401 = vrot.lane.b32.xlu0 %v5400_v35, %s7536_s29  ;;  %v2742_v35 = vld [vmem:[#allocation1 + $0x186] ss:$16 sm:%s6043_s27]  }
  0x88   :  { %7526 = sst [smem:[#allocation79_spill]] %s6440_s22  ;;  %s6442_s22 = smov 12  ;;  %v2744_v20 = vsel %vm2170_vm1, %v2742_v35, %v2739_v17  ;;  %v2994_v17 = vld [vmem:[#allocation1 + $0xd] ss:$16 sm:%s6283_s5]  }
  0x89   :  { %7527 = sst [smem:[#allocation80_spill]] %s6442_s22  ;;  %v2513_v38 = vld [vmem:[#allocation1 + $0x38f] ss:$16 sm:%s7521_s9]   ;;  %s6504_s4 = smov 192 }
  0x8a   :  { %s7528_s22 = sld [smem:[#allocation23_spill]]  ;;  %v2515_v45 = vsel %vm2170_vm1, %v2513_v38, %v2510_v36  ;;  %s6541_s26 = smov 192 }
  0x8b   :  { %s7529_s9 = sld [smem:[#allocation10_spill]]  ;;  %v2619_v41 = vld [vmem:[#allocation1 + $0xe] ss:$16 sm:%s7523_s3]   ;;  %s6452_s3 = smov 3 }
  0x8c   :  { %7530 = sst [smem:[#allocation23_spill]] %s6447_s20  ;;  %s6449_s20 = smov 192  ;;  %v2624_v61 = vsel %vm2165_vm0, %v2622_v43, %v2619_v41  ;;  %v2849_v41 = vld [vmem:[#allocation1 + $0x28e] ss:$16 sm:%s6127_s28]  }
  0x8d   :  { %7531 = sst [smem:[#allocation10_spill]] %s6449_s20  ;;  %s6550_s27 = smov 12  ;;  %v2872_v43 = vld [vmem:[#allocation1 + $0x38e] ss:$16 sm:%s6148_s11]  }
  0x8e   :  { %s7532_s20 = sld [smem:[#allocation24_spill]]  ;;  %s6566_s7 = smov 12 }
  0x8f   :  { %7533 = sst [smem:[#allocation24_spill]] %s6452_s3  ;;  %s6454_s3 = smov 12 }
  0x90   :  { %7534 = sst [smem:[#allocation81_spill]] %s6454_s3  ;;  %v2642_v44 = vld [vmem:[#allocation1 + $0x10e] ss:$16 sm:%s7528_s22]   ;;  %s6460_s22 = smov 48 }
  0x91   :  { %s7535_s3 = sld [smem:[#allocation21_spill]]  ;;  %v2518_v46 = vld [vmem:[#allocation1 + $0x38f] ss:$16 sm:%s7529_s9]   ;;  %s6571_s11 = smov 48 }
  0x92   :  { %s7537_s1 = sld [smem:[#allocation3_spill]]  ;;  %v2520_v59 = vsel %vm2175_vm2, %v2518_v46, %v2515_v45 }
  0x93   :  { %s7538_s15 = sld [smem:[#allocation4_spill]] }
  0x94   :  { %s7539_s10 = sld [smem:[#allocation5_spill]]  ;;  %v2645_v48 = vld [vmem:[#allocation1 + $0x10e] ss:$16 sm:%s7532_s20]   ;;  %s6466_s20 = smov 192 }
  0x95   :  { %7540 = sst [smem:[#allocation21_spill]] %s6460_s22  ;;  %s6472_s22 = smov 12  ;;  %v2647_v63 = vsel %vm2165_vm0, %v2645_v48, %v2642_v44  ;;  %v2875_v44 = vld [vmem:[#allocation1 + $0x38e] ss:$16 sm:%s6156_s14]  }
  0x96   :  { %s7541_s9 = sld [smem:[#allocation6_spill]] }
  0x97   :  { %7542 = sst [smem:[#allocation3_spill]] %s6466_s20  ;;  %v2627_v50 = vld [vmem:[#allocation1 + $0xe] ss:$16 sm:%s7535_s3]   ;;  %s6470_s3 = smov 3 }
  0x98   :  { %s7543_s20 = sld [smem:[#allocation25_spill]]  ;;  %v2482_v51 = vld [vmem:[#allocation1 + $0x28f] ss:$16 sm:%s7537_s1]   ;;  %v2629_v8 = vsel %vm2170_vm1, %v2627_v50, %v2624_v61 }
  0x99   :  { %v2485_v53 = vld [vmem:[#allocation1 + $0x28f] ss:$16 sm:%s7538_s15]   ;;  %s7544_s1 = sld [smem:[#allocation22_spill]]  ;;  %s6485_s15 = smov 48 }
  0x9a   :  { %v2490_v54 = vld [vmem:[#allocation1 + $0x28f] ss:$16 sm:%s7539_s10]   ;;  %v2487_v56 = vsel %vm2165_vm0, %v2485_v53, %v2482_v51  ;;  %7545 = sst [smem:[#allocation4_spill]] %s6485_s15  ;;  %s6489_s10 = smov 192 }
  0x9b   :  { %v2492_v4 = vsel %vm2170_vm1, %v2490_v54, %v2487_v56  ;;  %7546 = sst [smem:[#allocation5_spill]] %s6489_s10  ;;  %s6509_s10 = smov 12 }
  0x9c   :  { %v2495_v57 = vld [vmem:[#allocation1 + $0x28f] ss:$16 sm:%s7541_s9]   ;;  %s6491_s9 = smov 3  ;;  %7548 = sst [smem:[#allocation25_spill]] %s6504_s4 }
  0x9d   :  { %v2497_v5 = vsel %vm2175_vm2, %v2495_v57, %v2492_v4  ;;  %s6506_s4 = smov 3  ;;  %7549 = sst [smem:[#allocation22_spill]] %s6509_s10 }
  0x9e   :  { %v2650_v1 = vld [vmem:[#allocation1 + $0x10e] ss:$16 sm:%s7543_s20]   ;;  %s6496_s20 = smov 12  ;;  %v5390_v7 = vpack.i.bf16 %v2520_v59, %v2497_v5  ;;  %s6511_s15 = smov 48 }
  0x9f   :  { %v2632_v6 = vld [vmem:[#allocation1 + $0xe] ss:$16 sm:%s7544_s1]   ;;  %s6498_s1 = smov 48  ;;  %v2652_v10 = vsel %vm2170_vm1, %v2650_v1, %v2647_v63  ;;  %s6515_s10 = smov 192  ;;  %v2854_v63 = vsel %vm2165_vm0, %v2852_v26, %v2849_v41  ;;  %v2877_v1 = vsel %vm2165_vm0, %v2875_v44, %v2872_v43 }
  0xa0   :  { %7547 = sst [smem:[#allocation6_spill]] %s6498_s1  ;;  %5391 = vrot.lane.b32.xlu1 %v5390_v7, %s7453_s17  ;;  %v2634_v14 = vsel %vm2175_vm2, %v2632_v6, %v2629_v8  ;;  %v2657_v21 = vsel %vm2175_vm2, %v2655_v12, %v2652_v10 }
  0xa1   :  { %s7550_s1 = sld [smem:[#allocation15_spill]]  ;;  %v5405_v24 = vpack.i.bf16 %v2657_v21, %v2634_v14 }
  0xa2   :  { %7551 = sst [smem:[#allocation15_spill]] %s6511_s15 }
  0xa3   :  { %s7552_s15 = sld [smem:[#allocation16_spill]] }
  0xa4   :  { %7553 = sst [smem:[#allocation16_spill]] %s6515_s10  ;;  %s6519_s10 = smov 3 }
  0xa5   :  { %7554 = sst [smem:[#allocation82_spill]] %s6519_s10  ;;  %s6521_s10 = smov 12 }
  0xa6   :  { %7555 = sst [smem:[#allocation83_spill]] %s6521_s10  ;;  %s6524_s10 = smov 48 }
  0xa7   :  { %7556 = sst [smem:[#allocation84_spill]] %s6524_s10  ;;  %s6526_s10 = smov 192  ;;  %v2367_v11 = vld [vmem:[#allocation1 + $0x187] ss:$16 sm:%s7550_s1]  }
  0xa8   :  { %7557 = sst [smem:[#allocation85_spill]] %s6526_s10  ;;  %s6534_s1 = smov 12  ;;  %5406 = vrot.lane.b32.xlu1 %v5405_v24, %s7536_s29 }
  0xa9   :  { %s7558_s10 = sld [smem:[#allocation17_spill]]  ;;  %v2370_v23 = vld [vmem:[#allocation1 + $0x187] ss:$16 sm:%s7552_s15]   ;;  %s6531_s15 = smov 3 }
  0xaa   :  { %7559 = sst [smem:[#allocation17_spill]] %s6531_s15  ;;  %v2372_v28 = vsel %vm2165_vm0, %v2370_v23, %v2367_v11 }
  0xab   :  { %7560 = sst [smem:[#allocation86_spill]] %s6534_s1  ;;  %s6536_s1 = smov 48 }
  0xac   :  { %7561 = sst [smem:[#allocation87_spill]] %s6536_s1 }
  0xad   :  { %s7562_s1 = sld [smem:[#allocation18_spill]] }
  0xae   :  { %s7563_s25 = sld [smem:[#allocation30_spill]] }
  0xaf   :  { %7564 = sst [smem:[#allocation18_spill]] %s6541_s26  ;;  %s6543_s26 = smov 3  ;;  %v2375_v15 = vld [vmem:[#allocation1 + $0x187] ss:$16 sm:%s7558_s10]  }
  0xb0   :  { %7565 = sst [smem:[#allocation30_spill]] %s6543_s26  ;;  %s6552_s10 = smov 48  ;;  %v2377_v38 = vsel %vm2170_vm1, %v2375_v15, %v2372_v28  ;;  %v2920_v28 = vld [vmem:[#allocation1 + $0x105] ss:$16 sm:%s6211_s16]   ;;  %v2989_v15 = vld [vmem:[#allocation1 + $0xd] ss:$16 sm:%s6278_s8]  }
  0xb1   :  { %7566 = sst [smem:[#allocation88_spill]] %s6550_s27  ;;  %s6559_s27 = smov 3 }
  0xb2   :  { %7567 = sst [smem:[#allocation89_spill]] %s6552_s10  ;;  %s6554_s10 = smov 192 }
  0xb3   :  { %7568 = sst [smem:[#allocation90_spill]] %s6554_s10  ;;  %v2380_v19 = vld [vmem:[#allocation1 + $0x187] ss:$16 sm:%s7562_s1]  }
  0xb4   :  { %s7569_s1 = sld [smem:[#allocation11_spill]]  ;;  %v2747_v36 = vld [vmem:[#allocation1 + $0x186] ss:$16 sm:%s7563_s25]   ;;  %v2382_v53 = vsel %vm2175_vm2, %v2380_v19, %v2377_v38  ;;  %v2991_v19 = vsel %vm2165_vm0, %v2989_v15, %v2986_v58  ;;  %v2691_v15 = vld [vmem:[#allocation1 + $0x30e] ss:$16 sm:%s6402_s19]  }
  0xb5   :  { %s7570_s25 = sld [smem:[#allocation12_spill]]  ;;  %v2749_v37 = vsel %vm2175_vm2, %v2747_v36, %v2744_v20  ;;  %v3012_v20 = vld [vmem:[#allocation1 + $0x10d] ss:$16 sm:%s6296_s13]   ;;  %v2996_v41 = vsel %vm2170_vm1, %v2994_v17, %v2991_v19  ;;  %v3124_v17 = vld [vmem:[#allocation1 + $0x285] ss:$16 sm:%s6415_s6]  }
  0xb6   :  { %s7571_s10 = sld [smem:[#allocation13_spill]]  ;;  %v3132_v19 = vld [vmem:[#allocation1 + $0x285] ss:$16 sm:%s6422_s18]  }
  0xb7   :  { %7572 = sst [smem:[#allocation11_spill]] %s6559_s27 }
  0xb8   :  { %s7573_s27 = sld [smem:[#allocation47_spill]] }
  0xb9   :  { %s7574_s26 = sld [smem:[#allocation49_spill]] }
  0xba   :  { %s7575_s28 = sld [smem:[#allocation14_spill]]  ;;  %v2344_v45 = vld [vmem:[#allocation1 + $0x87] ss:$16 sm:%s7569_s1]  }
  0xbb   :  { %7576 = sst [smem:[#allocation12_spill]] %s6566_s7  ;;  %v2347_v46 = vld [vmem:[#allocation1 + $0x87] ss:$16 sm:%s7570_s25]   ;;  %s6600_s25 = smov 12 }
  0xbc   :  { %s7577_s7 = sld [smem:[#allocation26_spill]]  ;;  %v2352_v30 = vld [vmem:[#allocation1 + $0x87] ss:$16 sm:%s7571_s10]   ;;  %v2349_v50 = vsel %vm2165_vm0, %v2347_v46, %v2344_v45  ;;  %s6598_s10 = smov 3 }
  0xbd   :  { %s7578_s15 = sld [smem:[#allocation27_spill]]  ;;  %v2354_v56 = vsel %vm2170_vm1, %v2352_v30, %v2349_v50 }
  0xbe   :  { %7579 = sst [smem:[#allocation13_spill]] %s6571_s11  ;;  %v2857_v48 = vld [vmem:[#allocation1 + $0x28e] ss:$16 sm:%s7573_s27]   ;;  %s6630_s11 = smov 12 }
  0xbf   :  { %s7580_s14 = sld [smem:[#allocation28_spill]]  ;;  %v2880_v31 = vld [vmem:[#allocation1 + $0x38e] ss:$16 sm:%s7574_s26]   ;;  %v2859_v7 = vsel %vm2170_vm1, %v2857_v48, %v2854_v63 }
  0xc0   :  { %s7581_s1 = sld [smem:[#allocation29_spill]]  ;;  %v2357_v51 = vld [vmem:[#allocation1 + $0x87] ss:$16 sm:%s7575_s28]   ;;  %s6604_s28 = smov 48  ;;  %v2882_v8 = vsel %vm2170_vm1, %v2880_v31, %v2877_v1 }
  0xc1   :  { %v2359_v4 = vsel %vm2175_vm2, %v2357_v51, %v2354_v56  ;;  %s7583_s26 = sld [smem:[#allocation48_spill]] }
  0xc2   :  { %v2711_v54 = vld [vmem:[#allocation1 + $0x86] ss:$16 sm:%s7577_s7]   ;;  %s7584_s27 = sld [smem:[#allocation50_spill]]  ;;  %v5375_v5 = vpack.i.bf16 %v2382_v53, %v2359_v4  ;;  %s6606_s7 = smov 192 }
  0xc3   :  { %v2714_v33 = vld [vmem:[#allocation1 + $0x86] ss:$16 sm:%s7578_s15]   ;;  %s6593_s15 = smov 192  ;;  %7585 = sst [smem:[#allocation49_spill]] %s6604_s28 }
  0xc4   :  { %v2716_v57 = vsel %vm2165_vm0, %v2714_v33, %v2711_v54  ;;  %7582 = sst [smem:[#allocation47_spill]] %s6593_s15  ;;  %5376 = vrot.lane.b32.xlu2 %v5375_v5, %s7453_s17  ;;  %s6625_s28 = smov 3 }
  0xc5   :  { %v2719_v59 = vld [vmem:[#allocation1 + $0x86] ss:$16 sm:%s7580_s14]   ;;  %7586 = sst [smem:[#allocation14_spill]] %s6606_s7  ;;  %s6613_s14 = smov 3 }
  0xc6   :  { %v2724_v61 = vld [vmem:[#allocation1 + $0x86] ss:$16 sm:%s7581_s1]   ;;  %v2721_v39 = vsel %vm2170_vm1, %v2719_v59, %v2716_v57  ;;  %7587 = sst [smem:[#allocation26_spill]] %s6613_s14  ;;  %s6617_s1 = smov 12  ;;  %v2922_v59 = vsel %vm2165_vm0, %v2920_v28, %v2917_v0  ;;  %v2688_v28 = vld [vmem:[#allocation1 + $0x30e] ss:$16 sm:%s6396_s24]  }
  0xc7   :  { %v2726_v40 = vsel %vm2175_vm2, %v2724_v61, %v2721_v39  ;;  %v2862_v49 = vld [vmem:[#allocation1 + $0x28e] ss:$16 sm:%s7583_s26]   ;;  %7588 = sst [smem:[#allocation27_spill]] %s6617_s1  ;;  %s6619_s26 = smov 48 }
  0xc8   :  { %v5415_v6 = vpack.i.bf16 %v2749_v37, %v2726_v40  ;;  %v2885_v10 = vld [vmem:[#allocation1 + $0x38e] ss:$16 sm:%s7584_s27]   ;;  %7589 = sst [smem:[#allocation28_spill]] %s6619_s26  ;;  %s6623_s7 = smov 192  ;;  %v2864_v12 = vsel %vm2175_vm2, %v2862_v49, %v2859_v7 }
  0xc9   :  { %s7590_s27 = sld [smem:[#allocation35_spill]]  ;;  %v2887_v52 = vsel %vm2175_vm2, %v2885_v10, %v2882_v8  ;;  %s6636_s26 = smov 3 }
  0xca   :  { %5416 = vrot.lane.b32.xlu0 %v5415_v6, %s7536_s29  ;;  %7591 = sst [smem:[#allocation29_spill]] %s6623_s7  ;;  %s6634_s7 = smov 192  ;;  %v5430_v21 = vpack.i.bf16 %v2887_v52, %v2864_v12 }
  0xcb   :  { %s7592_s15 = sld [smem:[#allocation36_spill]]  ;;  %s6638_s1 = smov 12 }
  0xcc   :  { %7593 = sst [smem:[#allocation48_spill]] %s6625_s28  ;;  %s6640_s14 = smov 48 }
  0xcd   :  { %7594 = sst [smem:[#allocation50_spill]] %s6630_s11  ;;  %s6632_s11 = smov 48 }
  0xce   :  { %7595 = sst [smem:[#allocation35_spill]] %s6632_s11 }
  0xcf   :  { %s7596_s11 = sld [smem:[#allocation37_spill]]  ;;  %v2780_v55 = vld [vmem:[#allocation1 + $0x386] ss:$16 sm:%s7590_s27]   ;;  %s6647_s27 = smov 3 }
  0xd0   :  { %s7597_s28 = sld [smem:[#allocation43_spill]] }
  0xd1   :  { %7598 = sst [smem:[#allocation36_spill]] %s6634_s7  ;;  %v2783_v14 = vld [vmem:[#allocation1 + $0x386] ss:$16 sm:%s7592_s15]   ;;  %s6644_s15 = smov 192 }
  0xd2   :  { %s7599_s7 = sld [smem:[#allocation44_spill]]  ;;  %v2785_v24 = vsel %vm2165_vm0, %v2783_v14, %v2780_v55  ;;  %5431 = vrot.lane.b32.xlu0 %v5430_v21, %s7536_s29 }
  0xd3   :  { %7600 = sst [smem:[#allocation37_spill]] %s6636_s26 }
  0xd4   :  { %s7601_s26 = sld [smem:[#allocation45_spill]] }
  0xd5   :  { %7602 = sst [smem:[#allocation43_spill]] %s6638_s1  ;;  %v2788_v11 = vld [vmem:[#allocation1 + $0x386] ss:$16 sm:%s7596_s11]  }
  0xd6   :  { %s7603_s1 = sld [smem:[#allocation51_spill]]  ;;  %v2413_v23 = vld [vmem:[#allocation1 + $0x387] ss:$16 sm:%s7597_s28]   ;;  %v2790_v44 = vsel %vm2170_vm1, %v2788_v11, %v2785_v24 }
  0xd7   :  { %7604 = sst [smem:[#allocation44_spill]] %s6640_s14 }
  0xd8   :  { %7605 = sst [smem:[#allocation45_spill]] %s6644_s15  ;;  %s6649_s15 = smov 12  ;;  %v2416_v60 = vld [vmem:[#allocation1 + $0x387] ss:$16 sm:%s7599_s7]  }
  0xd9   :  { %s7606_s21 = sld [smem:[#allocation56_spill]]  ;;  %v2418_v35 = vsel %vm2165_vm0, %v2416_v60, %v2413_v23 }
  0xda   :  { %s7607_s14 = sld [smem:[#allocation64_spill]]  ;;  %v2421_v62 = vld [vmem:[#allocation1 + $0x387] ss:$16 sm:%s7601_s26]  }
  0xdb   :  { %s7608_s11 = sld [smem:[#allocation65_spill]]  ;;  %v2423_v50 = vsel %vm2170_vm1, %v2421_v62, %v2418_v35 }
  0xdc   :  { %s7609_s28 = sld [smem:[#allocation57_spill]]  ;;  %v2895_v13 = vld [vmem:[#allocation1 + $0x5] ss:$16 sm:%s7603_s1]  }
  0xdd   :  { %s7610_s7 = sld [smem:[#allocation66_spill]]  ;;  %v2900_v57 = vsel %vm2165_vm0, %v2898_v25, %v2895_v13  ;;  %v2665_v13 = vld [vmem:[#allocation1 + $0x20e] ss:$16 sm:%s6361_s2]  }
  0xde   :  { %s7611_s30 = sld [smem:[#allocation67_spill]]  ;;  %v2668_v25 = vld [vmem:[#allocation1 + $0x20e] ss:$16 sm:%s6381_s0]  }
  0xdf   :  { %s7612_s12 = sld [smem:[#allocation38_spill]]  ;;  %v2528_v2 = vld [vmem:[#allocation1 + $0x6] ss:$16 sm:%s7606_s21]  }
  0xe0   :  { %s7613_s16 = sld [smem:[#allocation52_spill]]  ;;  %v2999_v36 = vld [vmem:[#allocation1 + $0xd] ss:$16 sm:%s7607_s14]  }
  0xe1   :  { %s7614_s8 = sld [smem:[#allocation54_spill]]  ;;  %v3009_v38 = vld [vmem:[#allocation1 + $0x10d] ss:$16 sm:%s7608_s11]   ;;  %v3001_v48 = vsel %vm2175_vm2, %v2999_v36, %v2996_v41 }
  0xe2   :  { %s7615_s5 = sld [smem:[#allocation60_spill]]  ;;  %v2531_v3 = vld [vmem:[#allocation1 + $0x6] ss:$16 sm:%s7609_s28]   ;;  %v3014_v26 = vsel %vm2165_vm0, %v3012_v20, %v3009_v38 }
  0xe3   :  { %s7616_s1 = sld [smem:[#allocation61_spill]]  ;;  %v3017_v9 = vld [vmem:[#allocation1 + $0x10d] ss:$16 sm:%s7610_s7]   ;;  %v2533_v40 = vsel %vm2165_vm0, %v2531_v3, %v2528_v2  ;;  %v3127_v2 = vld [vmem:[#allocation1 + $0x285] ss:$16 sm:%s6420_s23]  }
  0xe4   :  { %s7617_s14 = sld [smem:[#allocation46_spill]]  ;;  %v3022_v43 = vld [vmem:[#allocation1 + $0x10d] ss:$16 sm:%s7611_s30]   ;;  %v3019_v31 = vsel %vm2170_vm1, %v3017_v9, %v3014_v26  ;;  %v3129_v41 = vsel %vm2165_vm0, %v3127_v2, %v3124_v17 }
  0xe5   :  { %s7618_s13 = sld [smem:[#allocation58_spill]]  ;;  %v2793_v45 = vld [vmem:[#allocation1 + $0x386] ss:$16 sm:%s7612_s12]   ;;  %v3024_v33 = vsel %vm2175_vm2, %v3022_v43, %v3019_v31 }
  0xe6   :  { %s7619_s26 = sld [smem:[#allocation62_spill]]  ;;  %v2903_v46 = vld [vmem:[#allocation1 + $0x5] ss:$16 sm:%s7613_s16]   ;;  %v5445_v61 = vpack.i.bf16 %v3024_v33, %v3001_v48  ;;  %v2795_v4 = vsel %vm2175_vm2, %v2793_v45, %v2790_v44 }
  0xe7   :  { %s7620_s21 = sld [smem:[#allocation31_spill]]  ;;  %v2925_v30 = vld [vmem:[#allocation1 + $0x105] ss:$16 sm:%s7614_s8]   ;;  %v2905_v52 = vsel %vm2170_vm1, %v2903_v46, %v2900_v57 }
  0xe8   :  { %s7621_s11 = sld [smem:[#allocation32_spill]]  ;;  %v2550_v16 = vld [vmem:[#allocation1 + $0x106] ss:$16 sm:%s7615_s5]   ;;  %v2927_v55 = vsel %vm2170_vm1, %v2925_v30, %v2922_v59  ;;  %v3134_v30 = vsel %vm2170_vm1, %v3132_v19, %v3129_v41 }
  0xe9   :  { %s7622_s28 = sld [smem:[#allocation33_spill]]  ;;  %v2553_v18 = vld [vmem:[#allocation1 + $0x106] ss:$16 sm:%s7616_s1]  }
  0xea   :  { %s7623_s7 = sld [smem:[#allocation34_spill]]  ;;  %v2426_v51 = vld [vmem:[#allocation1 + $0x387] ss:$16 sm:%s7617_s14]   ;;  %v2555_v29 = vsel %vm2165_vm0, %v2553_v18, %v2550_v16 }
  0xeb   :  { %s7624_s30 = sld [smem:[#allocation39_spill]]  ;;  %v2536_v53 = vld [vmem:[#allocation1 + $0x6] ss:$16 sm:%s7618_s13]   ;;  %v2428_v8 = vsel %vm2175_vm2, %v2426_v51, %v2423_v50  ;;  %v2670_v50 = vsel %vm2165_vm0, %v2668_v25, %v2665_v13 }
  0xec   :  { %s7625_s12 = sld [smem:[#allocation40_spill]]  ;;  %v2558_v54 = vld [vmem:[#allocation1 + $0x106] ss:$16 sm:%s7619_s26]   ;;  %v2538_v60 = vsel %vm2170_vm1, %v2536_v53, %v2533_v40  ;;  %v2693_v53 = vsel %vm2165_vm0, %v2691_v15, %v2688_v28 }
  0xed   :  { %s7626_s16 = sld [smem:[#allocation53_spill]]  ;;  %v2757_v37 = vld [vmem:[#allocation1 + $0x286] ss:$16 sm:%s7620_s21]   ;;  %v2560_v24 = vsel %vm2170_vm1, %v2558_v54, %v2555_v29 }
  0xee   :  { %s7627_s8 = sld [smem:[#allocation41_spill]]  ;;  %v2760_v22 = vld [vmem:[#allocation1 + $0x286] ss:$16 sm:%s7621_s11]  }
  0xef   :  { %s7628_s5 = sld [smem:[#allocation42_spill]]  ;;  %v2765_v56 = vld [vmem:[#allocation1 + $0x286] ss:$16 sm:%s7622_s28]   ;;  %v2762_v63 = vsel %vm2165_vm0, %v2760_v22, %v2757_v37 }
  0xf0   :  { %s7629_s1 = sld [smem:[#allocation55_spill]]  ;;  %v2770_v1 = vld [vmem:[#allocation1 + $0x286] ss:$16 sm:%s7623_s7]   ;;  %v2767_v6 = vsel %vm2170_vm1, %v2765_v56, %v2762_v63 }
  0xf1   :  { %s7630_s14 = sld [smem:[#allocation59_spill]]  ;;  %v2390_v39 = vld [vmem:[#allocation1 + $0x287] ss:$16 sm:%s7624_s30]   ;;  %v2772_v47 = vsel %vm2175_vm2, %v2770_v1, %v2767_v6  ;;  %s5637_s30 = smov 80  }
  0xf2   :  { %s7631_s13 = sld [smem:[#allocation63_spill]]  ;;  %v2393_v27 = vld [vmem:[#allocation1 + $0x287] ss:$16 sm:%s7625_s12]   ;;  %v5420_v11 = vpack.i.bf16 %v2795_v4, %v2772_v47  ;;  %5446 = vrot.lane.b32.xlu0 %v5445_v61, %s5637_s30 }
  0xf3   :  { %s7632_s26 = sld [smem:[#allocation68_spill]]  ;;  %v2908_v5 = vld [vmem:[#allocation1 + $0x5] ss:$16 sm:%s7626_s16]   ;;  %v2395_v32 = vsel %vm2165_vm0, %v2393_v27, %v2390_v39 }
  0xf4   :  { %s7633_s21 = sld [smem:[#allocation69_spill]]  ;;  %v2398_v7 = vld [vmem:[#allocation1 + $0x287] ss:$16 sm:%s7627_s8]   ;;  %5421 = vrot.lane.b32.xlu1 %v5420_v11, %s7536_s29  ;;  %v2910_v35 = vsel %vm2175_vm2, %v2908_v5, %v2905_v52 }
  0xf5   :  { %s7634_s11 = sld [smem:[#allocation72_spill]]  ;;  %v2403_v49 = vld [vmem:[#allocation1 + $0x287] ss:$16 sm:%s7628_s5]   ;;  %v2400_v12 = vsel %vm2170_vm1, %v2398_v7, %v2395_v32  ;;  %v2803_v7 = vld [vmem:[#allocation1 + $0x8e] ss:$16 sm:%s6470_s3]  }
  0xf6   :  { %v2930_v10 = vld [vmem:[#allocation1 + $0x105] ss:$16 sm:%s7629_s1]   ;;  %s7635_s28 = sld [smem:[#allocation2_spill]]  ;;  %v2405_v23 = vsel %vm2175_vm2, %v2403_v49, %v2400_v12  ;;  %s6744_s1 = smov 48  ;;  %v2806_v49 = vld [vmem:[#allocation1 + $0x8e] ss:$16 sm:%s6472_s22]  }
  0xf7   :  { %v2541_v34 = vld [vmem:[#allocation1 + $0x6] ss:$16 sm:%s7630_s14]   ;;  %s7636_s7 = sld [smem:[#allocation8_spill]]  ;;  %v5380_v0 = vpack.i.bf16 %v2428_v8, %v2405_v23  ;;  %v2932_v38 = vsel %vm2175_vm2, %v2930_v10, %v2927_v55  ;;  %s6746_s14 = smov 192  ;;  %v2826_v8 = vld [vmem:[#allocation1 + $0x18e] ss:$16 sm:%s6491_s9]   ;;  %v2808_v17 = vsel %vm2165_vm0, %v2806_v49, %v2803_v7 }
  0xf8   :  { %v2563_v42 = vld [vmem:[#allocation1 + $0x106] ss:$16 sm:%s7631_s13]   ;;  %s7637_s2 = sld [smem:[#allocation77_spill]]  ;;  %v2543_v20 = vsel %vm2175_vm2, %v2541_v34, %v2538_v60  ;;  %v5435_v22 = vpack.i.bf16 %v2932_v38, %v2910_v35  ;;  %v2829_v10 = vld [vmem:[#allocation1 + $0x18e] ss:$16 sm:%s6496_s20]  }
  0xf9   :  { %v3032_v14 = vld [vmem:[#allocation1 + $0x20d] ss:$16 sm:%s7632_s26]   ;;  %s7638_s0 = sld [smem:[#allocation9_spill]]  ;;  %5381 = vrot.lane.b32.xlu2 %v5380_v0, %s7453_s17  ;;  %v2565_v3 = vsel %vm2175_vm2, %v2563_v42, %v2560_v24  ;;  %v3262_v34 = vld [vmem:[#allocation1 + $0x4] ss:$16 sm:%s6506_s4]   ;;  %v2831_v2 = vsel %vm2165_vm0, %v2829_v10, %v2826_v8 }
  0xfa   :  { %v3035_v21 = vld [vmem:[#allocation1 + $0x20d] ss:$16 sm:%s7633_s21]   ;;  %s7639_s12 = sld [smem:[#allocation20_spill]]  ;;  %v5395_v63 = vpack.i.bf16 %v2565_v3, %v2543_v20 }
  0xfb   :  { %v3055_v58 = vld [vmem:[#allocation1 + $0x30d] ss:$16 sm:%s7634_s11]   ;;  %s7640_s24 = sld [smem:[#allocation70_spill]]  ;;  %v3037_v44 = vsel %vm2165_vm0, %v3035_v21, %v3032_v14 }
  0xfc   :  { %v3058_v62 = vld [vmem:[#allocation1 + $0x30d] ss:$16 sm:%s7635_s28]   ;;  %s7641_s19 = sld [smem:[#allocation78_spill]]  ;;  %5436 = vrot.lane.b32.xlu1 %v5435_v22, %s5637_s30 }
  0xfd   :  { %v3137_v36 = vld [vmem:[#allocation1 + $0x285] ss:$16 sm:%s7636_s7]   ;;  %s7642_s17 = sld [smem:[#allocation71_spill]]  ;;  %v3060_v46 = vsel %vm2165_vm0, %v3058_v62, %v3055_v58 }
  0xfe   :  { %s7643_s6 = sld [smem:[#allocation73_spill]]  ;;  %v3147_v26 = vld [vmem:[#allocation1 + $0x385] ss:$16 sm:%s7637_s2]   ;;  %v3139_v33 = vsel %vm2175_vm2, %v3137_v36, %v3134_v30 }
  0xff   :  { %s7644_s23 = sld [smem:[#allocation75_spill]]  ;;  %v3150_v9 = vld [vmem:[#allocation1 + $0x385] ss:$16 sm:%s7638_s0]  }
 0x100   :  { %s7645_s18 = sld [smem:[#allocation19_spill]]  ;;  %v3155_v43 = vld [vmem:[#allocation1 + $0x385] ss:$16 sm:%s7639_s12]   ;;  %v3152_v16 = vsel %vm2165_vm0, %v3150_v9, %v3147_v26 }
 0x101   :  { %v3040_v45 = vld [vmem:[#allocation1 + $0x20d] ss:$16 sm:%s7640_s24]   ;;  %s7646_s16 = sld [smem:[#allocation74_spill]]  ;;  %v3157_v37 = vsel %vm2170_vm1, %v3155_v43, %v3152_v16  ;;  %5396 = vrot.lane.b32.xlu2 %v5395_v63, %s7536_s29 }
 0x102   :  { %s7647_s8 = sld [smem:[#allocation76_spill]]  ;;  %v3160_v18 = vld [vmem:[#allocation1 + $0x385] ss:$16 sm:%s7641_s19]   ;;  %v3042_v1 = vsel %vm2170_vm1, %v3040_v45, %v3037_v44 }
 0x103   :  { %s7648_s5 = sld [smem:[#allocation7_spill]]  ;;  %v3045_v48 = vld [vmem:[#allocation1 + $0x20d] ss:$16 sm:%s7642_s17]   ;;  %v3162_v61 = vsel %vm2175_vm2, %v3160_v18, %v3157_v37  ;;  %v2966_v37 = vld [vmem:[#allocation1 + $0x305] ss:$16 sm:%s6600_s25]  }
 0x104   :  { %s7649_s13 = sld [smem:[#allocation79_spill]]  ;;  %v3063_v31 = vld [vmem:[#allocation1 + $0x30d] ss:$16 sm:%s7643_s6]   ;;  %v5460_v4 = vpack.i.bf16 %v3162_v61, %v3139_v33  ;;  %v3047_v42 = vsel %vm2175_vm2, %v3045_v48, %v3042_v1  ;;  %s6793_s6 = smov 3  ;;  %v2963_v33 = vld [vmem:[#allocation1 + $0x305] ss:$16 sm:%s6598_s10]  }
 0x105   :  { %s7650_s26 = sld [smem:[#allocation80_spill]]  ;;  %v2673_v51 = vld [vmem:[#allocation1 + $0x20e] ss:$16 sm:%s7644_s23]   ;;  %v3065_v40 = vsel %vm2170_vm1, %v3063_v31, %v3060_v46  ;;  %s6795_s23 = smov 12 }
 0x106   :  { %s7651_s21 = sld [smem:[#allocation24_spill]]  ;;  %v2696_v54 = vld [vmem:[#allocation1 + $0x30e] ss:$16 sm:%s7645_s18]   ;;  %v2675_v29 = vsel %vm2170_vm1, %v2673_v51, %v2670_v50  ;;  %5461 = vrot.lane.b32.xlu0 %v5460_v4, %s5637_s30 }
 0x107   :  { %s7652_s11 = sld [smem:[#allocation81_spill]]  ;;  %v3068_v56 = vld [vmem:[#allocation1 + $0x30d] ss:$16 sm:%s7646_s16]   ;;  %v2698_v6 = vsel %vm2170_vm1, %v2696_v54, %v2693_v53 }
 0x108   :  { %v2678_v57 = vld [vmem:[#allocation1 + $0x20e] ss:$16 sm:%s7647_s8]   ;;  %s7653_s28 = sld [smem:[#allocation22_spill]]  ;;  %v3070_v55 = vsel %vm2175_vm2, %v3068_v56, %v3065_v40 }
 0x109   :  { %v2701_v59 = vld [vmem:[#allocation1 + $0x30e] ss:$16 sm:%s7648_s5]   ;;  %s7654_s7 = sld [smem:[#allocation15_spill]]  ;;  %v2680_v14 = vsel %vm2175_vm2, %v2678_v57, %v2675_v29  ;;  %v5450_v20 = vpack.i.bf16 %v3070_v55, %v3047_v42 }
 0x10a   :  { %v3170_v39 = vld [vmem:[#allocation1 + $0x8d] ss:$16 sm:%s7649_s13]   ;;  %s7655_s2 = sld [smem:[#allocation16_spill]]  ;;  %v2703_v21 = vsel %vm2175_vm2, %v2701_v59, %v2698_v6 }
 0x10b   :  { %v3173_v27 = vld [vmem:[#allocation1 + $0x8d] ss:$16 sm:%s7650_s26]   ;;  %s7656_s3 = sld [smem:[#allocation82_spill]]  ;;  %v5410_v9 = vpack.i.bf16 %v2703_v21, %v2680_v14  ;;  %5451 = vrot.lane.b32.xlu1 %v5450_v20, %s5637_s30  ;;  %v2968_v14 = vsel %vm2165_vm0, %v2966_v37, %v2963_v33 }
 0x10c   :  { %v3193_v5 = vld [vmem:[#allocation1 + $0x18d] ss:$16 sm:%s7651_s21]   ;;  %s7657_s22 = sld [smem:[#allocation83_spill]]  ;;  %v3175_v24 = vsel %vm2165_vm0, %v3173_v27, %v3170_v39  ;;  %s6807_s21 = smov 48 }
 0x10d   :  { %v3196_v32 = vld [vmem:[#allocation1 + $0x18d] ss:$16 sm:%s7652_s11]   ;;  %s7658_s0 = sld [smem:[#allocation84_spill]]  ;;  %5411 = vrot.lane.b32.xlu2 %v5410_v9, %s7536_s29  ;;  %v3476_v9 = vld [vmem:[#allocation1 + $0x184] ss:$16 sm:%s6744_s1]   ;;  %s3549_s1 = smov 192 }
 0x10e   :  { %s7659_s9 = sld [smem:[#allocation23_spill]]  ;;  %v3265_v47 = vld [vmem:[#allocation1 + $0x4] ss:$16 sm:%s7653_s28]   ;;  %v3198_v13 = vsel %vm2165_vm0, %v3196_v32, %v3193_v5  ;;  %s6809_s28 = smov 192 }
 0x10f   :  { %s7660_s20 = sld [smem:[#allocation85_spill]]  ;;  %v3270_v12 = vld [vmem:[#allocation1 + $0x4] ss:$16 sm:%s7654_s7]   ;;  %v3267_v58 = vsel %vm2165_vm0, %v3265_v47, %v3262_v34 }
 0x110   :  { %v3275_v52 = vld [vmem:[#allocation1 + $0x4] ss:$16 sm:%s7655_s2]   ;;  %s7661_s4 = sld [smem:[#allocation21_spill]]  ;;  %v3272_v25 = vsel %vm2170_vm1, %v3270_v12, %v3267_v58 }
 0x111   :  { %s7662_s12 = sld [smem:[#allocation4_spill]]  ;;  %v3284_v11 = vld [vmem:[#allocation1 + $0x104] ss:$16 sm:%s7656_s3]   ;;  %v3277_v36 = vsel %vm2175_vm2, %v3275_v52, %v3272_v25 }
 0x112   :  { %s7663_s24 = sld [smem:[#allocation6_spill]]  ;;  %v3287_v23 = vld [vmem:[#allocation1 + $0x104] ss:$16 sm:%s7657_s22]  }
 0x113   :  { %v3292_v60 = vld [vmem:[#allocation1 + $0x104] ss:$16 sm:%s7658_s0]   ;;  %s7664_s19 = sld [smem:[#allocation10_spill]]  ;;  %v3289_v0 = vsel %vm2165_vm0, %v3287_v23, %v3284_v11 }
 0x114   :  { %v3178_v62 = vld [vmem:[#allocation1 + $0x8d] ss:$16 sm:%s7659_s9]   ;;  %s7665_s17 = sld [smem:[#allocation3_spill]]  ;;  %v3294_v38 = vsel %vm2170_vm1, %v3292_v60, %v3289_v0  ;;  %s5638_s9 = smov 64  }
 0x115   :  { %v3297_v28 = vld [vmem:[#allocation1 + $0x104] ss:$16 sm:%s7660_s20]   ;;  %s7666_s18 = sld [smem:[#allocation5_spill]]  ;;  %v3180_v43 = vsel %vm2170_vm1, %v3178_v62, %v3175_v24 }
 0x116   :  { %v3201_v15 = vld [vmem:[#allocation1 + $0x18d] ss:$16 sm:%s7661_s4]   ;;  %s7667_s16 = sld [smem:[#allocation25_spill]]  ;;  %v3299_v26 = vsel %vm2175_vm2, %v3297_v28, %v3294_v38 }
 0x117   :  { %v2811_v35 = vld [vmem:[#allocation1 + $0x8e] ss:$16 sm:%s7662_s12]   ;;  %s7668_s8 = sld [smem:[#allocation17_spill]]  ;;  %v5475_v46 = vpack.i.bf16 %v3299_v26, %v3277_v36  ;;  %v3203_v16 = vsel %vm2170_vm1, %v3201_v15, %v3198_v13  ;;  %v3468_v15 = vld [vmem:[#allocation1 + $0x184] ss:$16 sm:%s6647_s27]   ;;  %s3108_s27 = smov 48 }
 0x118   :  { %v2834_v19 = vld [vmem:[#allocation1 + $0x18e] ss:$16 sm:%s7663_s24]   ;;  %s7669_s5 = sld [smem:[#allocation86_spill]]  ;;  %v2813_v18 = vsel %vm2170_vm1, %v2811_v35, %v2808_v17  ;;  %v3471_v17 = vld [vmem:[#allocation1 + $0x184] ss:$16 sm:%s6649_s15]  }
 0x119   :  { %s7670_s13 = sld [smem:[#allocation30_spill]]  ;;  %v3183_v3 = vld [vmem:[#allocation1 + $0x8d] ss:$16 sm:%s7664_s19]   ;;  %v2836_v48 = vsel %vm2170_vm1, %v2834_v19, %v2831_v2  ;;  %5476 = vrot.lane.b32.xlu0 %v5475_v46, %s5638_s9  ;;  %v3078_v19 = vld [vmem:[#allocation1 + $0x85] ss:$16 sm:%s6793_s6]   ;;  %s6869_s6 = smov 192 }
 0x11a   :  { %s7671_s26 = sld [smem:[#allocation88_spill]]  ;;  %v3206_v41 = vld [vmem:[#allocation1 + $0x18d] ss:$16 sm:%s7665_s17]   ;;  %v3185_v56 = vsel %vm2175_vm2, %v3183_v3, %v3180_v43  ;;  %v3081_v36 = vld [vmem:[#allocation1 + $0x85] ss:$16 sm:%s6795_s23]   ;;  %s3536_s23 = smov 3 }
 0x11b   :  { %s7672_s11 = sld [smem:[#allocation11_spill]]  ;;  %v2816_v44 = vld [vmem:[#allocation1 + $0x8e] ss:$16 sm:%s7666_s18]   ;;  %v3208_v63 = vsel %vm2175_vm2, %v3206_v41, %v3203_v16  ;;  %v3537_v43 = vld [vmem:[#allocation1 + $0x8c] ss:$16 sm:%s3536_s23]   ;;  %s3696_s23 = smov 3 }
 0x11c   :  { %s7673_s7 = sld [smem:[#allocation12_spill]]  ;;  %v2839_v45 = vld [vmem:[#allocation1 + $0x18e] ss:$16 sm:%s7667_s16]   ;;  %v2818_v1 = vsel %vm2175_vm2, %v2816_v44, %v2813_v18  ;;  %v5465_v47 = vpack.i.bf16 %v3208_v63, %v3185_v56  ;;  %v3109_v16 = vld [vmem:[#allocation1 + $0x185] ss:$16 sm:%s3108_s27]   ;;  %s3681_s27 = smov 48 }
 0x11d   :  { %s7674_s2 = sld [smem:[#allocation26_spill]]  ;;  %v3307_v30 = vld [vmem:[#allocation1 + $0x204] ss:$16 sm:%s7668_s8]   ;;  %v2841_v4 = vsel %vm2175_vm2, %v2839_v45, %v2836_v48 }
 0x11e   :  { %s7675_s3 = sld [smem:[#allocation27_spill]]  ;;  %v3310_v31 = vld [vmem:[#allocation1 + $0x204] ss:$16 sm:%s7669_s5]   ;;  %v5425_v11 = vpack.i.bf16 %v2841_v4, %v2818_v1  ;;  %5466 = vrot.lane.b32.xlu1 %v5465_v47, %s5637_s30 }
 0x11f   :  { %s7676_s22 = sld [smem:[#allocation28_spill]]  ;;  %v3330_v50 = vld [vmem:[#allocation1 + $0x304] ss:$16 sm:%s7670_s13]   ;;  %v3312_v29 = vsel %vm2165_vm0, %v3310_v31, %v3307_v30  ;;  %s3100_s13 = smov 3  ;;  %v3086_v30 = vld [vmem:[#allocation1 + $0x85] ss:$16 sm:%s6807_s21]  }
 0x120   :  { %s7677_s0 = sld [smem:[#allocation29_spill]]  ;;  %v3333_v51 = vld [vmem:[#allocation1 + $0x304] ss:$16 sm:%s7671_s26]   ;;  %v3101_v3 = vld [vmem:[#allocation1 + $0x185] ss:$16 sm:%s3100_s13]   ;;  %5426 = vrot.lane.b32.xlu2 %v5425_v11, %s7536_s29  ;;  %s3544_s29 = smov 48 }
 0x121   :  { %s7678_s20 = sld [smem:[#allocation48_spill]]  ;;  %v2940_v53 = vld [vmem:[#allocation1 + $0x205] ss:$16 sm:%s7672_s11]   ;;  %v3335_v32 = vsel %vm2165_vm0, %v3333_v51, %v3330_v50  ;;  %s3103_s11 = smov 12  ;;  %v3545_v48 = vld [vmem:[#allocation1 + $0x8c] ss:$16 sm:%s3544_s29]  }
 0x122   :  { %s7679_s4 = sld [smem:[#allocation50_spill]]  ;;  %v2943_v54 = vld [vmem:[#allocation1 + $0x205] ss:$16 sm:%s7673_s7]   ;;  %v3550_v31 = vld [vmem:[#allocation1 + $0x8c] ss:$16 sm:%s3549_s1]   ;;  %s3559_s21 = smov 3 }
 0x123   :  { %s7680_s12 = sld [smem:[#allocation35_spill]]  ;;  %v3399_v22 = vld [vmem:[#allocation1 + $0x20c] ss:$16 sm:%s7674_s2]   ;;  %v2945_v52 = vsel %vm2165_vm0, %v2943_v54, %v2940_v53  ;;  %v3104_v41 = vld [vmem:[#allocation1 + $0x185] ss:$16 sm:%s3103_s11]   ;;  %s3539_s2 = smov 12  ;;  %v3473_v53 = vsel %vm2165_vm0, %v3471_v17, %v3468_v15 }
 0x124   :  { %s7681_s10 = sld [smem:[#allocation87_spill]]  ;;  %v3402_v57 = vld [vmem:[#allocation1 + $0x20c] ss:$16 sm:%s7675_s3]   ;;  %s3562_s3 = smov 12  ;;  %v3106_v56 = vsel %vm2165_vm0, %v3104_v41, %v3101_v3 }
 0x125   :  { %s7682_s25 = sld [smem:[#allocation89_spill]]  ;;  %v3407_v59 = vld [vmem:[#allocation1 + $0x20c] ss:$16 sm:%s7676_s22]   ;;  %v3404_v39 = vsel %vm2165_vm0, %v3402_v57, %v3399_v22  ;;  %v3083_v22 = vsel %vm2165_vm0, %v3081_v36, %v3078_v19  ;;  %s3241_s13 = smov 12 }
 0x126   :  { %s7683_s24 = sld [smem:[#allocation36_spill]]  ;;  %v3412_v61 = vld [vmem:[#allocation1 + $0x20c] ss:$16 sm:%s7677_s0]   ;;  %v3409_v49 = vsel %vm2170_vm1, %v3407_v59, %v3404_v39  ;;  %s3567_s0 = smov 48  ;;  %v3481_v39 = vld [vmem:[#allocation1 + $0x184] ss:$16 sm:%s6746_s14]  }
 0x127   :  { %s7684_s19 = sld [smem:[#allocation18_spill]]  ;;  %v3422_v27 = vld [vmem:[#allocation1 + $0x30c] ss:$16 sm:%s7678_s20]   ;;  %v3414_v34 = vsel %vm2175_vm2, %v3412_v61, %v3409_v49  ;;  %s3572_s20 = smov 192  ;;  %v3111_v49 = vsel %vm2170_vm1, %v3109_v16, %v3106_v56 }
 0x128   :  { %v3425_v5 = vld [vmem:[#allocation1 + $0x30c] ss:$16 sm:%s7679_s4]   ;;  %s7685_s17 = sld [smem:[#allocation13_spill]]  ;;  %s3582_s4 = smov 3 }
 0x129   :  { %v3430_v40 = vld [vmem:[#allocation1 + $0x30c] ss:$16 sm:%s7680_s12]   ;;  %s7686_s18 = sld [smem:[#allocation49_spill]]  ;;  %v3427_v8 = vsel %vm2165_vm0, %v3425_v5, %v3422_v27  ;;  %s3585_s12 = smov 12 }
 0x12a   :  { %v3315_v6 = vld [vmem:[#allocation1 + $0x204] ss:$16 sm:%s7681_s10]   ;;  %s7687_s16 = sld [smem:[#allocation90_spill]]  ;;  %v3432_v42 = vsel %vm2170_vm1, %v3430_v40, %v3427_v8  ;;  %v3540_v44 = vld [vmem:[#allocation1 + $0x8c] ss:$16 sm:%s3539_s2]   ;;  %s6891_s14 = smov 48  ;;  %v3478_v40 = vsel %vm2170_vm1, %v3476_v9, %v3473_v53 }
 0x12b   :  { %v3338_v7 = vld [vmem:[#allocation1 + $0x304] ss:$16 sm:%s7682_s25]   ;;  %s7688_s8 = sld [smem:[#allocation47_spill]]  ;;  %v3317_v23 = vsel %vm2170_vm1, %v3315_v6, %v3312_v29  ;;  %v3542_v18 = vsel %vm2165_vm0, %v3540_v44, %v3537_v43  ;;  %v3560_v33 = vld [vmem:[#allocation1 + $0x18c] ss:$16 sm:%s3559_s21]   ;;  %s6893_s10 = smov 192 }
 0x12c   :  { %v3435_v10 = vld [vmem:[#allocation1 + $0x30c] ss:$16 sm:%s7683_s24]   ;;  %s7689_s5 = sld [smem:[#allocation14_spill]]  ;;  %v3340_v60 = vsel %vm2170_vm1, %v3338_v7, %v3335_v32  ;;  %v3547_v54 = vsel %vm2170_vm1, %v3545_v48, %v3542_v18  ;;  %v3091_v29 = vld [vmem:[#allocation1 + $0x85] ss:$16 sm:%s6809_s28]   ;;  %s3605_s28 = smov 3  ;;  %v3088_v7 = vsel %vm2170_vm1, %v3086_v30, %v3083_v22 }
 0x12d   :  { %s7690_s26 = sld [smem:[#allocation37_spill]]  ;;  %v3320_v12 = vld [vmem:[#allocation1 + $0x204] ss:$16 sm:%s7684_s19]   ;;  %v3437_v58 = vsel %vm2175_vm2, %v3435_v10, %v3432_v42  ;;  %v3563_v37 = vld [vmem:[#allocation1 + $0x18c] ss:$16 sm:%s3562_s3]   ;;  %v3552_v57 = vsel %vm2175_vm2, %v3550_v31, %v3547_v54  ;;  %s3608_s25 = smov 12 }
 0x12e   :  { %s7691_s7 = sld [smem:[#allocation43_spill]]  ;;  %v2948_v55 = vld [vmem:[#allocation1 + $0x205] ss:$16 sm:%s7685_s17]   ;;  %v5490_v25 = vpack.i.bf16 %v3437_v58, %v3414_v34  ;;  %v3322_v38 = vsel %vm2175_vm2, %v3320_v12, %v3317_v23  ;;  %v3565_v59 = vsel %vm2165_vm0, %v3563_v37, %v3560_v33  ;;  %v3568_v61 = vld [vmem:[#allocation1 + $0x18c] ss:$16 sm:%s3567_s0]   ;;  %s3613_s24 = smov 48 }
 0x12f   :  { %v2971_v21 = vld [vmem:[#allocation1 + $0x305] ss:$16 sm:%s7686_s18]   ;;  %s7692_s15 = sld [smem:[#allocation44_spill]]  ;;  %v2950_v35 = vsel %vm2170_vm1, %v2948_v55, %v2945_v52  ;;  %v3573_v63 = vld [vmem:[#allocation1 + $0x18c] ss:$16 sm:%s3572_s20]   ;;  %v3570_v27 = vsel %vm2170_vm1, %v3568_v61, %v3565_v59  ;;  %s3618_s19 = smov 192  ;;  %v3483_v52 = vsel %vm2175_vm2, %v3481_v39, %v3478_v40 }
 0x130   :  { %v3343_v24 = vld [vmem:[#allocation1 + $0x304] ss:$16 sm:%s7687_s16]   ;;  %v2973_v2 = vsel %vm2170_vm1, %v2971_v21, %v2968_v14  ;;  %5491 = vrot.lane.b32.xlu0 %v5490_v25, %s5638_s9  ;;  %s7693_s22 = sld [smem:[#allocation45_spill]]  ;;  %v3114_v6 = vld [vmem:[#allocation1 + $0x185] ss:$16 sm:%s6869_s6]   ;;  %v3575_v32 = vsel %vm2175_vm2, %v3573_v63, %v3570_v27  ;;  %s3215_s17 = smov 3  ;;  %v3093_v21 = vsel %vm2175_vm2, %v3091_v29, %v3088_v7 }
 0x131   :  { %v2953_v62 = vld [vmem:[#allocation1 + $0x205] ss:$16 sm:%s7688_s8]   ;;  %v3345_v20 = vsel %vm2175_vm2, %v3343_v24, %v3340_v60  ;;  %v5505_v8 = vpack.i.bf16 %v3575_v32, %v3552_v57  ;;  %v3583_v10 = vld [vmem:[#allocation1 + $0x28c] ss:$16 sm:%s3582_s4]   ;;  %s3218_s18 = smov 12  ;;  %s3223_s16 = smov 48  ;;  %v3116_v58 = vsel %vm2175_vm2, %v3114_v6, %v3111_v49 }
 0x132   :  { %v2976_v13 = vld [vmem:[#allocation1 + $0x305] ss:$16 sm:%s7689_s5]   ;;  %v2955_v45 = vsel %vm2175_vm2, %v2953_v62, %v2950_v35  ;;  %v5480_v50 = vpack.i.bf16 %v3345_v20, %v3322_v38  ;;  %v3586_v34 = vld [vmem:[#allocation1 + $0x28c] ss:$16 sm:%s3585_s12]   ;;  %v3216_v55 = vld [vmem:[#allocation1 + $0x28d] ss:$16 sm:%s3215_s17]   ;;  %v5455_v19 = vpack.i.bf16 %v3116_v58, %v3093_v21 }
 0x133   :  { %v3445_v0 = vld [vmem:[#allocation1 + $0x84] ss:$16 sm:%s7690_s26]   ;;  %v2978_v46 = vsel %vm2175_vm2, %v2976_v13, %v2973_v2  ;;  %v3606_v42 = vld [vmem:[#allocation1 + $0x38c] ss:$16 sm:%s3605_s28]   ;;  %v3219_v14 = vld [vmem:[#allocation1 + $0x28d] ss:$16 sm:%s3218_s18]   ;;  %v3588_v60 = vsel %vm2165_vm0, %v3586_v34, %v3583_v10 }
 0x134   :  { %v3448_v28 = vld [vmem:[#allocation1 + $0x84] ss:$16 sm:%s7691_s7]   ;;  %v5440_v1 = vpack.i.bf16 %v2978_v46, %v2955_v45  ;;  %5481 = vrot.lane.b32.xlu1 %v5480_v50, %s5638_s9  ;;  %v3609_v47 = vld [vmem:[#allocation1 + $0x38c] ss:$16 sm:%s3608_s25]   ;;  %s3228_s8 = smov 192  ;;  %s3238_s5 = smov 3  ;;  %v3221_v15 = vsel %vm2165_vm0, %v3219_v14, %v3216_v55 }
 0x135   :  { %v3453_v26 = vld [vmem:[#allocation1 + $0x84] ss:$16 sm:%s7692_s15]   ;;  %v3450_v51 = vsel %vm2165_vm0, %v3448_v28, %v3445_v0  ;;  %v3591_v11 = vld [vmem:[#allocation1 + $0x28c] ss:$16 sm:%s6891_s14]   ;;  %v3611_v24 = vsel %vm2165_vm0, %v3609_v47, %v3606_v42  ;;  %v3239_v62 = vld [vmem:[#allocation1 + $0x38d] ss:$16 sm:%s3238_s5]  }
 0x136   :  { %v3458_v4 = vld [vmem:[#allocation1 + $0x84] ss:$16 sm:%s7693_s22]   ;;  %v3455_v5 = vsel %vm2170_vm1, %v3453_v26, %v3450_v51  ;;  %5441 = vrot.lane.b32.xlu2 %v5440_v1, %s5637_s30  ;;  %v3614_v23 = vld [vmem:[#allocation1 + $0x38c] ss:$16 sm:%s3613_s24]   ;;  %v3242_v13 = vld [vmem:[#allocation1 + $0x38d] ss:$16 sm:%s3241_s13]   ;;  %v3593_v3 = vsel %vm2170_vm1, %v3591_v11, %v3588_v60 }
 0x137   :  { %v3460_v12 = vsel %vm2175_vm2, %v3458_v4, %v3455_v5  ;;  %s3246_s26 = smov 48  ;;  %s3251_s11 = smov 192  ;;  %v3596_v0 = vld [vmem:[#allocation1 + $0x28c] ss:$16 sm:%s6893_s10]   ;;  %v3224_v17 = vld [vmem:[#allocation1 + $0x28d] ss:$16 sm:%s3223_s16]   ;;  %v3244_v35 = vsel %vm2165_vm0, %v3242_v13, %v3239_v62  ;;  %v3616_v41 = vsel %vm2170_vm1, %v3614_v23, %v3611_v24 }
 0x138   :  { %5506 = vrot.lane.b32.xlu0 %v5505_v8, %s5638_s9  ;;  %v5495_v25 = vpack.i.bf16 %v3483_v52, %v3460_v12  ;;  %v3619_v28 = vld [vmem:[#allocation1 + $0x38c] ss:$16 sm:%s3618_s19]   ;;  %v3247_v2 = vld [vmem:[#allocation1 + $0x38d] ss:$16 sm:%s3246_s26]   ;;  %s3673_s7 = smov 3  ;;  %s3676_s15 = smov 12  ;;  %v3226_v43 = vsel %vm2170_vm1, %v3224_v17, %v3221_v15  ;;  %v3598_v31 = vsel %vm2175_vm2, %v3596_v0, %v3593_v3 }
 0x139   :  { %v3229_v36 = vld [vmem:[#allocation1 + $0x28d] ss:$16 sm:%s3228_s8]   ;;  %v3674_v20 = vld [vmem:[#allocation1 + $0x203] ss:$16 sm:%s3673_s7]   ;;  %s3686_s6 = smov 192  ;;  %v3249_v44 = vsel %vm2170_vm1, %v3247_v2, %v3244_v35  ;;  %s3699_s2 = smov 12  ;;  %v3621_v50 = vsel %vm2175_vm2, %v3619_v28, %v3616_v41 }
 0x13a   :  { %v3252_v38 = vld [vmem:[#allocation1 + $0x38d] ss:$16 sm:%s3251_s11]   ;;  %v3677_v26 = vld [vmem:[#allocation1 + $0x203] ss:$16 sm:%s3676_s15]   ;;  %s3704_s29 = smov 48  ;;  %s3709_s1 = smov 192  ;;  %v3231_v37 = vsel %vm2175_vm2, %v3229_v36, %v3226_v43  ;;  %v5510_v4 = vpack.i.bf16 %v3621_v50, %v3598_v31 }
 0x13b   :  { %v3682_v9 = vld [vmem:[#allocation1 + $0x203] ss:$16 sm:%s3681_s27]   ;;  %v3679_v45 = vsel %vm2165_vm0, %v3677_v26, %v3674_v20  ;;  %s3719_s21 = smov 3  ;;  %s3722_s3 = smov 12  ;;  %v3254_v22 = vsel %vm2175_vm2, %v3252_v38, %v3249_v44 }
 0x13c   :  { %v3687_v46 = vld [vmem:[#allocation1 + $0x203] ss:$16 sm:%s3686_s6]   ;;  %5496 = vrot.lane.b32.xlu1 %v5495_v25, %s5638_s9  ;;  %v3684_v16 = vsel %vm2170_vm1, %v3682_v9, %v3679_v45  ;;  %v3720_v33 = vld [vmem:[#allocation1 + $0xb] ss:$16 sm:%s3719_s21]   ;;  %s3727_s22 = smov 48  ;;  %s3732_s0 = smov 192  ;;  %v5470_v29 = vpack.i.bf16 %v3254_v22, %v3231_v37 }
 0x13d   :  { %v3697_v30 = vld [vmem:[#allocation1 + $0x303] ss:$16 sm:%s3696_s23]   ;;  %v3689_v51 = vsel %vm2175_vm2, %v3687_v46, %v3684_v16  ;;  %v3723_v57 = vld [vmem:[#allocation1 + $0xb] ss:$16 sm:%s3722_s3]   ;;  %s3742_s20 = smov 3  ;;  %s3745_s4 = smov 12 }
 0x13e   :  { %v3700_v18 = vld [vmem:[#allocation1 + $0x303] ss:$16 sm:%s3699_s2]   ;;  %5456 = vrot.lane.b32.xlu2 %v5455_v19, %s5637_s30  ;;  %v3725_v61 = vsel %vm2165_vm0, %v3723_v57, %v3720_v33  ;;  %v3728_v63 = vld [vmem:[#allocation1 + $0xb] ss:$16 sm:%s3727_s22]   ;;  %s3750_s12 = smov 48  ;;  %s3755_s14 = smov 192  ;;  %v6960_v57 = vpop.permute.xlu1 %5366 }
 0x13f   :  { %v3705_v48 = vld [vmem:[#allocation1 + $0x303] ss:$16 sm:%s3704_s29]   ;;  %v3702_v53 = vsel %vm2165_vm0, %v3700_v18, %v3697_v30  ;;  %v3743_v1 = vld [vmem:[#allocation1 + $0x10b] ss:$16 sm:%s3742_s20]   ;;  %s3352_s10 = smov 3  ;;  %s3355_s28 = smov 12  ;;  %v3730_v49 = vsel %vm2170_vm1, %v3728_v63, %v3725_v61 }
 0x140   :  { %v3710_v54 = vld [vmem:[#allocation1 + $0x303] ss:$16 sm:%s3709_s1]   ;;  %v3707_v56 = vsel %vm2170_vm1, %v3705_v48, %v3702_v53  ;;  %v3733_v27 = vld [vmem:[#allocation1 + $0xb] ss:$16 sm:%s3732_s0]   ;;  %v3353_v7 = vld [vmem:[#allocation1 + $0xc] ss:$16 sm:%s3352_s10]  }
 0x141   :  { %v3712_v59 = vsel %vm2175_vm2, %v3710_v54, %v3707_v56  ;;  %v3746_v5 = vld [vmem:[#allocation1 + $0x10b] ss:$16 sm:%s3745_s4]   ;;  %s3360_s25 = smov 48  ;;  %s5639_s24 = smov 48   ;;  %v3356_v10 = vld [vmem:[#allocation1 + $0xc] ss:$16 sm:%s3355_s28]   ;;  %v3735_v21 = vsel %vm2175_vm2, %v3733_v27, %v3730_v49 }
 0x142   :  { %v5520_v39 = vpack.i.bf16 %v3712_v59, %v3689_v51  ;;  %v3751_v40 = vld [vmem:[#allocation1 + $0x10b] ss:$16 sm:%s3750_s12]   ;;  %v3748_v6 = vsel %vm2165_vm0, %v3746_v5, %v3743_v1  ;;  %v3361_v34 = vld [vmem:[#allocation1 + $0xc] ss:$16 sm:%s3360_s25]   ;;  %s3365_s19 = smov 192  ;;  %s3375_s17 = smov 3  ;;  %v3358_v42 = vsel %vm2165_vm0, %v3356_v10, %v3353_v7  ;;  %v6962_v59 = vpop.permute.xlu0 %5356 }
 0x143   :  { %v3756_v32 = vld [vmem:[#allocation1 + $0x10b] ss:$16 sm:%s3755_s14]   ;;  %v3753_v8 = vsel %vm2170_vm1, %v3751_v40, %v3748_v6  ;;  %v3366_v47 = vld [vmem:[#allocation1 + $0xc] ss:$16 sm:%s3365_s19]   ;;  %s3378_s18 = smov 12  ;;  %s3383_s16 = smov 48  ;;  %v3363_v52 = vsel %vm2170_vm1, %v3361_v34, %v3358_v42 }
 0x144   :  { %5521 = vrot.lane.b32.xlu0 %v5520_v39, %s5639_s24  ;;  %v3376_v12 = vld [vmem:[#allocation1 + $0x10c] ss:$16 sm:%s3375_s17]   ;;  %5511 = vrot.lane.b32.xlu1 %v5510_v4, %s5638_s9  ;;  %s3388_s8 = smov 192  ;;  %s3811_s5 = smov 3  ;;  %v3758_v58 = vsel %vm2175_vm2, %v3756_v32, %v3753_v8  ;;  %v3368_v24 = vsel %vm2175_vm2, %v3366_v47, %v3363_v52 }
 0x145   :  { %v3379_v55 = vld [vmem:[#allocation1 + $0x10c] ss:$16 sm:%s3378_s18]   ;;  %v3812_v60 = vld [vmem:[#allocation1 + $0x83] ss:$16 sm:%s3811_s5]   ;;  %s3819_s13 = smov 48  ;;  %s3824_s26 = smov 192  ;;  %v5525_v35 = vpack.i.bf16 %v3758_v58, %v3735_v21 }
 0x146   :  { %v3384_v14 = vld [vmem:[#allocation1 + $0x10c] ss:$16 sm:%s3383_s16]   ;;  %5471 = vrot.lane.b32.xlu2 %v5470_v29, %s5637_s30  ;;  %v3381_v11 = vsel %vm2165_vm0, %v3379_v55, %v3376_v12  ;;  %s3814_s30 = smov 12  ;;  %v3820_v25 = vld [vmem:[#allocation1 + $0x83] ss:$16 sm:%s3819_s13]   ;;  %s3834_s11 = smov 3 }
 0x147   :  { %v3389_v23 = vld [vmem:[#allocation1 + $0x10c] ss:$16 sm:%s3388_s8]   ;;  %v3386_v62 = vsel %vm2170_vm1, %v3384_v14, %v3381_v11  ;;  %v3815_v13 = vld [vmem:[#allocation1 + $0x83] ss:$16 sm:%s3814_s30]   ;;  %s3837_s7 = smov 12  ;;  %s3842_s15 = smov 48 }
 0x148   :  { %v3391_v0 = vsel %vm2175_vm2, %v3389_v23, %v3386_v62  ;;  %v3817_v28 = vsel %vm2165_vm0, %v3815_v13, %v3812_v60  ;;  %v3825_v15 = vld [vmem:[#allocation1 + $0x83] ss:$16 sm:%s3824_s26]   ;;  %s3847_s27 = smov 192  ;;  %s3857_s6 = smov 3 }
 0x149   :  { %v3835_v17 = vld [vmem:[#allocation1 + $0x183] ss:$16 sm:%s3834_s11]   ;;  %v3822_v2 = vsel %vm2170_vm1, %v3820_v25, %v3817_v28  ;;  %v5485_v38 = vpack.i.bf16 %v3391_v0, %v3368_v24  ;;  %s3860_s23 = smov 12  ;;  %s3865_s2 = smov 48 }
 0x14a   :  { %v3838_v19 = vld [vmem:[#allocation1 + $0x183] ss:$16 sm:%s3837_s7]   ;;  %v3827_v20 = vsel %vm2175_vm2, %v3825_v15, %v3822_v2  ;;  %s3870_s29 = smov 192  ;;  %s3880_s1 = smov 3 }
 0x14b   :  { %v3843_v36 = vld [vmem:[#allocation1 + $0x183] ss:$16 sm:%s3842_s15]   ;;  %v3840_v3 = vsel %vm2165_vm0, %v3838_v19, %v3835_v17  ;;  %s3883_s21 = smov 12  ;;  %s3888_s3 = smov 48 }
 0x14c   :  { %v3848_v41 = vld [vmem:[#allocation1 + $0x183] ss:$16 sm:%s3847_s27]   ;;  %v3845_v9 = vsel %vm2170_vm1, %v3843_v36, %v3840_v3  ;;  %5526 = vrot.lane.b32.xlu1 %v5525_v35, %s5639_s24  ;;  %s3893_s22 = smov 192  ;;  %s3490_s0 = smov 3 }
 0x14d   :  { %v3858_v26 = vld [vmem:[#allocation1 + $0x283] ss:$16 sm:%s3857_s6]   ;;  %v3850_v45 = vsel %vm2175_vm2, %v3848_v41, %v3845_v9  ;;  %v3491_v33 = vld [vmem:[#allocation1 + $0x284] ss:$16 sm:%s3490_s0]   ;;  %s3493_s20 = smov 12  ;;  %s3498_s4 = smov 48  ;;  %v6985_v9 = vpop.permute.xlu1 %5371 }
 0x14e   :  { %v3861_v43 = vld [vmem:[#allocation1 + $0x283] ss:$16 sm:%s3860_s23]   ;;  %v5535_v18 = vpack.i.bf16 %v3850_v45, %v3827_v20  ;;  %5486 = vrot.lane.b32.xlu2 %v5485_v38, %s5638_s9  ;;  %v3494_v22 = vld [vmem:[#allocation1 + $0x284] ss:$16 sm:%s3493_s20]   ;;  %s3503_s12 = smov 192  ;;  %s3513_s14 = smov 3 }
 0x14f   :  { %v3866_v44 = vld [vmem:[#allocation1 + $0x283] ss:$16 sm:%s3865_s2]   ;;  %v3863_v46 = vsel %vm2165_vm0, %v3861_v43, %v3858_v26  ;;  %v3499_v56 = vld [vmem:[#allocation1 + $0x284] ss:$16 sm:%s3498_s4]   ;;  %v3496_v63 = vsel %vm2165_vm0, %v3494_v22, %v3491_v33  ;;  %s3516_s10 = smov 12  ;;  %s3521_s28 = smov 48  ;;  %v6987_v43 = vpop.permute.xlu0 %5361 }
 0x150   :  { %v3871_v30 = vld [vmem:[#allocation1 + $0x283] ss:$16 sm:%s3870_s29]   ;;  %v3868_v48 = vsel %vm2170_vm1, %v3866_v44, %v3863_v46  ;;  %5536 = vrot.lane.b32.xlu0 %v5535_v18, %s5639_s24  ;;  %v3504_v1 = vld [vmem:[#allocation1 + $0x284] ss:$16 sm:%s3503_s12]   ;;  %v3501_v27 = vsel %vm2170_vm1, %v3499_v56, %v3496_v63  ;;  %s3526_s25 = smov 192  ;;  %s3949_s19 = smov 3 }
 0x151   :  { %v3881_v16 = vld [vmem:[#allocation1 + $0x383] ss:$16 sm:%s3880_s1]   ;;  %v3873_v51 = vsel %vm2175_vm2, %v3871_v30, %v3868_v48  ;;  %v3514_v4 = vld [vmem:[#allocation1 + $0x384] ss:$16 sm:%s3513_s14]   ;;  %v3506_v29 = vsel %vm2175_vm2, %v3504_v1, %v3501_v27  ;;  %v3950_v7 = vld [vmem:[#allocation1 + $0x28b] ss:$16 sm:%s3949_s19]  }
 0x152   :  { %v3884_v31 = vld [vmem:[#allocation1 + $0x383] ss:$16 sm:%s3883_s21]   ;;  %v3517_v5 = vld [vmem:[#allocation1 + $0x384] ss:$16 sm:%s3516_s10]   ;;  %s3952_s17 = smov 12  ;;  %s3957_s18 = smov 48 }
 0x153   :  { %v3889_v50 = vld [vmem:[#allocation1 + $0x383] ss:$16 sm:%s3888_s3]   ;;  %v3886_v53 = vsel %vm2165_vm0, %v3884_v31, %v3881_v16  ;;  %v3522_v40 = vld [vmem:[#allocation1 + $0x384] ss:$16 sm:%s3521_s28]   ;;  %v3519_v6 = vsel %vm2165_vm0, %v3517_v5, %v3514_v4  ;;  %v3953_v8 = vld [vmem:[#allocation1 + $0x28b] ss:$16 sm:%s3952_s17]   ;;  %v6991_v16 = vpop.permute.xlu2 %5376 }
 0x154   :  { %v3894_v54 = vld [vmem:[#allocation1 + $0x383] ss:$16 sm:%s3893_s22]   ;;  %v3891_v37 = vsel %vm2170_vm1, %v3889_v50, %v3886_v53  ;;  %v3527_v32 = vld [vmem:[#allocation1 + $0x384] ss:$16 sm:%s3526_s25]   ;;  %v3524_v49 = vsel %vm2170_vm1, %v3522_v40, %v3519_v6  ;;  %v3958_v10 = vld [vmem:[#allocation1 + $0x28b] ss:$16 sm:%s3957_s18]   ;;  %v3955_v42 = vsel %vm2165_vm0, %v3953_v8, %v3950_v7 }
 0x155   :  { %v3896_v61 = vsel %vm2175_vm2, %v3894_v54, %v3891_v37  ;;  %s3962_s16 = smov 192  ;;  %s3972_s8 = smov 3  ;;  %v3529_v34 = vsel %vm2175_vm2, %v3527_v32, %v3524_v49  ;;  %v3960_v55 = vsel %vm2170_vm1, %v3958_v10, %v3955_v42 }
 0x156   :  { %v5540_v39 = vpack.i.bf16 %v3896_v61, %v3873_v51  ;;  %v3963_v47 = vld [vmem:[#allocation1 + $0x28b] ss:$16 sm:%s3962_s16]   ;;  %s3975_s5 = smov 12  ;;  %s3980_s30 = smov 48  ;;  %v5500_v52 = vpack.i.bf16 %v3529_v34, %v3506_v29 }
 0x157   :  { %v3973_v12 = vld [vmem:[#allocation1 + $0x38b] ss:$16 sm:%s3972_s8]   ;;  %s3985_s13 = smov 192  ;;  %s3995_s26 = smov 3  ;;  %v3965_v58 = vsel %vm2175_vm2, %v3963_v47, %v3960_v55 }
 0x158   :  { %5541 = vrot.lane.b32.xlu1 %v5540_v39, %s5639_s24  ;;  %v3976_v14 = vld [vmem:[#allocation1 + $0x38b] ss:$16 sm:%s3975_s5]   ;;  %v3996_v60 = vld [vmem:[#allocation1 + $0x2] ss:$16 sm:%s3995_s26]   ;;  %s3998_s11 = smov 12  ;;  %s4003_s7 = smov 48  ;;  %5501 = vrot.lane.b32.xlu2 %v5500_v52, %s5638_s9 }
 0x159   :  { %v3981_v21 = vld [vmem:[#allocation1 + $0x38b] ss:$16 sm:%s3980_s30]   ;;  %v3978_v11 = vsel %vm2165_vm0, %v3976_v14, %v3973_v12  ;;  %v3999_v62 = vld [vmem:[#allocation1 + $0x2] ss:$16 sm:%s3998_s11]   ;;  %s4008_s9 = smov 192  ;;  %s4017_s15 = smov 3 }
 0x15a   :  { %v3986_v23 = vld [vmem:[#allocation1 + $0x38b] ss:$16 sm:%s3985_s13]   ;;  %v3983_v24 = vsel %vm2170_vm1, %v3981_v21, %v3978_v11  ;;  %v4004_v13 = vld [vmem:[#allocation1 + $0x2] ss:$16 sm:%s4003_s7]   ;;  %v4001_v0 = vsel %vm2165_vm0, %v3999_v62, %v3996_v60  ;;  %s4020_s27 = smov 12  ;;  %s4025_s6 = smov 48 }
 0x15b   :  { %v3988_v25 = vsel %vm2175_vm2, %v3986_v23, %v3983_v24  ;;  %v4009_v28 = vld [vmem:[#allocation1 + $0x2] ss:$16 sm:%s4008_s9]   ;;  %v4006_v17 = vsel %vm2170_vm1, %v4004_v13, %v4001_v0  ;;  %s4030_s23 = smov 192  ;;  %s3628_s2 = smov 3 }
 0x15c   :  { %v5550_v15 = vpack.i.bf16 %v3988_v25, %v3965_v58  ;;  %v4018_v35 = vld [vmem:[#allocation1 + $0x102] ss:$16 sm:%s4017_s15]   ;;  %v4011_v19 = vsel %vm2175_vm2, %v4009_v28, %v4006_v17  ;;  %s3631_s29 = smov 12  ;;  %v3629_v41 = vld [vmem:[#allocation1 + $0x3] ss:$16 sm:%s3628_s2]   ;;  %s3636_s1 = smov 48  ;;  %v7014_v17 = vpop.permute.xlu0 %5386 }
 0x15d   :  { %v4021_v2 = vld [vmem:[#allocation1 + $0x102] ss:$16 sm:%s4020_s27]   ;;  %v3632_v26 = vld [vmem:[#allocation1 + $0x3] ss:$16 sm:%s3631_s29]   ;;  %s3641_s21 = smov 192  ;;  %s3650_s3 = smov 3 }
 0x15e   :  { %v4023_v36 = vsel %vm2165_vm0, %v4021_v2, %v4018_v35  ;;  %v4026_v38 = vld [vmem:[#allocation1 + $0x102] ss:$16 sm:%s4025_s6]   ;;  %5551 = vrot.lane.b32.xlu0 %v5550_v15, %s5639_s24  ;;  %v3634_v45 = vsel %vm2165_vm0, %v3632_v26, %v3629_v41  ;;  %v3637_v46 = vld [vmem:[#allocation1 + $0x3] ss:$16 sm:%s3636_s1]   ;;  %s3653_s22 = smov 12  ;;  %s3658_s0 = smov 48  ;;  %v7016_v35 = vpop.permute.xlu1 %5391 }
 0x15f   :  { %v4031_v20 = vld [vmem:[#allocation1 + $0x102] ss:$16 sm:%s4030_s23]   ;;  %v4028_v3 = vsel %vm2170_vm1, %v4026_v38, %v4023_v36  ;;  %v3642_v30 = vld [vmem:[#allocation1 + $0x3] ss:$16 sm:%s3641_s21]   ;;  %v3639_v48 = vsel %vm2170_vm1, %v3637_v46, %v3634_v45  ;;  %s3663_s20 = smov 192  ;;  %s4086_s4 = smov 3 }
 0x160   :  { %v4033_v44 = vsel %vm2175_vm2, %v4031_v20, %v4028_v3  ;;  %v3651_v31 = vld [vmem:[#allocation1 + $0x103] ss:$16 sm:%s3650_s3]   ;;  %v3644_v51 = vsel %vm2175_vm2, %v3642_v30, %v3639_v48  ;;  %s4089_s12 = smov 12  ;;  %s5640_s14 = smov 32   ;;  %v4087_v22 = vld [vmem:[#allocation1 + $0xa] ss:$16 sm:%s4086_s4]  }
 0x161   :  { %v5555_v18 = vpack.i.bf16 %v4033_v44, %v4011_v19  ;;  %v3654_v50 = vld [vmem:[#allocation1 + $0x103] ss:$16 sm:%s3653_s22]   ;;  %v4090_v56 = vld [vmem:[#allocation1 + $0xa] ss:$16 sm:%s4089_s12]   ;;  %s4094_s10 = smov 48  ;;  %s4099_s28 = smov 192 }
 0x162   :  { %v3656_v53 = vsel %vm2165_vm0, %v3654_v50, %v3651_v31  ;;  %v3659_v54 = vld [vmem:[#allocation1 + $0x103] ss:$16 sm:%s3658_s0]   ;;  %v4092_v63 = vsel %vm2165_vm0, %v4090_v56, %v4087_v22  ;;  %v4095_v1 = vld [vmem:[#allocation1 + $0xa] ss:$16 sm:%s4094_s10]   ;;  %s4109_s25 = smov 3  ;;  %s4112_s19 = smov 12 }
 0x163   :  { %v3664_v33 = vld [vmem:[#allocation1 + $0x103] ss:$16 sm:%s3663_s20]   ;;  %5556 = vrot.lane.b32.xlu1 %v5555_v18, %s5640_s14  ;;  %v3661_v37 = vsel %vm2170_vm1, %v3659_v54, %v3656_v53  ;;  %v4100_v4 = vld [vmem:[#allocation1 + $0xa] ss:$16 sm:%s4099_s28]   ;;  %v4097_v27 = vsel %vm2170_vm1, %v4095_v1, %v4092_v63  ;;  %s4117_s17 = smov 48  ;;  %s4122_s18 = smov 192 }
 0x164   :  { %v3666_v61 = vsel %vm2175_vm2, %v3664_v33, %v3661_v37  ;;  %v4110_v5 = vld [vmem:[#allocation1 + $0x10a] ss:$16 sm:%s4109_s25]   ;;  %v4102_v29 = vsel %vm2175_vm2, %v4100_v4, %v4097_v27  ;;  %s4132_s16 = smov 3  ;;  %s4135_s8 = smov 12 }
 0x165   :  { %v5515_v39 = vpack.i.bf16 %v3666_v61, %v3644_v51  ;;  %v4113_v40 = vld [vmem:[#allocation1 + $0x10a] ss:$16 sm:%s4112_s19]   ;;  %s4140_s5 = smov 48  ;;  %s4145_s30 = smov 192 }
 0x166   :  { %v4115_v6 = vsel %vm2165_vm0, %v4113_v40, %v4110_v5  ;;  %v4118_v32 = vld [vmem:[#allocation1 + $0x10a] ss:$16 sm:%s4117_s17]   ;;  %s4155_s13 = smov 3  ;;  %s4158_s26 = smov 12  ;;  %v7032_v40 = vpop.permute.xlu2 %5381 }
 0x167   :  { %v4123_v7 = vld [vmem:[#allocation1 + $0x10a] ss:$16 sm:%s4122_s18]   ;;  %5516 = vrot.lane.b32.xlu2 %v5515_v39, %s5639_s24  ;;  %v4120_v49 = vsel %vm2170_vm1, %v4118_v32, %v4115_v6  ;;  %s4163_s11 = smov 48  ;;  %s4168_s7 = smov 192 }
 0x168   :  { %v4133_v8 = vld [vmem:[#allocation1 + $0x20a] ss:$16 sm:%s4132_s16]   ;;  %v4125_v34 = vsel %vm2175_vm2, %v4123_v7, %v4120_v49  ;;  %s3765_s9 = smov 3  ;;  %s3768_s15 = smov 12 }
 0x169   :  { %v4136_v10 = vld [vmem:[#allocation1 + $0x20a] ss:$16 sm:%s4135_s8]   ;;  %v5565_v52 = vpack.i.bf16 %v4125_v34, %v4102_v29  ;;  %v3766_v62 = vld [vmem:[#allocation1 + $0x20b] ss:$16 sm:%s3765_s9]   ;;  %s3773_s27 = smov 48  ;;  %s3778_s6 = smov 192 }
 0x16a   :  { %v4138_v42 = vsel %vm2165_vm0, %v4136_v10, %v4133_v8  ;;  %v4141_v47 = vld [vmem:[#allocation1 + $0x20a] ss:$16 sm:%s4140_s5]   ;;  %v3769_v13 = vld [vmem:[#allocation1 + $0x20b] ss:$16 sm:%s3768_s15]   ;;  %s3788_s23 = smov 3  ;;  %s3791_s2 = smov 12 }
 0x16b   :  { %v4146_v12 = vld [vmem:[#allocation1 + $0x20a] ss:$16 sm:%s4145_s30]   ;;  %v4143_v55 = vsel %vm2170_vm1, %v4141_v47, %v4138_v42  ;;  %5566 = vrot.lane.b32.xlu0 %v5565_v52, %s5640_s14  ;;  %v3771_v0 = vsel %vm2165_vm0, %v3769_v13, %v3766_v62  ;;  %v3774_v28 = vld [vmem:[#allocation1 + $0x20b] ss:$16 sm:%s3773_s27]   ;;  %s3796_s29 = smov 48  ;;  %s3801_s1 = smov 192 }
 0x16c   :  { %v4156_v14 = vld [vmem:[#allocation1 + $0x30a] ss:$16 sm:%s4155_s13]   ;;  %v4148_v58 = vsel %vm2175_vm2, %v4146_v12, %v4143_v55  ;;  %v3779_v15 = vld [vmem:[#allocation1 + $0x20b] ss:$16 sm:%s3778_s6]   ;;  %v3776_v19 = vsel %vm2170_vm1, %v3774_v28, %v3771_v0  ;;  %s4224_s21 = smov 3  ;;  %s4227_s3 = smov 12 }
 0x16d   :  { %v4159_v21 = vld [vmem:[#allocation1 + $0x30a] ss:$16 sm:%s4158_s26]   ;;  %v3789_v36 = vld [vmem:[#allocation1 + $0x30b] ss:$16 sm:%s3788_s23]   ;;  %v3781_v20 = vsel %vm2175_vm2, %v3779_v15, %v3776_v19  ;;  %v4225_v45 = vld [vmem:[#allocation1 + $0x282] ss:$16 sm:%s4224_s21]  }
 0x16e   :  { %v4161_v11 = vsel %vm2165_vm0, %v4159_v21, %v4156_v14  ;;  %v4164_v23 = vld [vmem:[#allocation1 + $0x30a] ss:$16 sm:%s4163_s11]   ;;  %v3792_v38 = vld [vmem:[#allocation1 + $0x30b] ss:$16 sm:%s3791_s2]   ;;  %v4228_v46 = vld [vmem:[#allocation1 + $0x282] ss:$16 sm:%s4227_s3]  }
 0x16f   :  { %v4169_v60 = vld [vmem:[#allocation1 + $0x30a] ss:$16 sm:%s4168_s7]   ;;  %v4166_v24 = vsel %vm2170_vm1, %v4164_v23, %v4161_v11  ;;  %v3794_v3 = vsel %vm2165_vm0, %v3792_v38, %v3789_v36  ;;  %v3797_v41 = vld [vmem:[#allocation1 + $0x30b] ss:$16 sm:%s3796_s29]   ;;  %s4232_s22 = smov 48  ;;  %s4237_s0 = smov 192  ;;  %v4230_v18 = vsel %vm2165_vm0, %v4228_v46, %v4225_v45 }
 0x170   :  { %v4171_v25 = vsel %vm2175_vm2, %v4169_v60, %v4166_v24  ;;  %v3802_v26 = vld [vmem:[#allocation1 + $0x30b] ss:$16 sm:%s3801_s1]   ;;  %v3799_v44 = vsel %vm2170_vm1, %v3797_v41, %v3794_v3  ;;  %v4233_v48 = vld [vmem:[#allocation1 + $0x282] ss:$16 sm:%s4232_s22]   ;;  %s4247_s20 = smov 3  ;;  %s4250_s4 = smov 12 }
 0x171   :  { %v5570_v2 = vpack.i.bf16 %v4171_v25, %v4148_v58  ;;  %v3804_v30 = vsel %vm2175_vm2, %v3802_v26, %v3799_v44  ;;  %v4238_v31 = vld [vmem:[#allocation1 + $0x282] ss:$16 sm:%s4237_s0]   ;;  %v4235_v51 = vsel %vm2170_vm1, %v4233_v48, %v4230_v18  ;;  %s4255_s12 = smov 48  ;;  %s4260_s10 = smov 192 }
 0x172   :  { %v5530_v50 = vpack.i.bf16 %v3804_v30, %v3781_v20  ;;  %v4248_v53 = vld [vmem:[#allocation1 + $0x382] ss:$16 sm:%s4247_s20]   ;;  %v4240_v33 = vsel %vm2175_vm2, %v4238_v31, %v4235_v51  ;;  %s4270_s28 = smov 3  ;;  %s4273_s25 = smov 12  ;;  %v7048_v20 = vpop.permute.xlu2 %5396 }
 0x173   :  { %5571 = vrot.lane.b32.xlu1 %v5570_v2, %s5640_s14  ;;  %v4251_v54 = vld [vmem:[#allocation1 + $0x382] ss:$16 sm:%s4250_s4]   ;;  %v4271_v63 = vld [vmem:[#allocation1 + $0x8a] ss:$16 sm:%s4270_s28]   ;;  %s4278_s19 = smov 48  ;;  %s4283_s17 = smov 192 }
 0x174   :  { %v4253_v37 = vsel %vm2165_vm0, %v4251_v54, %v4248_v53  ;;  %v4256_v22 = vld [vmem:[#allocation1 + $0x382] ss:$16 sm:%s4255_s12]   ;;  %5531 = vrot.lane.b32.xlu2 %v5530_v50, %s5639_s24  ;;  %v4274_v1 = vld [vmem:[#allocation1 + $0x8a] ss:$16 sm:%s4273_s25]   ;;  %s4293_s18 = smov 3  ;;  %s4296_s16 = smov 12 }
 0x175   :  { %v4261_v56 = vld [vmem:[#allocation1 + $0x382] ss:$16 sm:%s4260_s10]   ;;  %v4258_v61 = vsel %vm2170_vm1, %v4256_v22, %v4253_v37  ;;  %v4276_v39 = vsel %vm2165_vm0, %v4274_v1, %v4271_v63  ;;  %v4279_v27 = vld [vmem:[#allocation1 + $0x8a] ss:$16 sm:%s4278_s19]   ;;  %s4301_s8 = smov 48  ;;  %s4306_s5 = smov 192 }
 0x176   :  { %v4263_v4 = vsel %vm2175_vm2, %v4261_v56, %v4258_v61  ;;  %v4284_v5 = vld [vmem:[#allocation1 + $0x8a] ss:$16 sm:%s4283_s17]   ;;  %v4281_v6 = vsel %vm2170_vm1, %v4279_v27, %v4276_v39  ;;  %s3903_s30 = smov 3  ;;  %s3906_s13 = smov 12 }
 0x177   :  { %v5580_v29 = vpack.i.bf16 %v4263_v4, %v4240_v33  ;;  %v4294_v32 = vld [vmem:[#allocation1 + $0x18a] ss:$16 sm:%s4293_s18]   ;;  %v4286_v49 = vsel %vm2175_vm2, %v4284_v5, %v4281_v6  ;;  %v3904_v47 = vld [vmem:[#allocation1 + $0x8b] ss:$16 sm:%s3903_s30]   ;;  %s3911_s26 = smov 48  ;;  %s3916_s11 = smov 192 }
 0x178   :  { %v4297_v7 = vld [vmem:[#allocation1 + $0x18a] ss:$16 sm:%s4296_s16]   ;;  %v3907_v12 = vld [vmem:[#allocation1 + $0x8b] ss:$16 sm:%s3906_s13]   ;;  %s3926_s7 = smov 3  ;;  %s3929_s9 = smov 12 }
 0x179   :  { %v4299_v8 = vsel %vm2165_vm0, %v4297_v7, %v4294_v32  ;;  %v4302_v10 = vld [vmem:[#allocation1 + $0x18a] ss:$16 sm:%s4301_s8]   ;;  %5581 = vrot.lane.b32.xlu0 %v5580_v29, %s5640_s14  ;;  %v3909_v55 = vsel %vm2165_vm0, %v3907_v12, %v3904_v47  ;;  %v3912_v14 = vld [vmem:[#allocation1 + $0x8b] ss:$16 sm:%s3911_s26]   ;;  %s3934_s15 = smov 48  ;;  %s3939_s27 = smov 192 }
 0x17a   :  { %v4307_v34 = vld [vmem:[#allocation1 + $0x18a] ss:$16 sm:%s4306_s5]   ;;  %v4304_v42 = vsel %vm2170_vm1, %v4302_v10, %v4299_v8  ;;  %v3917_v21 = vld [vmem:[#allocation1 + $0x8b] ss:$16 sm:%s3916_s11]   ;;  %v3914_v11 = vsel %vm2170_vm1, %v3912_v14, %v3909_v55  ;;  %s4362_s6 = smov 3  ;;  %s4365_s23 = smov 12 }
 0x17b   :  { %v4309_v52 = vsel %vm2175_vm2, %v4307_v34, %v4304_v42  ;;  %v3927_v23 = vld [vmem:[#allocation1 + $0x18b] ss:$16 sm:%s3926_s7]   ;;  %v3919_v24 = vsel %vm2175_vm2, %v3917_v21, %v3914_v11  ;;  %v4363_v28 = vld [vmem:[#allocation1 + $0x1] ss:$16 sm:%s4362_s6]   ;;  %s4370_s2 = smov 48  ;;  %s4375_s29 = smov 192 }
 0x17c   :  { %v5585_v58 = vpack.i.bf16 %v4309_v52, %v4286_v49  ;;  %v3930_v60 = vld [vmem:[#allocation1 + $0x18b] ss:$16 sm:%s3929_s9]   ;;  %v4366_v15 = vld [vmem:[#allocation1 + $0x1] ss:$16 sm:%s4365_s23]   ;;  %s4384_s1 = smov 3  ;;  %s4387_s21 = smov 12 }
 0x17d   :  { %v3932_v62 = vsel %vm2165_vm0, %v3930_v60, %v3927_v23  ;;  %v3935_v13 = vld [vmem:[#allocation1 + $0x18b] ss:$16 sm:%s3934_s15]   ;;  %v4368_v19 = vsel %vm2165_vm0, %v4366_v15, %v4363_v28  ;;  %v4371_v36 = vld [vmem:[#allocation1 + $0x1] ss:$16 sm:%s4370_s2]   ;;  %s4392_s3 = smov 48  ;;  %s4397_s22 = smov 192 }
 0x17e   :  { %v3940_v25 = vld [vmem:[#allocation1 + $0x18b] ss:$16 sm:%s3939_s27]   ;;  %5586 = vrot.lane.b32.xlu1 %v5585_v58, %s5640_s14  ;;  %v3937_v0 = vsel %vm2170_vm1, %v3935_v13, %v3932_v62  ;;  %v4376_v38 = vld [vmem:[#allocation1 + $0x1] ss:$16 sm:%s4375_s29]   ;;  %v4373_v41 = vsel %vm2170_vm1, %v4371_v36, %v4368_v19  ;;  %s4407_s0 = smov 3  ;;  %s4415_s20 = smov 48 }
 0x17f   :  { %v3942_v2 = vsel %vm2175_vm2, %v3940_v25, %v3937_v0  ;;  %v4385_v26 = vld [vmem:[#allocation1 + $0x101] ss:$16 sm:%s4384_s1]   ;;  %v4378_v46 = vsel %vm2175_vm2, %v4376_v38, %v4373_v41  ;;  %s4420_s4 = smov 192  ;;  %s4430_s12 = smov 3  ;;  %v7080_v38 = vpop.permute.xlu0 %5401 }
 0x180   :  { %v5545_v3 = vpack.i.bf16 %v3942_v2, %v3919_v24  ;;  %v4388_v44 = vld [vmem:[#allocation1 + $0x101] ss:$16 sm:%s4387_s21]   ;;  %s4433_s10 = smov 12  ;;  %s4438_s28 = smov 48 }
 0x181   :  { %v4393_v45 = vld [vmem:[#allocation1 + $0x101] ss:$16 sm:%s4392_s3]   ;;  %v4390_v30 = vsel %vm2165_vm0, %v4388_v44, %v4385_v26  ;;  %s4443_s25 = smov 192  ;;  %s4040_s19 = smov 3 }
 0x182   :  { %5546 = vrot.lane.b32.xlu2 %v5545_v3, %s5639_s24  ;;  %v4398_v18 = vld [vmem:[#allocation1 + $0x101] ss:$16 sm:%s4397_s22]   ;;  %s4410_s24 = smov 12  ;;  %v4395_v31 = vsel %vm2170_vm1, %v4393_v45, %v4390_v30  ;;  %v4041_v27 = vld [vmem:[#allocation1 + $0x202] ss:$16 sm:%s4040_s19]   ;;  %s4043_s17 = smov 12 }
 0x183   :  { %v4408_v48 = vld [vmem:[#allocation1 + $0x201] ss:$16 sm:%s4407_s0]   ;;  %v4400_v53 = vsel %vm2175_vm2, %v4398_v18, %v4395_v31  ;;  %s4048_s18 = smov 48  ;;  %s5641_s16 = smov 16   ;;  %v4044_v29 = vld [vmem:[#allocation1 + $0x202] ss:$16 sm:%s4043_s17]  }
 0x184   :  { %v4411_v50 = vld [vmem:[#allocation1 + $0x201] ss:$16 sm:%s4410_s24]   ;;  %v5595_v22 = vpack.i.bf16 %v4400_v53, %v4378_v46  ;;  %v4049_v6 = vld [vmem:[#allocation1 + $0x202] ss:$16 sm:%s4048_s18]   ;;  %s4053_s8 = smov 192  ;;  %s4063_s5 = smov 3  ;;  %v4046_v7 = vsel %vm2165_vm0, %v4044_v29, %v4041_v27  ;;  %v5358_v53 = vunpack.i.l.bf16 %v6962_v59  ;;  %v5359_v59 = vunpack.i.h.bf16 %v6962_v59  ;;  %v7106_v27 = vpop.permute.xlu2 %5411 }
 0x185   :  { %v4416_v51 = vld [vmem:[#allocation1 + $0x201] ss:$16 sm:%s4415_s20]   ;;  %v4413_v54 = vsel %vm2165_vm0, %v4411_v50, %v4408_v48  ;;  %v4054_v49 = vld [vmem:[#allocation1 + $0x202] ss:$16 sm:%s4053_s8]   ;;  %s4066_s30 = smov 12  ;;  %s4071_s13 = smov 48  ;;  %v4051_v34 = vsel %vm2170_vm1, %v4049_v6, %v4046_v7 }
 0x186   :  { %v4421_v33 = vld [vmem:[#allocation1 + $0x201] ss:$16 sm:%s4420_s4]   ;;  %v4418_v56 = vsel %vm2170_vm1, %v4416_v51, %v4413_v54  ;;  %5596 = vrot.lane.b32.xlu0 %v5595_v22, %s5641_s16  ;;  %v4064_v8 = vld [vmem:[#allocation1 + $0x302] ss:$16 sm:%s4063_s5]   ;;  %s4076_s26 = smov 192  ;;  %v4056_v12 = vsel %vm2175_vm2, %v4054_v49, %v4051_v34  ;;  %s4499_s11 = smov 3 }
 0x187   :  { %v4431_v37 = vld [vmem:[#allocation1 + $0x301] ss:$16 sm:%s4430_s12]   ;;  %v4423_v1 = vsel %vm2175_vm2, %v4421_v33, %v4418_v56  ;;  %v4067_v42 = vld [vmem:[#allocation1 + $0x302] ss:$16 sm:%s4066_s30]   ;;  %s4502_s7 = smov 12  ;;  %s4507_s9 = smov 48  ;;  %v5399_v56 = vunpack.i.h.bf16 %v7048_v20  ;;  %v5398_v20 = vunpack.i.l.bf16 %v7048_v20 }
 0x188   :  { %v4434_v61 = vld [vmem:[#allocation1 + $0x301] ss:$16 sm:%s4433_s10]   ;;  %v4072_v47 = vld [vmem:[#allocation1 + $0x302] ss:$16 sm:%s4071_s13]   ;;  %v4069_v52 = vsel %vm2165_vm0, %v4067_v42, %v4064_v8  ;;  %v4500_v2 = vld [vmem:[#allocation1 + $0x209] ss:$16 sm:%s4499_s11]  }
 0x189   :  { %v4439_v63 = vld [vmem:[#allocation1 + $0x301] ss:$16 sm:%s4438_s28]   ;;  %v4436_v4 = vsel %vm2165_vm0, %v4434_v61, %v4431_v37  ;;  %v4077_v55 = vld [vmem:[#allocation1 + $0x302] ss:$16 sm:%s4076_s26]   ;;  %v4074_v21 = vsel %vm2170_vm1, %v4072_v47, %v4069_v52  ;;  %v4503_v36 = vld [vmem:[#allocation1 + $0x209] ss:$16 sm:%s4502_s7]  }
 0x18a   :  { %v4444_v39 = vld [vmem:[#allocation1 + $0x301] ss:$16 sm:%s4443_s25]   ;;  %v4441_v5 = vsel %vm2170_vm1, %v4439_v63, %v4436_v4  ;;  %v1922_v14 = vld [vmem:[#allocation1] ss:$8 sm:$0xf]   ;;  %v4079_v23 = vsel %vm2175_vm2, %v4077_v55, %v4074_v21  ;;  %s4512_s15 = smov 192  ;;  %v4505_v3 = vsel %vm2165_vm0, %v4503_v36, %v4500_v2 }
 0x18b   :  { %v4446_v32 = vsel %vm2175_vm2, %v4444_v39, %v4441_v5  ;;  %v1923_v58 = vld [vmem:[#allocation1] ss:$8 sm:$0xf0]   ;;  %v5560_v62 = vpack.i.bf16 %v4079_v23, %v4056_v12  ;;  %v4508_v41 = vld [vmem:[#allocation1 + $0x209] ss:$16 sm:%s4507_s9]   ;;  %s4522_s27 = smov 3  ;;  %v5407_v39 = vpop.permute.xlu1 %5406  ;;  %v5368_v5 = vunpack.i.l.bf16 %v6960_v57  ;;  %v5369_v57 = vunpack.i.h.bf16 %v6960_v57 }
 0x18c   :  { %v5600_v10 = vpack.i.bf16 %v4446_v32, %v4423_v1  ;;  %v1935_v11 = vld [vmem:[#allocation1 + $0x40] ss:$8 sm:$0xf]   ;;  %v1925_v60 = vsel %vm1924_vm3, %v1923_v58, %v1922_v14  ;;  %v4510_v26 = vsel %vm2170_vm1, %v4508_v41, %v4505_v3  ;;  %v4513_v44 = vld [vmem:[#allocation1 + $0x209] ss:$16 sm:%s4512_s15]   ;;  %s4525_s6 = smov 12  ;;  %v5409_v42 = vunpack.i.h.bf16 %v5407_v39 }
 0x18d   :  { %v1937_v24 = vld [vmem:[#allocation1 + $0x40] ss:$8 sm:$0xf0]   ;;  %1927 = vst.msk [vmem:[#allocation0] ss:$8 sm:$0x3] %vm1926_vm4, %v1925_v60   ;;  %5561 = vrot.lane.b32.xlu2 %v5560_v62, %s5640_s14  ;;  %v4515_v18 = vsel %vm2175_vm2, %v4513_v44, %v4510_v26  ;;  %v5408_v52 = vunpack.i.l.bf16 %v5407_v39 }
 0x18e   :  { %5601 = vrot.lane.b32.xlu1 %v5600_v10, %s5641_s16  ;;  %1929 = vst.msk [vmem:[#allocation0 - $0xf] ss:$8 sm:$0xc] %vm1926_vm4, %v1925_v60   ;;  %v1939_v13 = vsel %vm1924_vm3, %v1937_v24, %v1935_v11  ;;  %v1980_v25 = vld [vmem:[#allocation1 + $0x100] ss:$8 sm:$0xf]  }
 0x18f   :  { %1931 = vst.msk [vmem:[#allocation0 - $0x1e] ss:$8 sm:$0x30] %vm1926_vm4, %v1925_v60   ;;  %v1982_v0 = vld [vmem:[#allocation1 + $0x100] ss:$8 sm:$0xf0]  }
 0x190   :  { %1933 = vst.msk [vmem:[#allocation0 - $0x2d] ss:$8 sm:$0xc0] %vm1926_vm4, %v1925_v60   ;;  %v1995_v28 = vld [vmem:[#allocation1 + $0x140] ss:$8 sm:$0xf]   ;;  %v1984_v19 = vsel %vm1924_vm3, %v1982_v0, %v1980_v25 }
 0x191   :  { %1942 = vst.msk [vmem:[#allocation0 + $0x4] ss:$8 sm:$0x3] %vm1926_vm4, %v1939_v13   ;;  %v1997_v15 = vld [vmem:[#allocation1 + $0x140] ss:$8 sm:$0xf0]  }
 0x192   :  { %1944 = vst.msk [vmem:[#allocation0 - $0xb] ss:$8 sm:$0xc] %vm1926_vm4, %v1939_v13   ;;  %v4523_v45 = vld [vmem:[#allocation1 + $0x309] ss:$16 sm:%s4522_s27]   ;;  %s4530_s23 = smov 48  ;;  %v1999_v46 = vsel %vm1924_vm3, %v1997_v15, %v1995_v28 }
 0x193   :  { %1946 = vst.msk [vmem:[#allocation0 - $0x1a] ss:$8 sm:$0x30] %vm1926_vm4, %v1939_v13   ;;  %v4526_v30 = vld [vmem:[#allocation1 + $0x309] ss:$16 sm:%s4525_s6]   ;;  %s4535_s2 = smov 192 }
 0x194   :  { %1948 = vst.msk [vmem:[#allocation0 - $0x29] ss:$8 sm:$0xc0] %vm1926_vm4, %v1939_v13   ;;  %v4528_v48 = vsel %vm2165_vm0, %v4526_v30, %v4523_v45  ;;  %v4531_v31 = vld [vmem:[#allocation1 + $0x309] ss:$16 sm:%s4530_s23]   ;;  %s4545_s29 = smov 3 }
 0x195   :  { %1987 = vst.msk [vmem:[#allocation0 + $0x20] ss:$8 sm:$0x3] %vm1926_vm4, %v1984_v19   ;;  %v4533_v50 = vsel %vm2170_vm1, %v4531_v31, %v4528_v48  ;;  %v4536_v51 = vld [vmem:[#allocation1 + $0x309] ss:$16 sm:%s4535_s2]   ;;  %s4548_s1 = smov 12 }
 0x196   :  { %1989 = vst.msk [vmem:[#allocation0 + $0x11] ss:$8 sm:$0xc] %vm1926_vm4, %v1984_v19   ;;  %v4538_v54 = vsel %vm2175_vm2, %v4536_v51, %v4533_v50  ;;  %v4546_v33 = vld [vmem:[#allocation1 + $0x81] ss:$16 sm:%s4545_s29]   ;;  %s4553_s21 = smov 48 }
 0x197   :  { %1991 = vst.msk [vmem:[#allocation0 + $0x2] ss:$8 sm:$0x30] %vm1926_vm4, %v1984_v19   ;;  %v5610_v37 = vpack.i.bf16 %v4538_v54, %v4515_v18  ;;  %v4549_v22 = vld [vmem:[#allocation1 + $0x81] ss:$16 sm:%s4548_s1]   ;;  %s4558_s3 = smov 192 }
 0x198   :  { %1993 = vst.msk [vmem:[#allocation0 - $0xd] ss:$8 sm:$0xc0] %vm1926_vm4, %v1984_v19   ;;  %v4551_v61 = vsel %vm2165_vm0, %v4549_v22, %v4546_v33  ;;  %v4554_v63 = vld [vmem:[#allocation1 + $0x81] ss:$16 sm:%s4553_s21]   ;;  %s4568_s22 = smov 3 }
 0x199   :  { %2002 = vst.msk [vmem:[#allocation0 + $0x24] ss:$8 sm:$0x3] %vm1926_vm4, %v1999_v46   ;;  %5611 = vrot.lane.b32.xlu0 %v5610_v37, %s5641_s16  ;;  %v4556_v1 = vsel %vm2170_vm1, %v4554_v63, %v4551_v61  ;;  %v4559_v4 = vld [vmem:[#allocation1 + $0x81] ss:$16 sm:%s4558_s3]   ;;  %s4571_s0 = smov 12 }
 0x19a   :  { %2004 = vst.msk [vmem:[#allocation0 + $0x15] ss:$8 sm:$0xc] %vm1926_vm4, %v1999_v46   ;;  %v4569_v29 = vld [vmem:[#allocation1 + $0x181] ss:$16 sm:%s4568_s22]   ;;  %s4576_s24 = smov 48  ;;  %v4561_v32 = vsel %vm2175_vm2, %v4559_v4, %v4556_v1  ;;  %v7151_v1 = vpop.permute.xlu0 %5416  ;;  %v5363_v4 = vunpack.i.l.bf16 %v6987_v43  ;;  %v5364_v43 = vunpack.i.h.bf16 %v6987_v43 }
 0x19b   :  { %2006 = vst.msk [vmem:[#allocation0 + $0x6] ss:$8 sm:$0x30] %vm1926_vm4, %v1999_v46   ;;  %v4572_v6 = vld [vmem:[#allocation1 + $0x181] ss:$16 sm:%s4571_s0]   ;;  %s4581_s20 = smov 192 }
 0x19c   :  { %2008 = vst.msk [vmem:[#allocation0 - $0x9] ss:$8 sm:$0xc0] %vm1926_vm4, %v1999_v46   ;;  %v4574_v7 = vsel %vm2165_vm0, %v4572_v6, %v4569_v29  ;;  %v4577_v49 = vld [vmem:[#allocation1 + $0x181] ss:$16 sm:%s4576_s24]   ;;  %s4178_s4 = smov 3 }
 0x19d   :  { %2180 = vst.msk [vmem:[#allocation0] sm:$0xff] %vm2179_vm5, %v5358_v53   ;;  %v4579_v8 = vsel %vm2170_vm1, %v4577_v49, %v4574_v7  ;;  %v4582_v10 = vld [vmem:[#allocation1 + $0x181] ss:$16 sm:%s4581_s20]   ;;  %v4179_v34 = vld [vmem:[#allocation1 + $0x82] ss:$16 sm:%s4178_s4]   ;;  %s4181_s12 = smov 12 }
 0x19e   :  { %2203 = vst.msk [vmem:[#allocation0 + $0x20] sm:$0xff] %vm2179_vm5, %v5359_v59   ;;  %v4584_v47 = vsel %vm2175_vm2, %v4582_v10, %v4579_v8  ;;  %v4182_v12 = vld [vmem:[#allocation1 + $0x82] ss:$16 sm:%s4181_s12]   ;;  %s4186_s10 = smov 48  ;;  %s4191_s28 = smov 192  ;;  %v5373_v10 = vunpack.i.l.bf16 %v6985_v9  ;;  %v5374_v9 = vunpack.i.h.bf16 %v6985_v9 }
 0x19f   :  { %2570 = vst.msk [vmem:[#allocation0 + $0x20] sm:$0xff] %vm2546_vm6, %v5399_v56   ;;  %v5615_v55 = vpack.i.bf16 %v4584_v47, %v4561_v32  ;;  %v4184_v14 = vsel %vm2165_vm0, %v4182_v12, %v4179_v34  ;;  %v4187_v21 = vld [vmem:[#allocation1 + $0x82] ss:$16 sm:%s4186_s10]   ;;  %s4201_s25 = smov 3  ;;  %s4204_s19 = smov 12 }
 0x1a0   :  { %2547 = vst.msk [vmem:[#allocation0] sm:$0xff] %vm2546_vm6, %v5398_v20   ;;  %v4192_v58 = vld [vmem:[#allocation1 + $0x82] ss:$16 sm:%s4191_s28]   ;;  %v4189_v11 = vsel %vm2170_vm1, %v4187_v21, %v4184_v14  ;;  %s4209_s17 = smov 48  ;;  %s4214_s18 = smov 192 }
 0x1a1   :  { %2272 = vst.msk [vmem:[#allocation0 + $0x8] sm:$0xff] %vm2179_vm5, %v5368_v5   ;;  %v4202_v23 = vld [vmem:[#allocation1 + $0x182] ss:$16 sm:%s4201_s25]   ;;  %5616 = vrot.lane.b32.xlu1 %v5615_v55, %s5641_s16  ;;  %v4194_v62 = vsel %vm2175_vm2, %v4192_v58, %v4189_v11  ;;  %v2040_v0 = vld [vmem:[#allocation1 + $0x200] ss:$8 sm:$0xf]   ;;  %v5414_v55 = vunpack.i.h.bf16 %v7106_v27  ;;  %v5413_v27 = vunpack.i.l.bf16 %v7106_v27 }
 0x1a2   :  { %2295 = vst.msk [vmem:[#allocation0 + $0x28] sm:$0xff] %vm2179_vm5, %v5369_v57   ;;  %v4205_v60 = vld [vmem:[#allocation1 + $0x182] ss:$16 sm:%s4204_s19]   ;;  %v2042_v15 = vld [vmem:[#allocation1 + $0x200] ss:$8 sm:$0xf0]   ;;  %v5403_v57 = vunpack.i.l.bf16 %v7080_v38  ;;  %v5404_v38 = vunpack.i.h.bf16 %v7080_v38 }
 0x1a3   :  { %v4210_v24 = vld [vmem:[#allocation1 + $0x182] ss:$16 sm:%s4209_s17]   ;;  %2662 = vst.msk [vmem:[#allocation0 + $0x28] sm:$0xff] %vm2546_vm6, %v5409_v42   ;;  %v4207_v13 = vsel %vm2165_vm0, %v4205_v60, %v4202_v23  ;;  %v2055_v2 = vld [vmem:[#allocation1 + $0x240] ss:$8 sm:$0xf]   ;;  %v2044_v36 = vsel %vm1924_vm3, %v2042_v15, %v2040_v0 }
 0x1a4   :  { %v4215_v25 = vld [vmem:[#allocation1 + $0x182] ss:$16 sm:%s4214_s18]   ;;  %2639 = vst.msk [vmem:[#allocation0 + $0x8] sm:$0xff] %vm2546_vm6, %v5408_v52   ;;  %v4212_v28 = vsel %vm2170_vm1, %v4210_v24, %v4207_v13  ;;  %v2057_v3 = vld [vmem:[#allocation1 + $0x240] ss:$8 sm:$0xf0]  }
 0x1a5   :  { %v4217_v19 = vsel %vm2175_vm2, %v4215_v25, %v4212_v28  ;;  %2047 = vst.msk [vmem:[#allocation0 + $0x40] ss:$8 sm:$0x3] %vm1926_vm4, %v2044_v36   ;;  %v2059_v26 = vsel %vm1924_vm3, %v2057_v3, %v2055_v2  ;;  %v2100_v44 = vld [vmem:[#allocation1 + $0x300] ss:$8 sm:$0xf]  }
 0x1a6   :  { %v5575_v41 = vpack.i.bf16 %v4217_v19, %v4194_v62  ;;  %2049 = vst.msk [vmem:[#allocation0 + $0x31] ss:$8 sm:$0xc] %vm1926_vm4, %v2044_v36   ;;  %v2102_v45 = vld [vmem:[#allocation1 + $0x300] ss:$8 sm:$0xf0]  }
 0x1a7   :  { %2051 = vst.msk [vmem:[#allocation0 + $0x22] ss:$8 sm:$0x30] %vm1926_vm4, %v2044_v36   ;;  %s4637_s8 = smov 3  ;;  %s4640_s5 = smov 12  ;;  %v2104_v48 = vsel %vm1924_vm3, %v2102_v45, %v2100_v44 }
 0x1a8   :  { %5576 = vrot.lane.b32.xlu2 %v5575_v41, %s5640_s14  ;;  %2053 = vst.msk [vmem:[#allocation0 + $0x13] ss:$8 sm:$0xc0] %vm1926_vm4, %v2044_v36   ;;  %v2115_v46 = vld [vmem:[#allocation1 + $0x340] ss:$8 sm:$0xf]  }
 0x1a9   :  { %2062 = vst.msk [vmem:[#allocation0 + $0x44] ss:$8 sm:$0x3] %vm1926_vm4, %v2059_v26   ;;  %v2117_v30 = vld [vmem:[#allocation1 + $0x340] ss:$8 sm:$0xf0]  }
 0x1aa   :  { %v4638_v18 = vld [vmem:[#allocation1 + $0x89] ss:$16 sm:%s4637_s8]   ;;  %s4645_s30 = smov 48  ;;  %2064 = vst.msk [vmem:[#allocation0 + $0x35] ss:$8 sm:$0xc] %vm1926_vm4, %v2059_v26   ;;  %v2119_v59 = vsel %vm1924_vm3, %v2117_v30, %v2115_v46 }
 0x1ab   :  { %v4641_v31 = vld [vmem:[#allocation1 + $0x89] ss:$16 sm:%s4640_s5]   ;;  %s4650_s13 = smov 192  ;;  %2066 = vst.msk [vmem:[#allocation0 + $0x26] ss:$8 sm:$0x30] %vm1926_vm4, %v2059_v26  }
 0x1ac   :  { %v4643_v50 = vsel %vm2165_vm0, %v4641_v31, %v4638_v18  ;;  %v4646_v51 = vld [vmem:[#allocation1 + $0x89] ss:$16 sm:%s4645_s30]   ;;  %s4660_s26 = smov 3  ;;  %2068 = vst.msk [vmem:[#allocation0 + $0x17] ss:$8 sm:$0xc0] %vm1926_vm4, %v2059_v26  }
 0x1ad   :  { %v4648_v53 = vsel %vm2170_vm1, %v4646_v51, %v4643_v50  ;;  %v4651_v54 = vld [vmem:[#allocation1 + $0x89] ss:$16 sm:%s4650_s13]   ;;  %s4663_s11 = smov 12  ;;  %2107 = vst.msk [vmem:[#allocation0 + $0x60] ss:$8 sm:$0x3] %vm1926_vm4, %v2104_v48   ;;  %v7192_v50 = vpop.permute.xlu1 %5421 }
 0x1ae   :  { %v4661_v33 = vld [vmem:[#allocation1 + $0x189] ss:$16 sm:%s4660_s26]   ;;  %s4668_s7 = smov 48  ;;  %2109 = vst.msk [vmem:[#allocation0 + $0x51] ss:$8 sm:$0xc] %vm1926_vm4, %v2104_v48   ;;  %v4653_v22 = vsel %vm2175_vm2, %v4651_v54, %v4648_v53 }
 0x1af   :  { %v4664_v37 = vld [vmem:[#allocation1 + $0x189] ss:$16 sm:%s4663_s11]   ;;  %s4673_s9 = smov 192  ;;  %2111 = vst.msk [vmem:[#allocation0 + $0x42] ss:$8 sm:$0x30] %vm1926_vm4, %v2104_v48  }
 0x1b0   :  { %v4666_v56 = vsel %vm2165_vm0, %v4664_v37, %v4661_v33  ;;  %v4669_v61 = vld [vmem:[#allocation1 + $0x189] ss:$16 sm:%s4668_s7]   ;;  %s4683_s15 = smov 3  ;;  %2113 = vst.msk [vmem:[#allocation0 + $0x33] ss:$8 sm:$0xc0] %vm1926_vm4, %v2104_v48   ;;  %v7207_v37 = vpop.permute.xlu2 %5426 }
 0x1b1   :  { %v4671_v63 = vsel %vm2170_vm1, %v4669_v61, %v4666_v56  ;;  %v4674_v20 = vld [vmem:[#allocation1 + $0x189] ss:$16 sm:%s4673_s9]   ;;  %s4686_s27 = smov 12  ;;  %2122 = vst.msk [vmem:[#allocation0 + $0x64] ss:$8 sm:$0x3] %vm1926_vm4, %v2119_v59   ;;  %v7213_v61 = vpop.permute.xlu0 %5431 }
 0x1b2   :  { %v4676_v39 = vsel %vm2175_vm2, %v4674_v20, %v4671_v63  ;;  %v4684_v5 = vld [vmem:[#allocation1 + $0x289] ss:$16 sm:%s4683_s15]   ;;  %s4691_s6 = smov 48  ;;  %2124 = vst.msk [vmem:[#allocation0 + $0x55] ss:$8 sm:$0xc] %vm1926_vm4, %v2119_v59   ;;  %v5419_v63 = vunpack.i.h.bf16 %v7151_v1  ;;  %v5418_v1 = vunpack.i.l.bf16 %v7151_v1 }
 0x1b3   :  { %v5625_v29 = vpack.i.bf16 %v4676_v39, %v4653_v22  ;;  %v4687_v6 = vld [vmem:[#allocation1 + $0x289] ss:$16 sm:%s4686_s27]   ;;  %s4696_s23 = smov 192  ;;  %2126 = vst.msk [vmem:[#allocation0 + $0x46] ss:$8 sm:$0x30] %vm1926_vm4, %v2119_v59   ;;  %v5378_v22 = vunpack.i.l.bf16 %v6991_v16  ;;  %v5379_v16 = vunpack.i.h.bf16 %v6991_v16 }
 0x1b4   :  { %v4689_v32 = vsel %vm2165_vm0, %v4687_v6, %v4684_v5  ;;  %v4692_v7 = vld [vmem:[#allocation1 + $0x289] ss:$16 sm:%s4691_s6]   ;;  %s4706_s2 = smov 3  ;;  %2128 = vst.msk [vmem:[#allocation0 + $0x37] ss:$8 sm:$0xc0] %vm1926_vm4, %v2119_v59   ;;  %v5388_v6 = vunpack.i.l.bf16 %v7014_v17  ;;  %v5389_v17 = vunpack.i.h.bf16 %v7014_v17 }
 0x1b5   :  { %5626 = vrot.lane.b32.xlu0 %v5625_v29, %s5641_s16  ;;  %v4694_v49 = vsel %vm2170_vm1, %v4692_v7, %v4689_v32  ;;  %v4697_v8 = vld [vmem:[#allocation1 + $0x289] ss:$16 sm:%s4696_s23]   ;;  %s4709_s29 = smov 12  ;;  %2226 = vst.msk [vmem:[#allocation0 + $0x40] sm:$0xff] %vm2179_vm5, %v5363_v4   ;;  %s4714_s1 = smov 48  ;;  %v7220_v29 = vpop.permute.xlu1 %5436 }
 0x1b6   :  { %v4707_v34 = vld [vmem:[#allocation1 + $0x389] ss:$16 sm:%s4706_s2]   ;;  %2249 = vst.msk [vmem:[#allocation0 + $0x60] sm:$0xff] %vm2179_vm5, %v5364_v43   ;;  %v4699_v47 = vsel %vm2175_vm2, %v4697_v8, %v4694_v49  ;;  %s4719_s21 = smov 192  ;;  %s4316_s3 = smov 3 }
 0x1b7   :  { %v4710_v42 = vld [vmem:[#allocation1 + $0x389] ss:$16 sm:%s4709_s29]   ;;  %2593 = vst.msk [vmem:[#allocation0 + $0x40] sm:$0xff] %vm2546_vm6, %v5403_v57   ;;  %v4317_v58 = vld [vmem:[#allocation1 + $0x28a] ss:$16 sm:%s4316_s3]   ;;  %s4319_s22 = smov 12 }
 0x1b8   :  { %v4712_v12 = vsel %vm2165_vm0, %v4710_v42, %v4707_v34  ;;  %v4715_v52 = vld [vmem:[#allocation1 + $0x389] ss:$16 sm:%s4714_s1]   ;;  %2616 = vst.msk [vmem:[#allocation0 + $0x60] sm:$0xff] %vm2546_vm6, %v5404_v38   ;;  %v4320_v23 = vld [vmem:[#allocation1 + $0x28a] ss:$16 sm:%s4319_s22]   ;;  %s4324_s0 = smov 48 }
 0x1b9   :  { %v4717_v14 = vsel %vm2170_vm1, %v4715_v52, %v4712_v12  ;;  %v4720_v21 = vld [vmem:[#allocation1 + $0x389] ss:$16 sm:%s4719_s21]   ;;  %s4329_s24 = smov 192  ;;  %2318 = vst.msk [vmem:[#allocation0 + $0x48] sm:$0xff] %vm2179_vm5, %v5373_v10   ;;  %v4322_v24 = vsel %vm2165_vm0, %v4320_v23, %v4317_v58  ;;  %v4325_v62 = vld [vmem:[#allocation1 + $0x28a] ss:$16 sm:%s4324_s0]   ;;  %v7233_v12 = vpop.permute.xlu2 %5441 }
 0x1ba   :  { %v4722_v11 = vsel %vm2175_vm2, %v4720_v21, %v4717_v14  ;;  %v4330_v13 = vld [vmem:[#allocation1 + $0x28a] ss:$16 sm:%s4329_s24]   ;;  %s4339_s20 = smov 3  ;;  %2341 = vst.msk [vmem:[#allocation0 + $0x68] sm:$0xff] %vm2179_vm5, %v5374_v9   ;;  %v4327_v25 = vsel %vm2170_vm1, %v4325_v62, %v4322_v24  ;;  %s4342_s4 = smov 12  ;;  %v7238_v21 = vpop.permute.xlu0 %5446 }
 0x1bb   :  { %v5630_v60 = vpack.i.bf16 %v4722_v11, %v4699_v47  ;;  %v4340_v0 = vld [vmem:[#allocation1 + $0x38a] ss:$16 sm:%s4339_s20]   ;;  %s4347_s12 = smov 48  ;;  %2708 = vst.msk [vmem:[#allocation0 + $0x68] sm:$0xff] %vm2546_vm6, %v5414_v55   ;;  %s4352_s10 = smov 192  ;;  %v4332_v2 = vsel %vm2175_vm2, %v4330_v13, %v4327_v25 }
 0x1bc   :  { %v4343_v28 = vld [vmem:[#allocation1 + $0x38a] ss:$16 sm:%s4342_s4]   ;;  %2685 = vst.msk [vmem:[#allocation0 + $0x48] sm:$0xff] %vm2546_vm6, %v5413_v27   ;;  %v1950_v3 = vld [vmem:[#allocation1 + $0x80] ss:$8 sm:$0xf]  }
 0x1bd   :  { %5631 = vrot.lane.b32.xlu1 %v5630_v60, %s5641_s16  ;;  %v4348_v15 = vld [vmem:[#allocation1 + $0x38a] ss:$16 sm:%s4347_s12]   ;;  %v4345_v19 = vsel %vm2165_vm0, %v4343_v28, %v4340_v0  ;;  %v1952_v26 = vld [vmem:[#allocation1 + $0x80] ss:$8 sm:$0xf0]   ;;  %s4456_s28 = smov 12  ;;  %v7244_v23 = vpop.permute.xlu1 %5451 }
 0x1be   :  { %v4353_v36 = vld [vmem:[#allocation1 + $0x38a] ss:$16 sm:%s4352_s10]   ;;  %v4350_v41 = vsel %vm2170_vm1, %v4348_v15, %v4345_v19  ;;  %v1965_v44 = vld [vmem:[#allocation1 + $0xc0] ss:$8 sm:$0xf]   ;;  %v1954_v46 = vsel %vm1924_vm3, %v1952_v26, %v1950_v3  ;;  %s4461_s25 = smov 48 }
 0x1bf   :  { %v4355_v45 = vsel %vm2175_vm2, %v4353_v36, %v4350_v41  ;;  %v1967_v30 = vld [vmem:[#allocation1 + $0xc0] ss:$8 sm:$0xf0]   ;;  %1957 = vst.msk [vmem:[#allocation0 + $0x10] ss:$8 sm:$0x3] %vm1926_vm4, %v1954_v46  }
 0x1c0   :  { %v5590_v18 = vpack.i.bf16 %v4355_v45, %v4332_v2  ;;  %1959 = vst.msk [vmem:[#allocation0 + $0x1] ss:$8 sm:$0xc] %vm1926_vm4, %v1954_v46   ;;  %v1969_v48 = vsel %vm1924_vm3, %v1967_v30, %v1965_v44  ;;  %v2010_v31 = vld [vmem:[#allocation1 + $0x180] ss:$8 sm:$0xf]  }
 0x1c1   :  { %1961 = vst.msk [vmem:[#allocation0 - $0xe] ss:$8 sm:$0x30] %vm1926_vm4, %v1954_v46   ;;  %v2012_v51 = vld [vmem:[#allocation1 + $0x180] ss:$8 sm:$0xf0]   ;;  %v7251_v0 = vpop.permute.xlu2 %5456 }
 0x1c2   :  { %5591 = vrot.lane.b32.xlu2 %v5590_v18, %s5640_s14  ;;  %1963 = vst.msk [vmem:[#allocation0 - $0x1d] ss:$8 sm:$0xc0] %vm1926_vm4, %v1954_v46   ;;  %v2014_v53 = vsel %vm1924_vm3, %v2012_v51, %v2010_v31  ;;  %v2025_v54 = vld [vmem:[#allocation1 + $0x1c0] ss:$8 sm:$0xf]   ;;  %v7257_v3 = vpop.permute.xlu0 %5461  ;;  %v5383_v51 = vunpack.i.l.bf16 %v7032_v40  ;;  %v5384_v40 = vunpack.i.h.bf16 %v7032_v40 }
 0x1c3   :  { %1972 = vst.msk [vmem:[#allocation0 + $0x14] ss:$8 sm:$0x3] %vm1926_vm4, %v1969_v48   ;;  %v2027_v33 = vld [vmem:[#allocation1 + $0x1c0] ss:$8 sm:$0xf0]  }
 0x1c4   :  { %1974 = vst.msk [vmem:[#allocation0 + $0x5] ss:$8 sm:$0xc] %vm1926_vm4, %v1969_v48   ;;  %v2029_v59 = vsel %vm1924_vm3, %v2027_v33, %v2025_v54  ;;  %s4453_s14 = smov 3  ;;  %s4466_s19 = smov 192  ;;  %v5423_v33 = vunpack.i.l.bf16 %v7192_v50  ;;  %v5424_v50 = vunpack.i.h.bf16 %v7192_v50 }
 0x1c5   :  { %1976 = vst.msk [vmem:[#allocation0 - $0xa] ss:$8 sm:$0x30] %vm1926_vm4, %v1969_v48   ;;  %v4454_v56 = vld [vmem:[#allocation1 + $0x9] ss:$16 sm:%s4453_s14]   ;;  %s4476_s17 = smov 3  ;;  %v7264_v30 = vpop.permute.xlu1 %5466 }
 0x1c6   :  { %1978 = vst.msk [vmem:[#allocation0 - $0x19] ss:$8 sm:$0xc0] %vm1926_vm4, %v1969_v48   ;;  %v2070_v20 = vld [vmem:[#allocation1 + $0x280] ss:$8 sm:$0xf]  }
 0x1c7   :  { %2017 = vst.msk [vmem:[#allocation0 + $0x30] ss:$8 sm:$0x3] %vm1926_vm4, %v2014_v53   ;;  %v2072_v4 = vld [vmem:[#allocation1 + $0x280] ss:$8 sm:$0xf0]  }
 0x1c8   :  { %2019 = vst.msk [vmem:[#allocation0 + $0x21] ss:$8 sm:$0xc] %vm1926_vm4, %v2014_v53   ;;  %v4457_v39 = vld [vmem:[#allocation1 + $0x9] ss:$16 sm:%s4456_s28]   ;;  %s4479_s18 = smov 12  ;;  %v2074_v42 = vsel %vm1924_vm3, %v2072_v4, %v2070_v20  ;;  %v5438_v4 = vunpack.i.l.bf16 %v7220_v29 }
 0x1c9   :  { %2021 = vst.msk [vmem:[#allocation0 + $0x12] ss:$8 sm:$0x30] %vm1926_vm4, %v2014_v53   ;;  %v4459_v5 = vsel %vm2165_vm0, %v4457_v39, %v4454_v56  ;;  %v4462_v43 = vld [vmem:[#allocation1 + $0x9] ss:$16 sm:%s4461_s25]   ;;  %s4484_s8 = smov 48  ;;  %v7274_v54 = vpop.permute.xlu2 %5471  ;;  %v5429_v56 = vunpack.i.h.bf16 %v7207_v37  ;;  %v5428_v37 = vunpack.i.l.bf16 %v7207_v37  ;;  %v5439_v39 = vunpack.i.h.bf16 %v7220_v29 }
 0x1ca   :  { %2023 = vst.msk [vmem:[#allocation0 + $0x3] ss:$8 sm:$0xc0] %vm1926_vm4, %v2014_v53   ;;  %v4464_v57 = vsel %vm2170_vm1, %v4462_v43, %v4459_v5  ;;  %v4467_v32 = vld [vmem:[#allocation1 + $0x9] ss:$16 sm:%s4466_s19]   ;;  %s4489_s5 = smov 192  ;;  %v5444_v5 = vunpack.i.h.bf16 %v7233_v12  ;;  %v5443_v43 = vunpack.i.l.bf16 %v7233_v12  ;;  %v5473_v12 = vunpack.i.l.bf16 %v7274_v54 }
 0x1cb   :  { %2032 = vst.msk [vmem:[#allocation0 + $0x34] ss:$8 sm:$0x3] %vm1926_vm4, %v2029_v59   ;;  %v4477_v7 = vld [vmem:[#allocation1 + $0x109] ss:$16 sm:%s4476_s17]   ;;  %v4469_v8 = vsel %vm2175_vm2, %v4467_v32, %v4464_v57  ;;  %s4591_s30 = smov 3  ;;  %v5449_v57 = vunpack.i.h.bf16 %v7238_v21  ;;  %v5453_v32 = vunpack.i.l.bf16 %v7244_v23 }
 0x1cc   :  { %2034 = vst.msk [vmem:[#allocation0 + $0x25] ss:$8 sm:$0xc] %vm1926_vm4, %v2029_v59   ;;  %v4480_v38 = vld [vmem:[#allocation1 + $0x109] ss:$16 sm:%s4479_s18]   ;;  %s4594_s13 = smov 12 }
 0x1cd   :  { %2036 = vst.msk [vmem:[#allocation0 + $0x16] ss:$8 sm:$0x30] %vm1926_vm4, %v2029_v59   ;;  %v4485_v49 = vld [vmem:[#allocation1 + $0x109] ss:$16 sm:%s4484_s8]   ;;  %v4482_v10 = vsel %vm2165_vm0, %v4480_v38, %v4477_v7  ;;  %s4599_s26 = smov 48  ;;  %v5454_v7 = vunpack.i.h.bf16 %v7244_v23  ;;  %v5459_v38 = vunpack.i.h.bf16 %v7251_v0 }
 0x1ce   :  { %2038 = vst.msk [vmem:[#allocation0 + $0x7] ss:$8 sm:$0xc0] %vm1926_vm4, %v2029_v59   ;;  %v4490_v34 = vld [vmem:[#allocation1 + $0x109] ss:$16 sm:%s4489_s5]   ;;  %v4487_v47 = vsel %vm2170_vm1, %v4485_v49, %v4482_v10  ;;  %s4604_s11 = smov 192  ;;  %v7281_v59 = vpop.permute.xlu0 %5476  ;;  %v5458_v49 = vunpack.i.l.bf16 %v7251_v0  ;;  %v5463_v10 = vunpack.i.l.bf16 %v7257_v3 }
 0x1cf   :  { %2364 = vst.msk [vmem:[#allocation0 + $0x10] sm:$0xff] %vm2179_vm5, %v5378_v22   ;;  %v2085_v9 = vld [vmem:[#allocation1 + $0x2c0] ss:$8 sm:$0xf]   ;;  %v4492_v55 = vsel %vm2175_vm2, %v4490_v34, %v4487_v47  ;;  %v4592_v60 = vld [vmem:[#allocation1 + $0x281] ss:$16 sm:%s4591_s30]   ;;  %v5393_v22 = vunpack.i.l.bf16 %v7016_v35  ;;  %v5394_v35 = vunpack.i.h.bf16 %v7016_v35  ;;  %v5464_v34 = vunpack.i.h.bf16 %v7257_v3 }
 0x1d0   :  { %2387 = vst.msk [vmem:[#allocation0 + $0x30] sm:$0xff] %vm2179_vm5, %v5379_v16   ;;  %v2087_v52 = vld [vmem:[#allocation1 + $0x2c0] ss:$8 sm:$0xf0]   ;;  %v5605_v14 = vpack.i.bf16 %v4492_v55, %v4469_v8  ;;  %v4595_v13 = vld [vmem:[#allocation1 + $0x281] ss:$16 sm:%s4594_s13]   ;;  %v7287_v16 = vpop.permute.xlu1 %5481  ;;  %v5469_v47 = vunpack.i.h.bf16 %v7264_v30 }
 0x1d1   :  { %2754 = vst.msk [vmem:[#allocation0 + $0x30] sm:$0xff] %vm2546_vm6, %v5419_v63   ;;  %v2130_v58 = vld [vmem:[#allocation1 + $0x380] ss:$8 sm:$0xf]   ;;  %v2089_v11 = vsel %vm1924_vm3, %v2087_v52, %v2085_v9  ;;  %s4614_s7 = smov 3  ;;  %v4597_v28 = vsel %vm2165_vm0, %v4595_v13, %v4592_v60  ;;  %s4617_s9 = smov 12  ;;  %v5433_v63 = vunpack.i.l.bf16 %v7213_v61  ;;  %v5434_v61 = vunpack.i.h.bf16 %v7213_v61  ;;  %v7297_v20 = vpop.permute.xlu2 %5486 }
 0x1d2   :  { %2731 = vst.msk [vmem:[#allocation0 + $0x10] sm:$0xff] %vm2546_vm6, %v5418_v1   ;;  %v2132_v27 = vld [vmem:[#allocation1 + $0x380] ss:$8 sm:$0xf0]   ;;  %5606 = vrot.lane.b32.xlu2 %v5605_v14, %s5641_s16  ;;  %v4600_v15 = vld [vmem:[#allocation1 + $0x281] ss:$16 sm:%s4599_s26]   ;;  %v5468_v9 = vunpack.i.l.bf16 %v7264_v30  ;;  %v5474_v52 = vunpack.i.h.bf16 %v7274_v54  ;;  %v5478_v14 = vunpack.i.l.bf16 %v7281_v59  ;;  %v5489_v60 = vunpack.i.h.bf16 %v7297_v20 }
 0x1d3   :  { %2456 = vst.msk [vmem:[#allocation0 + $0x18] sm:$0xff] %vm2179_vm5, %v5388_v6   ;;  %v2145_v24 = vld [vmem:[#allocation1 + $0x3c0] ss:$8 sm:$0xf]   ;;  %v2134_v25 = vsel %vm1924_vm3, %v2132_v27, %v2130_v58  ;;  %v4602_v2 = vsel %vm2170_vm1, %v4600_v15, %v4597_v28  ;;  %v4605_v19 = vld [vmem:[#allocation1 + $0x281] ss:$16 sm:%s4604_s11]   ;;  %v5448_v6 = vunpack.i.l.bf16 %v7238_v21  ;;  %v5479_v21 = vunpack.i.h.bf16 %v7281_v59 }
 0x1d4   :  { %2479 = vst.msk [vmem:[#allocation0 + $0x38] sm:$0xff] %vm2179_vm5, %v5389_v17   ;;  %v2147_v62 = vld [vmem:[#allocation1 + $0x3c0] ss:$8 sm:$0xf0]   ;;  %s4622_s15 = smov 48  ;;  %s4627_s27 = smov 192  ;;  %v4607_v44 = vsel %vm2175_vm2, %v4605_v19, %v4602_v2  ;;  %v5483_v27 = vunpack.i.l.bf16 %v7287_v16 }
 0x1d5   :  { %2077 = vst.msk [vmem:[#allocation0 + $0x50] ss:$8 sm:$0x3] %vm1926_vm4, %v2074_v42   ;;  %v4615_v36 = vld [vmem:[#allocation1 + $0x381] ss:$16 sm:%s4614_s7]   ;;  %v2149_v26 = vsel %vm1924_vm3, %v2147_v62, %v2145_v24  ;;  %v5488_v24 = vunpack.i.l.bf16 %v7297_v20  ;;  %s7694_s23 = sld [smem:[#allocation91_spill]] }
 0x1d6   :  { %2079 = vst.msk [vmem:[#allocation0 + $0x41] ss:$8 sm:$0xc] %vm1926_vm4, %v2074_v42   ;;  %v4618_v41 = vld [vmem:[#allocation1 + $0x381] ss:$16 sm:%s4617_s9]   ;;  %v5492_v1 = vpop.permute.xlu0 %5491 }
 0x1d7   :  { %2081 = vst.msk [vmem:[#allocation0 + $0x32] ss:$8 sm:$0x30] %vm1926_vm4, %v2074_v42   ;;  %v4620_v45 = vsel %vm2165_vm0, %v4618_v41, %v4615_v36  ;;  %v4623_v46 = vld [vmem:[#allocation1 + $0x381] ss:$16 sm:%s4622_s15]   ;;  %v5493_v62 = vunpack.i.l.bf16 %v5492_v1  ;;  %v5494_v13 = vunpack.i.h.bf16 %v5492_v1 }
 0x1d8   :  { %2083 = vst.msk [vmem:[#allocation0 + $0x23] ss:$8 sm:$0xc0] %vm1926_vm4, %v2074_v42   ;;  %v4625_v18 = vsel %vm2170_vm1, %v4623_v46, %v4620_v45  ;;  %v4628_v48 = vld [vmem:[#allocation1 + $0x381] ss:$16 sm:%s4627_s27]   ;;  %v5497_v29 = vpop.permute.xlu1 %5496 }
 0x1d9   :  { %2092 = vst.msk [vmem:[#allocation0 + $0x54] ss:$8 sm:$0x3] %vm1926_vm4, %v2089_v11   ;;  %v4630_v31 = vsel %vm2175_vm2, %v4628_v48, %v4625_v18  ;;  %v5502_v17 = vpop.permute.xlu2 %5501  ;;  %v5498_v0 = vunpack.i.l.bf16 %v5497_v29  ;;  %v5499_v28 = vunpack.i.h.bf16 %v5497_v29 }
 0x1da   :  { %2094 = vst.msk [vmem:[#allocation0 + $0x45] ss:$8 sm:$0xc] %vm1926_vm4, %v2089_v11   ;;  %v5620_v53 = vpack.i.bf16 %v4630_v31, %v4607_v44  ;;  %v5503_v2 = vunpack.i.l.bf16 %v5502_v17  ;;  %v5504_v19 = vunpack.i.h.bf16 %v5502_v17 }
 0x1db   :  { %2096 = vst.msk [vmem:[#allocation0 + $0x36] ss:$8 sm:$0x30] %vm1926_vm4, %v2089_v11  }
 0x1dc   :  { %2098 = vst.msk [vmem:[#allocation0 + $0x27] ss:$8 sm:$0xc0] %vm1926_vm4, %v2089_v11   ;;  %5621 = vrot.lane.b32.xlu2 %v5620_v53, %s5641_s16  ;;  %v5484_v11 = vunpack.i.h.bf16 %v7287_v16 }
 0x1dd   :  { %2137 = vst.msk [vmem:[#allocation0 + $0x70] ss:$8 sm:$0x3] %vm1926_vm4, %v2134_v25  }
 0x1de   :  { %2139 = vst.msk [vmem:[#allocation0 + $0x61] ss:$8 sm:$0xc] %vm1926_vm4, %v2134_v25   ;;  %v5507_v8 = vpop.permute.xlu0 %5506 }
 0x1df   :  { %2141 = vst.msk [vmem:[#allocation0 + $0x52] ss:$8 sm:$0x30] %vm1926_vm4, %v2134_v25   ;;  %v5508_v3 = vunpack.i.l.bf16 %v5507_v8  ;;  %v5509_v41 = vunpack.i.h.bf16 %v5507_v8 }
 0x1e0   :  { %2143 = vst.msk [vmem:[#allocation0 + $0x43] ss:$8 sm:$0xc0] %vm1926_vm4, %v2134_v25   ;;  %v5512_v42 = vpop.permute.xlu1 %5511 }
 0x1e1   :  { %2152 = vst.msk [vmem:[#allocation0 + $0x74] ss:$8 sm:$0x3] %vm1926_vm4, %v2149_v26   ;;  %v5517_v55 = vpop.permute.xlu2 %5516  ;;  %v5514_v44 = vunpack.i.h.bf16 %v5512_v42 }
 0x1e2   :  { %2154 = vst.msk [vmem:[#allocation0 + $0x65] ss:$8 sm:$0xc] %vm1926_vm4, %v2149_v26   ;;  %v5518_v46 = vunpack.i.l.bf16 %v5517_v55  ;;  %v5519_v30 = vunpack.i.h.bf16 %v5517_v55 }
 0x1e3   :  { %2156 = vst.msk [vmem:[#allocation0 + $0x56] ss:$8 sm:$0x30] %vm1926_vm4, %v2149_v26  }
 0x1e4   :  { %2158 = vst.msk [vmem:[#allocation0 + $0x47] ss:$8 sm:$0xc0] %vm1926_vm4, %v2149_v26   ;;  %v5513_v26 = vunpack.i.l.bf16 %v5512_v42 }
 0x1e5   :  { %2410 = vst.msk [vmem:[#allocation0 + $0x50] sm:$0xff] %vm2179_vm5, %v5383_v51  }
 0x1e6   :  { %2433 = vst.msk [vmem:[#allocation0 + $0x70] sm:$0xff] %vm2179_vm5, %v5384_v40   ;;  %v5522_v58 = vpop.permute.xlu0 %5521 }
 0x1e7   :  { %2777 = vst.msk [vmem:[#allocation0 + $0x50] sm:$0xff] %vm2546_vm6, %v5423_v33   ;;  %v5523_v48 = vunpack.i.l.bf16 %v5522_v58  ;;  %v5524_v31 = vunpack.i.h.bf16 %v5522_v58 }
 0x1e8   :  { %2800 = vst.msk [vmem:[#allocation0 + $0x70] sm:$0xff] %vm2546_vm6, %v5424_v50   ;;  %v5527_v23 = vpop.permute.xlu1 %5526 }
 0x1e9   :  { %2502 = vst.msk [vmem:[#allocation0 + $0x58] sm:$0xff] %vm2179_vm5, %v5393_v22   ;;  %v5532_v25 = vpop.permute.xlu2 %5531  ;;  %v5528_v53 = vunpack.i.l.bf16 %v5527_v23  ;;  %v5529_v40 = vunpack.i.h.bf16 %v5527_v23 }
 0x1ea   :  { %2525 = vst.msk [vmem:[#allocation0 + $0x78] sm:$0xff] %vm2179_vm5, %v5394_v35   ;;  %v5533_v54 = vunpack.i.l.bf16 %v5532_v25  ;;  %v5534_v33 = vunpack.i.h.bf16 %v5532_v25 }
 0x1eb   :  { %2846 = vst.msk [vmem:[#allocation0 + $0x38] sm:$0xff] %vm2546_vm6, %v5429_v56  }
 0x1ec   :  { %2823 = vst.msk [vmem:[#allocation0 + $0x18] sm:$0xff] %vm2546_vm6, %v5428_v37  }
 0x1ed   :  { %2869 = vst.msk [vmem:[#allocation0 + $0x58] sm:$0xff] %vm2546_vm6, %v5433_v63  }
 0x1ee   :  { %2892 = vst.msk [vmem:[#allocation0 + $0x78] sm:$0xff] %vm2546_vm6, %v5434_v61   ;;  %v5537_v15 = vpop.permute.xlu0 %5536 }
 0x1ef   :  { %2914 = vst.msk [vmem:[#allocation0] sm:$0xff] %vm2913_vm7, %v5438_v4   ;;  %v5538_v59 = vunpack.i.l.bf16 %v5537_v15  ;;  %v5539_v22 = vunpack.i.h.bf16 %v5537_v15 }
 0x1f0   :  { %2937 = vst.msk [vmem:[#allocation0 + $0x20] sm:$0xff] %vm2913_vm7, %v5439_v39   ;;  %v5542_v36 = vpop.permute.xlu1 %5541 }
 0x1f1   :  { %2983 = vst.msk [vmem:[#allocation0 + $0x60] sm:$0xff] %vm2913_vm7, %v5444_v5   ;;  %v5547_v45 = vpop.permute.xlu2 %5546  ;;  %v5543_v16 = vunpack.i.l.bf16 %v5542_v36  ;;  %v5544_v56 = vunpack.i.h.bf16 %v5542_v36 }
 0x1f2   :  { %2960 = vst.msk [vmem:[#allocation0 + $0x40] sm:$0xff] %vm2913_vm7, %v5443_v43   ;;  %v5548_v63 = vunpack.i.l.bf16 %v5547_v45  ;;  %v5549_v61 = vunpack.i.h.bf16 %v5547_v45 }
 0x1f3   :  { %3006 = vst.msk [vmem:[#allocation0 + $0x8] sm:$0xff] %vm2913_vm7, %v5448_v6  }
 0x1f4   :  { %3029 = vst.msk [vmem:[#allocation0 + $0x28] sm:$0xff] %vm2913_vm7, %v5449_v57  }
 0x1f5   :  { %3052 = vst.msk [vmem:[#allocation0 + $0x48] sm:$0xff] %vm2913_vm7, %v5453_v32  }
 0x1f6   :  { %3075 = vst.msk [vmem:[#allocation0 + $0x68] sm:$0xff] %vm2913_vm7, %v5454_v7   ;;  %v5552_v18 = vpop.permute.xlu0 %5551 }
 0x1f7   :  { %3121 = vst.msk [vmem:[#allocation0 + $0x30] sm:$0xff] %vm2913_vm7, %v5459_v38   ;;  %v5553_v20 = vunpack.i.l.bf16 %v5552_v18  ;;  %v5554_v4 = vunpack.i.h.bf16 %v5552_v18 }
 0x1f8   :  { %3098 = vst.msk [vmem:[#allocation0 + $0x10] sm:$0xff] %vm2913_vm7, %v5458_v49   ;;  %v5557_v51 = vpop.permute.xlu1 %5556 }
 0x1f9   :  { %3144 = vst.msk [vmem:[#allocation0 + $0x50] sm:$0xff] %vm2913_vm7, %v5463_v10   ;;  %v5562_v50 = vpop.permute.xlu2 %5561  ;;  %v5558_v1 = vunpack.i.l.bf16 %v5557_v51  ;;  %v5559_v5 = vunpack.i.h.bf16 %v5557_v51 }
 0x1fa   :  { %3167 = vst.msk [vmem:[#allocation0 + $0x70] sm:$0xff] %vm2913_vm7, %v5464_v34   ;;  %v5563_v29 = vunpack.i.l.bf16 %v5562_v50  ;;  %v5564_v6 = vunpack.i.h.bf16 %v5562_v50 }
 0x1fb   :  { %3190 = vst.msk [vmem:[#allocation0 + $0x18] sm:$0xff] %vm2913_vm7, %v5468_v9  }
 0x1fc   :  { %3213 = vst.msk [vmem:[#allocation0 + $0x38] sm:$0xff] %vm2913_vm7, %v5469_v47  }
 0x1fd   :  { %3236 = vst.msk [vmem:[#allocation0 + $0x58] sm:$0xff] %vm2913_vm7, %v5473_v12  }
 0x1fe   :  { %3259 = vst.msk [vmem:[#allocation0 + $0x78] sm:$0xff] %vm2913_vm7, %v5474_v52   ;;  %v5567_v35 = vpop.permute.xlu0 %5566 }
 0x1ff   :  { %3281 = vst.msk [vmem:[#allocation0] sm:$0xff] %vm3280_vm8, %v5478_v14   ;;  %v5568_v32 = vunpack.i.l.bf16 %v5567_v35  ;;  %v5569_v7 = vunpack.i.h.bf16 %v5567_v35 }
 0x200   :  { %3304 = vst.msk [vmem:[#allocation0 + $0x20] sm:$0xff] %vm3280_vm8, %v5479_v21   ;;  %v5572_v37 = vpop.permute.xlu1 %5571 }
 0x201   :  { %3327 = vst.msk [vmem:[#allocation0 + $0x40] sm:$0xff] %vm3280_vm8, %v5483_v27   ;;  %v5573_v17 = vunpack.i.l.bf16 %v5572_v37  ;;  %v5574_v38 = vunpack.i.h.bf16 %v5572_v37 }
 0x202   :  { %3350 = vst.msk [vmem:[#allocation0 + $0x60] sm:$0xff] %vm3280_vm8, %v5484_v11   ;;  %v5577_v39 = vpop.permute.xlu2 %5576 }
 0x203   :  { %3396 = vst.msk [vmem:[#allocation0 + $0x28] sm:$0xff] %vm3280_vm8, %v5489_v60   ;;  %v5578_v8 = vunpack.i.l.bf16 %v5577_v39  ;;  %v5579_v10 = vunpack.i.h.bf16 %v5577_v39 }
 0x204   :  { %3373 = vst.msk [vmem:[#allocation0 + $0x8] sm:$0xff] %vm3280_vm8, %v5488_v24  }
 0x205   :  { %3419 = vst.msk [vmem:[#allocation0 + $0x48] sm:$0xff] %vm3280_vm8, %v5493_v62  }
 0x206   :  { %3442 = vst.msk [vmem:[#allocation0 + $0x68] sm:$0xff] %vm3280_vm8, %v5494_v13   ;;  %v5582_v43 = vpop.permute.xlu0 %5581 }
 0x207   :  { %3465 = vst.msk [vmem:[#allocation0 + $0x10] sm:$0xff] %vm3280_vm8, %v5498_v0   ;;  %v5583_v42 = vunpack.i.l.bf16 %v5582_v43  ;;  %v5584_v9 = vunpack.i.h.bf16 %v5582_v43 }
 0x208   :  { %3488 = vst.msk [vmem:[#allocation0 + $0x30] sm:$0xff] %vm3280_vm8, %v5499_v28   ;;  %v5587_v57 = vpop.permute.xlu1 %5586 }
 0x209   :  { %3511 = vst.msk [vmem:[#allocation0 + $0x50] sm:$0xff] %vm3280_vm8, %v5503_v2   ;;  %v5588_v12 = vunpack.i.l.bf16 %v5587_v57  ;;  %v5589_v52 = vunpack.i.h.bf16 %v5587_v57 }
 0x20a   :  { %3534 = vst.msk [vmem:[#allocation0 + $0x70] sm:$0xff] %vm3280_vm8, %v5504_v19  }
 0x20b   :  { %3557 = vst.msk [vmem:[#allocation0 + $0x18] sm:$0xff] %vm3280_vm8, %v5508_v3  }
 0x20c   :  { %3580 = vst.msk [vmem:[#allocation0 + $0x38] sm:$0xff] %vm3280_vm8, %v5509_v41  }
 0x20d   :  { %3603 = vst.msk [vmem:[#allocation0 + $0x58] sm:$0xff] %vm3280_vm8, %v5513_v26  }
 0x20e   :  { %3626 = vst.msk [vmem:[#allocation0 + $0x78] sm:$0xff] %vm3280_vm8, %v5514_v44   ;;  %v5597_v34 = vpop.permute.xlu0 %5596 }
 0x20f   :  { %3648 = vst.msk [vmem:[#allocation0] sm:$0xff] %vm3647_vm9, %v5518_v46   ;;  %v5598_v21 = vunpack.i.l.bf16 %v5597_v34  ;;  %v5599_v58 = vunpack.i.h.bf16 %v5597_v34 }
 0x210   :  { %3671 = vst.msk [vmem:[#allocation0 + $0x20] sm:$0xff] %vm3647_vm9, %v5519_v30   ;;  %v5602_v47 = vpop.permute.xlu1 %5601 }
 0x211   :  { %3694 = vst.msk [vmem:[#allocation0 + $0x40] sm:$0xff] %vm3647_vm9, %v5523_v48   ;;  %v5603_v11 = vunpack.i.l.bf16 %v5602_v47  ;;  %v5604_v23 = vunpack.i.h.bf16 %v5602_v47 }
 0x212   :  { %3717 = vst.msk [vmem:[#allocation0 + $0x60] sm:$0xff] %vm3647_vm9, %v5524_v31  }
 0x213   :  { %3740 = vst.msk [vmem:[#allocation0 + $0x8] sm:$0xff] %vm3647_vm9, %v5528_v53  }
 0x214   :  { %3763 = vst.msk [vmem:[#allocation0 + $0x28] sm:$0xff] %vm3647_vm9, %v5529_v40  }
 0x215   :  { %3786 = vst.msk [vmem:[#allocation0 + $0x48] sm:$0xff] %vm3647_vm9, %v5533_v54  }
 0x216   :  { %3809 = vst.msk [vmem:[#allocation0 + $0x68] sm:$0xff] %vm3647_vm9, %v5534_v33   ;;  %v5612_v27 = vpop.permute.xlu0 %5611 }
 0x217   :  { %3832 = vst.msk [vmem:[#allocation0 + $0x10] sm:$0xff] %vm3647_vm9, %v5538_v59   ;;  %v5613_v25 = vunpack.i.l.bf16 %v5612_v27  ;;  %v5614_v0 = vunpack.i.h.bf16 %v5612_v27 }
 0x218   :  { %3855 = vst.msk [vmem:[#allocation0 + $0x30] sm:$0xff] %vm3647_vm9, %v5539_v22   ;;  %v5617_v60 = vpop.permute.xlu1 %5616 }
 0x219   :  { %3878 = vst.msk [vmem:[#allocation0 + $0x50] sm:$0xff] %vm3647_vm9, %v5543_v16   ;;  %v5618_v28 = vunpack.i.l.bf16 %v5617_v60  ;;  %v5619_v15 = vunpack.i.h.bf16 %v5617_v60 }
 0x21a   :  { %3901 = vst.msk [vmem:[#allocation0 + $0x70] sm:$0xff] %vm3647_vm9, %v5544_v56  }
 0x21b   :  { %3924 = vst.msk [vmem:[#allocation0 + $0x18] sm:$0xff] %vm3647_vm9, %v5548_v63  }
 0x21c   :  { %3947 = vst.msk [vmem:[#allocation0 + $0x38] sm:$0xff] %vm3647_vm9, %v5549_v61   ;;  %v5592_v49 = vpop.permute.xlu2 %5591 }
 0x21d   :  { %3970 = vst.msk [vmem:[#allocation0 + $0x58] sm:$0xff] %vm3647_vm9, %v5553_v20   ;;  %v5593_v55 = vunpack.i.l.bf16 %v5592_v49  ;;  %v5594_v14 = vunpack.i.h.bf16 %v5592_v49 }
 0x21e   :  { %3993 = vst.msk [vmem:[#allocation0 + $0x78] sm:$0xff] %vm3647_vm9, %v5554_v4  }
 0x21f   :  { %4015 = vst.msk [vmem:[#allocation0] sm:$0xff] %vm4014_vm10, %v5558_v1  }
 0x220   :  { %4038 = vst.msk [vmem:[#allocation0 + $0x20] sm:$0xff] %vm4014_vm10, %v5559_v5  }
 0x221   :  { %4061 = vst.msk [vmem:[#allocation0 + $0x40] sm:$0xff] %vm4014_vm10, %v5563_v29  }
 0x222   :  { %4084 = vst.msk [vmem:[#allocation0 + $0x60] sm:$0xff] %vm4014_vm10, %v5564_v6  }
 0x223   :  { %4107 = vst.msk [vmem:[#allocation0 + $0x8] sm:$0xff] %vm4014_vm10, %v5568_v32  }
 0x224   :  { %4130 = vst.msk [vmem:[#allocation0 + $0x28] sm:$0xff] %vm4014_vm10, %v5569_v7  }
 0x225   :  { %4153 = vst.msk [vmem:[#allocation0 + $0x48] sm:$0xff] %vm4014_vm10, %v5573_v17  }
 0x226   :  { %4176 = vst.msk [vmem:[#allocation0 + $0x68] sm:$0xff] %vm4014_vm10, %v5574_v38  }
 0x227   :  { %4199 = vst.msk [vmem:[#allocation0 + $0x10] sm:$0xff] %vm4014_vm10, %v5578_v8   ;;  %v5627_v2 = vpop.permute.xlu0 %5626 }
 0x228   :  { %4222 = vst.msk [vmem:[#allocation0 + $0x30] sm:$0xff] %vm4014_vm10, %v5579_v10   ;;  %v5628_v19 = vunpack.i.l.bf16 %v5627_v2  ;;  %v5629_v36 = vunpack.i.h.bf16 %v5627_v2 }
 0x229   :  { %4245 = vst.msk [vmem:[#allocation0 + $0x50] sm:$0xff] %vm4014_vm10, %v5583_v42  }
 0x22a   :  { %4268 = vst.msk [vmem:[#allocation0 + $0x70] sm:$0xff] %vm4014_vm10, %v5584_v9  }
 0x22b   :  { %4291 = vst.msk [vmem:[#allocation0 + $0x18] sm:$0xff] %vm4014_vm10, %v5588_v12  }
 0x22c   :  { %4314 = vst.msk [vmem:[#allocation0 + $0x38] sm:$0xff] %vm4014_vm10, %v5589_v52   ;;  %v5607_v24 = vpop.permute.xlu2 %5606 }
 0x22d   :  { %4337 = vst.msk [vmem:[#allocation0 + $0x58] sm:$0xff] %vm4014_vm10, %v5593_v55   ;;  %v5609_v62 = vunpack.i.h.bf16 %v5607_v24  ;;  %v5608_v13 = vunpack.i.l.bf16 %v5607_v24 }
 0x22e   :  { %4360 = vst.msk [vmem:[#allocation0 + $0x78] sm:$0xff] %vm4014_vm10, %v5594_v14  }
 0x22f   :  { %4382 = vst.msk [vmem:[#allocation0] sm:$0xff] %vm4381_vm11, %v5598_v21   ;;  %v5632_v3 = vpop.permute.xlu1 %5631 }
 0x230   :  { %4405 = vst.msk [vmem:[#allocation0 + $0x20] sm:$0xff] %vm4381_vm11, %v5599_v58   ;;  %v5633_v41 = vunpack.i.l.bf16 %v5632_v3  ;;  %v5634_v44 = vunpack.i.h.bf16 %v5632_v3 }
 0x231   :  { %4428 = vst.msk [vmem:[#allocation0 + $0x40] sm:$0xff] %vm4381_vm11, %v5603_v11  }
 0x232   :  { %4451 = vst.msk [vmem:[#allocation0 + $0x60] sm:$0xff] %vm4381_vm11, %v5604_v23  }
 0x233   :  { %4474 = vst.msk [vmem:[#allocation0 + $0x8] sm:$0xff] %vm4381_vm11, %v5608_v13  }
 0x234   :  { %4497 = vst.msk [vmem:[#allocation0 + $0x28] sm:$0xff] %vm4381_vm11, %v5609_v62  }
 0x235   :  { %4520 = vst.msk [vmem:[#allocation0 + $0x48] sm:$0xff] %vm4381_vm11, %v5613_v25  }
 0x236   :  { %4543 = vst.msk [vmem:[#allocation0 + $0x68] sm:$0xff] %vm4381_vm11, %v5614_v0   ;;  %v4730_v26 = vld [vmem:[#allocation0] sm:$0xff]  ;;  %v5622_v33 = vpop.permute.xlu2 %5621 }
 0x237   :  { %4566 = vst.msk [vmem:[#allocation0 + $0x10] sm:$0xff] %vm4381_vm11, %v5618_v28   ;;  %v4757_v45 = vld [vmem:[#allocation0 + $0x20] sm:$0xff]  ;;  %v5624_v59 = vunpack.i.h.bf16 %v5622_v33  ;;  %v5623_v22 = vunpack.i.l.bf16 %v5622_v33 }
 0x238   :  { %4589 = vst.msk [vmem:[#allocation0 + $0x30] sm:$0xff] %vm4381_vm11, %v5619_v15   ;;  %v4785_v48 = vld [vmem:[#allocation0 + $0x40] sm:$0xff] }
 0x239   :  { %4658 = vst.msk [vmem:[#allocation0 + $0x18] sm:$0xff] %vm4381_vm11, %v5628_v19   ;;  %v4813_v53 = vld [vmem:[#allocation0 + $0x60] sm:$0xff] }
 0x23a   :  { %v4736_v46 = vld [vmem:[#allocation0 + $0x8] sm:$0xff]  ;;  %4681 = vst.msk [vmem:[#allocation0 + $0x38] sm:$0xff] %vm4381_vm11, %v5629_v36  }
 0x23b   :  { %v5241_v30 = vpack.c.bf16 %v4736_v46, %v4730_v26  ;;  %v4764_v18 = vld [vmem:[#allocation0 + $0x28] sm:$0xff]  ;;  %4704 = vst.msk [vmem:[#allocation0 + $0x58] sm:$0xff] %vm4381_vm11, %v5633_v41  }
 0x23c   :  { %v5251_v31 = vpack.c.bf16 %v4764_v18, %v4757_v45  ;;  %v4792_v51 = vld [vmem:[#allocation0 + $0x48] sm:$0xff]  ;;  %4727 = vst.msk [vmem:[#allocation0 + $0x78] sm:$0xff] %vm4381_vm11, %v5634_v44  }
 0x23d   :  { %5242 = vst [vmem:[%s7694_s23] sm:$0xff] %v5241_v30   ;;  %v4820_v40 = vld [vmem:[#allocation0 + $0x68] sm:$0xff]  ;;  %v5261_v54 = vpack.c.bf16 %v4792_v51, %v4785_v48 }
 0x23e   :  { %5342 = vst [vmem:[%s7694_s23 + $0x10] sm:$0xff] %v5251_v31   ;;  %v5271_v50 = vpack.c.bf16 %v4820_v40, %v4813_v53  ;;  %v4743_v35 = vld [vmem:[#allocation0 + $0x10] sm:$0xff] }
 0x23f   :  { %5344 = vst [vmem:[%s7694_s23 + $0x20] sm:$0xff] %v5261_v54   ;;  %v4771_v56 = vld [vmem:[#allocation0 + $0x30] sm:$0xff] }
 0x240   :  { %5346 = vst [vmem:[%s7694_s23 + $0x30] sm:$0xff] %v5271_v50   ;;  %v4750_v16 = vld [vmem:[#allocation0 + $0x18] sm:$0xff] }
 0x241   :  { %v5246_v37 = vpack.c.bf16 %v4750_v16, %v4743_v35  ;;  %v4778_v63 = vld [vmem:[#allocation0 + $0x38] sm:$0xff]  ;;  %4612 = vst.msk [vmem:[#allocation0 + $0x50] sm:$0xff] %vm4381_vm11, %v5623_v22  }
 0x242   :  { %v5256_v61 = vpack.c.bf16 %v4778_v63, %v4771_v56  ;;  %4635 = vst.msk [vmem:[#allocation0 + $0x70] sm:$0xff] %vm4381_vm11, %v5624_v59   ;;  %v4806_v20 = vld [vmem:[#allocation0 + $0x58] sm:$0xff] }
 0x243   :  { %5341 = vst [vmem:[%s7694_s23 + $0x8] sm:$0xff] %v5246_v37   ;;  %v4834_v4 = vld [vmem:[#allocation0 + $0x78] sm:$0xff] }
 0x244   :  { %5343 = vst [vmem:[%s7694_s23 + $0x18] sm:$0xff] %v5256_v61  }
 0x248   :  { %v4799_v39 = vld [vmem:[#allocation0 + $0x50] sm:$0xff] }
 0x249   :  { %v5266_v1 = vpack.c.bf16 %v4806_v20, %v4799_v39  ;;  %v4827_v5 = vld [vmem:[#allocation0 + $0x70] sm:$0xff] }
 0x24a   :  { %v5276_v43 = vpack.c.bf16 %v4834_v4, %v4827_v5 }
 0x24b   :  { %5345 = vst [vmem:[%s7694_s23 + $0x28] sm:$0xff] %v5266_v1  }
 0x24c   :  { %5347 = vst [vmem:[%s7694_s23 + $0x38] sm:$0xff] %v5276_v43  }

// kernel: deconv_block.1
= control target key start
LH: loop header
LB: loop body
LE: loop exit
PB: predicated region body
PF: predicated region fallthrough
CT: control target
= control target key end

     0   :  { %vm134_vm0 = vcmask 523264   ;;  %vm402_vm1 = vcmask 64512   ;;  %vm658_vm5 = vcmask 1040384   ;;  %s1705_s1 = inlined_call_operand.vmem [shape: bf16[64,512], index: 1, kind: input, shape index: {}]   ;;  %s1706_s0 = inlined_call_operand.vmem [shape: bf16[32,64], index: 0, kind: input, shape index: {}]   ;;  %s1707_s2 = inlined_call_operand.vmem [shape: f32[512,8], index: 2, kind: input, shape index: {}]   ;;  %s1708_s3 = inlined_call_operand.vmem [shape: f32[8,512], index: 3, kind: input, shape index: {}]   ;;  %s1709_s4 = inlined_call_operand.vmem [shape: f32[1,8], index: 4, kind: input, shape index: {}]   ;;  %s1710_s5 = inlined_call_operand.vmem [shape: f32[1,8], index: 5, kind: input, shape index: {}]   ;;  %s1711_s6 = inlined_call_operand.vmem [shape: f32[32,512], index: 6, kind: output, shape index: {}]  }
   0x1   :  { %v893_v0 = vld [vmem:[%s1705_s1 + $0x60] sm:$0xf]  ;;  %v939_v1 = vld [vmem:[%s1705_s1 + $0x6c] sm:$0xf0]  ;;  %v937_v2 = vld [vmem:[%s1705_s1 + $0x64] sm:$0xf] }
   0x2   :  { %v894_v3 = vor.u32 %v939_v1, %v893_v0  ;;  %v895_v4 = vld [vmem:[%s1705_s1 + $0x70] sm:$0xf0]  ;;  %v901_v5 = vld [vmem:[%s1705_s1 + $0x68] sm:$0xf]  ;;  %v940_v6 = vld [vmem:[%s1705_s1 + $0x74] sm:$0xf0] }
   0x3   :  { %v898_v7 = vor.u32 %v937_v2, %v895_v4  ;;  %v902_v8 = vor.u32 %v940_v6, %v901_v5  ;;  %v938_v9 = vld [vmem:[%s1705_s1 + $0x6c] sm:$0xf]  ;;  %v903_v10 = vld [vmem:[%s1705_s1 + $0x78] sm:$0xf0]  ;;  %v877_v11 = vld [vmem:[%s1705_s1 + $0x40] sm:$0xf] }
   0x4   :  { %145 = vmatpush.bf16.msra.mxu0 %v894_v3  ;;  %v906_v12 = vor.u32 %v938_v9, %v903_v10  ;;  %v935_v13 = vld [vmem:[%s1705_s1 + $0x4c] sm:$0xf0]  ;;  %v933_v14 = vld [vmem:[%s1705_s1 + $0x44] sm:$0xf]  ;;  %v879_v15 = vld [vmem:[%s1705_s1 + $0x50] sm:$0xf0] }
   0x5   :  { %164 = vmatpush.bf16.msra.mxu1 %v898_v7  ;;  %183 = vmatpush.bf16.msra.mxu2 %v902_v8  ;;  %v878_v16 = vor.u32 %v935_v13, %v877_v11  ;;  %v882_v17 = vor.u32 %v933_v14, %v879_v15  ;;  %v885_v18 = vld [vmem:[%s1705_s1 + $0x48] sm:$0xf]  ;;  %v936_v19 = vld [vmem:[%s1705_s1 + $0x54] sm:$0xf0]  ;;  %v934_v20 = vld [vmem:[%s1705_s1 + $0x4c] sm:$0xf] }
   0x6   :  { %202 = vmatpush.bf16.msra.mxu3 %v906_v12  ;;  %v886_v21 = vor.u32 %v936_v19, %v885_v18  ;;  %v887_v22 = vld [vmem:[%s1705_s1 + $0x58] sm:$0xf0]  ;;  %v861_v23 = vld [vmem:[%s1705_s1 + $0x20] sm:$0xf]  ;;  %v931_v24 = vld [vmem:[%s1705_s1 + $0x2c] sm:$0xf0] }
   0x7   :  { %v890_v25 = vor.u32 %v934_v20, %v887_v22  ;;  %v929_v26 = vld [vmem:[%s1705_s1 + $0x24] sm:$0xf]  ;;  %v863_v27 = vld [vmem:[%s1705_s1 + $0x30] sm:$0xf0]  ;;  %v869_v28 = vld [vmem:[%s1705_s1 + $0x28] sm:$0xf]  ;;  %v862_v29 = vor.u32 %v931_v24, %v861_v23 }
   0x8   :  { %146 = vmatpush.bf16.msra.mxu0 %v878_v16  ;;  %v932_v30 = vld [vmem:[%s1705_s1 + $0x34] sm:$0xf0]  ;;  %v930_v31 = vld [vmem:[%s1705_s1 + $0x2c] sm:$0xf]  ;;  %v871_v32 = vld [vmem:[%s1705_s1 + $0x38] sm:$0xf0]  ;;  %v866_v33 = vor.u32 %v929_v26, %v863_v27 }
   0x9   :  { %165 = vmatpush.bf16.msra.mxu1 %v882_v17  ;;  %184 = vmatpush.bf16.msra.mxu2 %v886_v21  ;;  %v870_v34 = vor.u32 %v932_v30, %v869_v28  ;;  %v845_v35 = vld [vmem:[%s1705_s1] sm:$0xf]  ;;  %v927_v36 = vld [vmem:[%s1705_s1 + $0xc] sm:$0xf0]  ;;  %v925_v37 = vld [vmem:[%s1705_s1 + $0x4] sm:$0xf]  ;;  %v874_v38 = vor.u32 %v930_v31, %v871_v32 }
   0xa   :  { %203 = vmatpush.bf16.msra.mxu3 %v890_v25  ;;  %v847_v39 = vld [vmem:[%s1705_s1 + $0x10] sm:$0xf0]  ;;  %v853_v40 = vld [vmem:[%s1705_s1 + $0x8] sm:$0xf]  ;;  %v928_v41 = vld [vmem:[%s1705_s1 + $0x14] sm:$0xf0]  ;;  %v846_v44 = vor.u32 %v927_v36, %v845_v35 }
   0xb   :  { %v926_v42 = vld [vmem:[%s1705_s1 + $0xc] sm:$0xf]  ;;  %v855_v43 = vld [vmem:[%s1705_s1 + $0x18] sm:$0xf0]  ;;  %v850_v45 = vor.u32 %v925_v37, %v847_v39  ;;  %v854_v46 = vor.u32 %v928_v41, %v853_v40  ;;  %v923_v48 = vld [vmem:[%s1706_s0] sm:$0xff] }
   0xc   :  { %147 = vmatpush.bf16.msra.mxu0 %v862_v29  ;;  %v858_v47 = vor.u32 %v926_v42, %v855_v43  ;;  %v924_v49 = vld [vmem:[%s1706_s0 + $0x8] sm:$0xff]  ;;  %v1083_v50 = vld [vmem:[%s1707_s2 + $0x78] sm:$0xff]  ;;  %v1095_v52 = vld [vmem:[%s1707_s2 + $0x70] sm:$0xff] }
   0xd   :  { %166 = vmatpush.bf16.msra.mxu1 %v866_v33  ;;  %185 = vmatpush.bf16.msra.mxu2 %v870_v34  ;;  %v1088_v51 = vld [vmem:[%s1707_s2 + $0xf8] sm:$0xff]  ;;  %v1100_v53 = vld [vmem:[%s1707_s2 + $0xf0] sm:$0xff]  ;;  %v1105_v54 = vld [vmem:[%s1707_s2 + $0x68] sm:$0xff] }
   0xe   :  { %204 = vmatpush.bf16.msra.mxu3 %v874_v38  ;;  %v1110_v55 = vld [vmem:[%s1707_s2 + $0xe8] sm:$0xff]  ;;  %v1115_v56 = vld [vmem:[%s1707_s2 + $0x178] sm:$0xff]  ;;  %v1125_v57 = vld [vmem:[%s1707_s2 + $0x60] sm:$0xff] }
   0xf   :  { %v1130_v58 = vld [vmem:[%s1707_s2 + $0xe0] sm:$0xff]  ;;  %v1135_v59 = vld [vmem:[%s1707_s2 + $0x1f8] sm:$0xff]  ;;  %v1143_v60 = vld [vmem:[%s1707_s2 + $0x170] sm:$0xff] }
  0x10   :  { %148 = vmatpush.bf16.msra.mxu0 %v846_v44  ;;  %v1148_v61 = vld [vmem:[%s1707_s2 + $0x58] sm:$0xff]  ;;  %v1160_v63 = vld [vmem:[%s1707_s2 + $0x1f0] sm:$0xff]  ;;  %v1165_v0 = vld [vmem:[%s1707_s2 + $0x168] sm:$0xff] }
  0x11   :  { %167 = vmatpush.bf16.msra.mxu1 %v850_v45  ;;  %186 = vmatpush.bf16.msra.mxu2 %v854_v46  ;;  %v1153_v62 = vld [vmem:[%s1707_s2 + $0xd8] sm:$0xff]  ;;  %v1170_v1 = vld [vmem:[%s1707_s2 + $0x50] sm:$0xff]  ;;  %v1182_v3 = vld [vmem:[%s1707_s2 + $0x1e8] sm:$0xff] }
  0x12   :  { %205 = vmatpush.bf16.msra.mxu3 %v858_v47  ;;  %v1177_v2 = vld [vmem:[%s1707_s2 + $0xd0] sm:$0xff]  ;;  %v1187_v4 = vld [vmem:[%s1707_s2 + $0x160] sm:$0xff]  ;;  %v1194_v5 = vld [vmem:[%s1707_s2 + $0x48] sm:$0xff] }
  0x13   :  { %907 = vmatmul.msk.bf16.vlgmr.msra.gmra.mxu0 %vm134_vm0, %v923_v48  ;;  %v1199_v6 = vld [vmem:[%s1707_s2 + $0xc8] sm:$0xff]  ;;  %v1204_v7 = vld [vmem:[%s1707_s2 + $0x1e0] sm:$0xff]  ;;  %v1211_v8 = vld [vmem:[%s1707_s2 + $0x158] sm:$0xff] }
  0x14   :  { %909 = vmatmul.msk.bf16.vlgmr.msra.gmra.mxu1 %vm134_vm0, %v923_v48  ;;  %911 = vmatmul.msk.bf16.vlgmr.msra.gmra.mxu2 %vm134_vm0, %v923_v48  ;;  %v1220_v9 = vld [vmem:[%s1707_s2 + $0x40] sm:$0xff]  ;;  %v1230_v11 = vld [vmem:[%s1707_s2 + $0x1d8] sm:$0xff]  ;;  %v1239_v12 = vld [vmem:[%s1707_s2 + $0x150] sm:$0xff] }
  0x15   :  { %913 = vmatmul.msk.bf16.vlgmr.msra.gmra.mxu3 %vm134_vm0, %v923_v48  ;;  %321 = vmatpush.msrb.mxu0 %v1083_v50  ;;  %v1225_v10 = vld [vmem:[%s1707_s2 + $0xc0] sm:$0xff]  ;;  %v1244_v13 = vld [vmem:[%s1707_s2 + $0x38] sm:$0xff]  ;;  %v1256_v15 = vld [vmem:[%s1707_s2 + $0x1d0] sm:$0xff] }
  0x16   :  { %341 = vmatpush.msrb.mxu1 %v1088_v51  ;;  %361 = vmatpush.msrb.mxu2 %v1115_v56  ;;  %1767 = vst [vmem:[#allocation2_spill] sm:$0xff] %v1244_v13  ;;  %v1249_v14 = vld [vmem:[%s1707_s2 + $0xb8] sm:$0xff]  ;;  %v1263_v16 = vld [vmem:[%s1707_s2 + $0x148] sm:$0xff]  ;;  %v1268_v17 = vld [vmem:[%s1707_s2 + $0x30] sm:$0xff] }
  0x17   :  { %322 = vmatpush.msrb.mxu0 %v1095_v52  ;;  %381 = vmatpush.msrb.mxu3 %v1135_v59  ;;  %1768 = vst [vmem:[#allocation3_spill] sm:$0xff] %v1249_v14  ;;  %v1273_v18 = vld [vmem:[%s1707_s2 + $0xb0] sm:$0xff]  ;;  %v1280_v19 = vld [vmem:[%s1707_s2 + $0x1c8] sm:$0xff]  ;;  %v1287_v20 = vld [vmem:[%s1707_s2 + $0x140] sm:$0xff] }
  0x18   :  { %342 = vmatpush.msrb.mxu1 %v1100_v53  ;;  %362 = vmatpush.msrb.mxu2 %v1143_v60  ;;  %1769 = vst [vmem:[#allocation4_spill] sm:$0xff] %v1268_v17  ;;  %v1292_v21 = vld [vmem:[%s1707_s2 + $0x28] sm:$0xff]  ;;  %v1304_v23 = vld [vmem:[%s1707_s2 + $0x1c0] sm:$0xff]  ;;  %v1311_v24 = vld [vmem:[%s1707_s2 + $0x138] sm:$0xff] }
  0x19   :  { %323 = vmatpush.msrb.mxu0 %v1105_v54  ;;  %382 = vmatpush.msrb.mxu3 %v1160_v63  ;;  %1770 = vst [vmem:[#allocation5_spill] sm:$0xff] %v1273_v18  ;;  %v1297_v22 = vld [vmem:[%s1707_s2 + $0xa8] sm:$0xff]  ;;  %v1316_v25 = vld [vmem:[%s1707_s2 + $0x20] sm:$0xff]  ;;  %v1330_v28 = vld [vmem:[%s1707_s2 + $0x1b8] sm:$0xff] }
  0x1a   :  { %343 = vmatpush.msrb.mxu1 %v1110_v55  ;;  %363 = vmatpush.msrb.mxu2 %v1165_v0  ;;  %1771 = vst [vmem:[#allocation6_spill] sm:$0xff] %v1292_v21  ;;  %v1321_v26 = vld [vmem:[%s1707_s2 + $0xa0] sm:$0xff]  ;;  %v1339_v30 = vld [vmem:[%s1707_s2 + $0x130] sm:$0xff]  ;;  %v1344_v31 = vld [vmem:[%s1707_s2 + $0x18] sm:$0xff] }
  0x1b   :  { %324 = vmatpush.msrb.mxu0 %v1125_v57  ;;  %383 = vmatpush.msrb.mxu3 %v1182_v3  ;;  %1772 = vst [vmem:[#allocation7_spill] sm:$0xff] %v1297_v22  ;;  %v1349_v32 = vld [vmem:[%s1707_s2 + $0x98] sm:$0xff]  ;;  %v1356_v33 = vld [vmem:[%s1707_s2 + $0x1b0] sm:$0xff]  ;;  %v1363_v34 = vld [vmem:[%s1707_s2 + $0x128] sm:$0xff] }
  0x1c   :  { %344 = vmatpush.msrb.mxu1 %v1130_v58  ;;  %364 = vmatpush.msrb.mxu2 %v1187_v4  ;;  %1773 = vst [vmem:[#allocation8_spill] sm:$0xff] %v1316_v25  ;;  %v1368_v35 = vld [vmem:[%s1707_s2 + $0x10] sm:$0xff]  ;;  %v1380_v37 = vld [vmem:[%s1707_s2 + $0x1a8] sm:$0xff]  ;;  %v1387_v38 = vld [vmem:[%s1707_s2 + $0x120] sm:$0xff] }
  0x1d   :  { %325 = vmatpush.msrb.mxu0 %v1148_v61  ;;  %384 = vmatpush.msrb.mxu3 %v1204_v7  ;;  %1774 = vst [vmem:[#allocation9_spill] sm:$0xff] %v1321_v26  ;;  %v1373_v36 = vld [vmem:[%s1707_s2 + $0x90] sm:$0xff]  ;;  %v1392_v39 = vld [vmem:[%s1707_s2 + $0x8] sm:$0xff]  ;;  %v1404_v41 = vld [vmem:[%s1707_s2 + $0x1a0] sm:$0xff] }
  0x1e   :  { %345 = vmatpush.msrb.mxu1 %v1153_v62  ;;  %365 = vmatpush.msrb.mxu2 %v1211_v8  ;;  %1776 = vst [vmem:[#allocation11_spill] sm:$0xff] %v1330_v28  ;;  %v1397_v40 = vld [vmem:[%s1707_s2 + $0x88] sm:$0xff]  ;;  %v1413_v43 = vld [vmem:[%s1707_s2 + $0x118] sm:$0xff]  ;;  %v1418_v44 = vld [vmem:[%s1707_s2] sm:$0xff] }
  0x1f   :  { %326 = vmatpush.msrb.mxu0 %v1170_v1  ;;  %385 = vmatpush.msrb.mxu3 %v1230_v11  ;;  %1778 = vst [vmem:[#allocation13_spill] sm:$0xff] %v1344_v31  ;;  %v1423_v45 = vld [vmem:[%s1707_s2 + $0x80] sm:$0xff]  ;;  %v1434_v48 = vld [vmem:[%s1707_s2 + $0x198] sm:$0xff] }
  0x20   :  { %346 = vmatpush.msrb.mxu1 %v1177_v2  ;;  %366 = vmatpush.msrb.mxu2 %v1239_v12  ;;  %1779 = vst [vmem:[#allocation14_spill] sm:$0xff] %v1349_v32 }
  0x21   :  { %327 = vmatpush.msrb.mxu0 %v1194_v5  ;;  %386 = vmatpush.msrb.mxu3 %v1256_v15  ;;  %1780 = vst [vmem:[#allocation15_spill] sm:$0xff] %v1356_v33 }
  0x22   :  { %347 = vmatpush.msrb.mxu1 %v1199_v6  ;;  %367 = vmatpush.msrb.mxu2 %v1263_v16  ;;  %1781 = vst [vmem:[#allocation16_spill] sm:$0xff] %v1368_v35 }
  0x23   :  { %908 = vmatmul.msk.bf16.gmra.mxu0 %vm134_vm0, %v924_v49  ;;  %387 = vmatpush.msrb.mxu3 %v1280_v19  ;;  %1782 = vst [vmem:[#allocation17_spill] sm:$0xff] %v1373_v36 }
  0x24   :  { %910 = vmatmul.msk.bf16.gmra.mxu1 %vm134_vm0, %v924_v49  ;;  %912 = vmatmul.msk.bf16.gmra.mxu2 %vm134_vm0, %v924_v49  ;;  %1783 = vst [vmem:[#allocation18_spill] sm:$0xff] %v1380_v37 }
  0x25   :  { %914 = vmatmul.msk.bf16.gmra.mxu3 %vm134_vm0, %v924_v49  ;;  %328 = vmatpush.msrb.mxu0 %v1220_v9  ;;  %1784 = vst [vmem:[#allocation19_spill] sm:$0xff] %v1392_v39  ;;  %v1439_v49 = vld [vmem:[%s1707_s2 + $0x110] sm:$0xff] }
  0x26   :  { %348 = vmatpush.msrb.mxu1 %v1225_v10  ;;  %368 = vmatpush.msrb.mxu2 %v1287_v20  ;;  %1785 = vst [vmem:[#allocation20_spill] sm:$0xff] %v1397_v40 }
  0x27   :  { %329 = vmatpush.msrb.mxu0 %v1244_v13  ;;  %388 = vmatpush.msrb.mxu3 %v1304_v23  ;;  %1786 = vst [vmem:[#allocation21_spill] sm:$0xff] %v1404_v41 }
  0x28   :  { %349 = vmatpush.msrb.mxu1 %v1249_v14  ;;  %369 = vmatpush.msrb.mxu2 %v1311_v24  ;;  %1788 = vst [vmem:[#allocation23_spill] sm:$0xff] %v1418_v44 }
  0x29   :  { %330 = vmatpush.msrb.mxu0 %v1268_v17  ;;  %389 = vmatpush.msrb.mxu3 %v1330_v28  ;;  %1789 = vst [vmem:[#allocation24_spill] sm:$0xff] %v1423_v45 }
  0x2a   :  { %350 = vmatpush.msrb.mxu1 %v1273_v18  ;;  %370 = vmatpush.msrb.mxu2 %v1339_v30  ;;  %1792 = vst [vmem:[#allocation27_spill] sm:$0xff] %v1434_v48 }
  0x2b   :  { %331 = vmatpush.msrb.mxu0 %v1292_v21  ;;  %390 = vmatpush.msrb.mxu3 %v1356_v33 }
  0x2c   :  { %351 = vmatpush.msrb.mxu1 %v1297_v22  ;;  %371 = vmatpush.msrb.mxu2 %v1363_v34 }
  0x2d   :  { %332 = vmatpush.msrb.mxu0 %v1316_v25  ;;  %391 = vmatpush.msrb.mxu3 %v1380_v37 }
  0x2e   :  { %352 = vmatpush.msrb.mxu1 %v1321_v26  ;;  %372 = vmatpush.msrb.mxu2 %v1387_v38 }
  0x2f   :  { %333 = vmatpush.msrb.mxu0 %v1344_v31  ;;  %392 = vmatpush.msrb.mxu3 %v1404_v41 }
  0x30   :  { %353 = vmatpush.msrb.mxu1 %v1349_v32  ;;  %373 = vmatpush.msrb.mxu2 %v1413_v43 }
  0x31   :  { %334 = vmatpush.msrb.mxu0 %v1368_v35  ;;  %393 = vmatpush.msrb.mxu3 %v1434_v48  ;;  %v1471_v35 = vld [vmem:[%s1707_s2 + $0x180] sm:$0xff] }
  0x32   :  { %354 = vmatpush.msrb.mxu1 %v1373_v36  ;;  %374 = vmatpush.msrb.mxu2 %v1439_v49  ;;  %v1459_v36 = vld [vmem:[%s1707_s2 + $0x188] sm:$0xff]  ;;  %1797 = vst [vmem:[#allocation32_spill] sm:$0xff] %v1471_v35 }
  0x33   :  { %335 = vmatpush.msrb.mxu0 %v1392_v39  ;;  %1795 = vst [vmem:[#allocation30_spill] sm:$0xff] %v1459_v36 }
  0x34   :  { %355 = vmatpush.msrb.mxu1 %v1397_v40  ;;  %v1444_v40 = vld [vmem:[%s1707_s2 + $0x190] sm:$0xff] }
  0x35   :  { %336 = vmatpush.msrb.mxu0 %v1418_v44  ;;  %1793 = vst [vmem:[#allocation28_spill] sm:$0xff] %v1444_v40  ;;  %v1453_v44 = vld [vmem:[%s1707_s2 + $0x108] sm:$0xff]  ;;  %394 = vmatpush.msrb.mxu3 %v1444_v40 }
  0x36   :  { %356 = vmatpush.msrb.mxu1 %v1423_v45  ;;  %v1465_v45 = vld [vmem:[%s1707_s2 + $0x100] sm:$0xff]  ;;  %375 = vmatpush.msrb.mxu2 %v1453_v44 }
  0x37   :  { %1796 = vst [vmem:[#allocation31_spill] sm:$0xff] %v1465_v45  ;;  %395 = vmatpush.msrb.mxu3 %v1459_v36 }
  0x38   :  { %376 = vmatpush.msrb.mxu2 %v1465_v45 }
  0x39   :  { %396 = vmatpush.msrb.mxu3 %v1471_v35 }
  0x90   :  { %v1323_v27 = vpop.f32.mrf.mxu0 }
  0x91   :  { %1775 = vst [vmem:[#allocation10_spill] sm:$0xff] %v1323_v27  ;;  %v1332_v29 = vpop.f32.mrf.mxu1 }
  0x92   :  { %1777 = vst [vmem:[#allocation12_spill] sm:$0xff] %v1332_v29 }
  0x97   :  { %v1406_v42 = vpop.f32.mrf.mxu2 }
  0x98   :  { %1787 = vst [vmem:[#allocation22_spill] sm:$0xff] %v1406_v42  ;;  %v1425_v46 = vpop.f32.mrf.mxu3  ;;  %v1427_v47 = vpop.f32.mrf.mxu0 }
  0x99   :  { %1790 = vst [vmem:[#allocation25_spill] sm:$0xff] %v1425_v46  ;;  %v1446_v39 = vpop.f32.mrf.mxu1  ;;  %v285_v41 = vadd.f32 %v1427_v47, %v1323_v27 }
  0x9a   :  { %1791 = vst [vmem:[#allocation26_spill] sm:$0xff] %v1427_v47  ;;  %v294_v26 = vadd.f32 %v1446_v39, %v1332_v29 }
  0x9b   :  { %1794 = vst [vmem:[#allocation29_spill] sm:$0xff] %v1446_v39 }
  0x9f   :  { %v1475_v48 = vpop.f32.mrf.mxu2 }
  0xa0   :  { %1798 = vst [vmem:[#allocation33_spill] sm:$0xff] %v1475_v48  ;;  %v1478_v40 = vpop.f32.mrf.mxu3  ;;  %v1480_v32 = vpop.f32.mrf.mxu0  ;;  %v303_v39 = vadd.f32 %v1475_v48, %v1406_v42 }
  0xa1   :  { %1799 = vst [vmem:[#allocation34_spill] sm:$0xff] %v1478_v40  ;;  %v1482_v31 = vpop.f32.mrf.mxu1  ;;  %v286_v36 = vadd.f32 %v285_v41, %v1480_v32  ;;  %v312_v41 = vadd.f32 %v1478_v40, %v1425_v46 }
  0xa2   :  { %1800 = vst [vmem:[#allocation35_spill] sm:$0xff] %v1480_v32  ;;  %v295_v37 = vadd.f32 %v294_v26, %v1482_v31 }
  0xa3   :  { %1801 = vst [vmem:[#allocation36_spill] sm:$0xff] %v1482_v31 }
  0xa7   :  { %v1489_v25 = vpop.f32.mrf.mxu2 }
  0xa8   :  { %1802 = vst [vmem:[#allocation37_spill] sm:$0xff] %v1489_v25  ;;  %v1492_v22 = vpop.f32.mrf.mxu3  ;;  %v1494_v35 = vpop.f32.mrf.mxu0  ;;  %v304_v26 = vadd.f32 %v303_v39, %v1489_v25 }
  0xa9   :  { %1803 = vst [vmem:[#allocation38_spill] sm:$0xff] %v1492_v22  ;;  %v287_v21 = vadd.f32 %v286_v36, %v1494_v35  ;;  %v1497_v33 = vpop.f32.mrf.mxu1  ;;  %v313_v27 = vadd.f32 %v312_v41, %v1492_v22 }
  0xaa   :  { %1804 = vst [vmem:[#allocation39_spill] sm:$0xff] %v1494_v35  ;;  %v296_v18 = vadd.f32 %v295_v37, %v1497_v33 }
  0xab   :  { %1805 = vst [vmem:[#allocation40_spill] sm:$0xff] %v1497_v33  ;;  %v288_v47 = vrot.slane %v287_v21, 4 }
  0xac   :  { %v297_v29 = vrot.slane %v296_v18, 4 }
  0xad   :  { %v289_v32 = vadd.f32 %v288_v47, %v287_v21 }
  0xae   :  { %v298_v31 = vadd.f32 %v297_v29, %v296_v18 }
  0xaf   :  { %v290_v17 = vrot.slane %v289_v32, 2  ;;  %v1506_v36 = vpop.f32.mrf.mxu2 }
  0xb0   :  { %1806 = vst [vmem:[#allocation41_spill] sm:$0xff] %v1506_v36  ;;  %v299_v35 = vrot.slane %v298_v31, 2  ;;  %v305_v37 = vadd.f32 %v304_v26, %v1506_v36  ;;  %v1509_v33 = vpop.f32.mrf.mxu3 }
  0xb1   :  { %v314_v48 = vadd.f32 %v313_v27, %v1509_v33  ;;  %v291_v42 = vadd.f32 %v290_v17, %v289_v32  ;;  %v1515_v17 = vld [vmem:[%s1708_s3 + $0x10] sm:$0xff]  ;;  %v1832_v32 = vld [vmem:[#allocation10_spill] sm:$0xff] }
  0xb2   :  { %v306_v28 = vrot.slane %v305_v37, 4  ;;  %v300_v14 = vadd.f32 %v299_v35, %v298_v31  ;;  %461 = vmatpush.msra.mxu2 %v1515_v17  ;;  %v1833_v35 = vld [vmem:[#allocation26_spill] sm:$0xff] }
  0xb3   :  { %v315_v40 = vrot.slane %v314_v48, 4  ;;  %v292_v21 = vrot.slane %v291_v42, 1 }
  0xb4   :  { %v307_v47 = vadd.f32 %v306_v28, %v305_v37  ;;  %v301_v39 = vrot.slane %v300_v14, 1 }
  0xb5   :  { %v316_v18 = vadd.f32 %v315_v40, %v314_v48  ;;  %v293_v29 = vadd.f32 %v292_v21, %v291_v42  ;;  %v1834_v40 = vld [vmem:[#allocation35_spill] sm:$0xff]  ;;  %v1837_v48 = vld [vmem:[#allocation36_spill] sm:$0xff] }
  0xb6   :  { %v308_v41 = vrot.slane %v307_v47, 2  ;;  %v302_v22 = vadd.f32 %v301_v39, %v300_v14  ;;  %v1839_v39 = vld [vmem:[#allocation40_spill] sm:$0xff] }
  0xb7   :  { %v317_v46 = vrot.slane %v316_v18, 2  ;;  %337 = vmatmul.f32.vlgmr.msrb.gmra.mxu0 %v293_v29 }
  0xb8   :  { %357 = vmatmul.f32.vlgmr.msrb.gmra.mxu1 %v302_v22  ;;  %v309_v25 = vadd.f32 %v308_v41, %v307_v47  ;;  %v1829_v22 = vld [vmem:[#allocation23_spill] sm:$0xff] }
  0xb9   :  { %v318_v26 = vadd.f32 %v317_v46, %v316_v18 }
  0xba   :  { %v310_v36 = vrot.slane %v309_v25, 1 }
  0xbb   :  { %v319_v45 = vrot.slane %v318_v26, 1 }
  0xbc   :  { %v311_v13 = vadd.f32 %v310_v36, %v309_v25  ;;  %v1838_v36 = vld [vmem:[#allocation39_spill] sm:$0xff] }
  0xbd   :  { %v320_v27 = vadd.f32 %v319_v45, %v318_v26  ;;  %v1836_v45 = vld [vmem:[#allocation29_spill] sm:$0xff] }
  0xbe   :  { %377 = vmatmul.f32.vlgmr.msrb.gmra.mxu2 %v311_v13  ;;  %v1528_v13 = vld [vmem:[%s1708_s3 + $0x18] sm:$0xff] }
  0xbf   :  { %397 = vmatmul.f32.vlgmr.msrb.gmra.mxu3 %v320_v27  ;;  %598 = vmatpush.msrb.mxu2 %v1115_v56  ;;  %v1533_v56 = vld [vmem:[%s1708_s3] sm:$0xff] }
  0xc0   :  { %481 = vmatpush.msra.mxu3 %v1528_v13  ;;  %421 = vmatpush.msra.mxu0 %v1533_v56 }
  0xc1   :  { %599 = vmatpush.msrb.mxu2 %v1143_v60  ;;  %v1538_v60 = vld [vmem:[%s1708_s3 + $0x8] sm:$0xff] }
  0xc2   :  { %441 = vmatpush.msra.mxu1 %v1538_v60  ;;  %558 = vmatpush.msrb.mxu0 %v1083_v50  ;;  %v1807_v50 = vld [vmem:[#allocation2_spill] sm:$0xff] }
  0xc3   :  { %600 = vmatpush.msrb.mxu2 %v1165_v0  ;;  %618 = vmatpush.msrb.mxu3 %v1135_v59  ;;  %v1817_v0 = vld [vmem:[#allocation8_spill] sm:$0xff] }
  0xc4   :  { %578 = vmatpush.msrb.mxu1 %v1088_v51  ;;  %559 = vmatpush.msrb.mxu0 %v1095_v52  ;;  %v1808_v51 = vld [vmem:[#allocation31_spill] sm:$0xff] }
  0xc5   :  { %601 = vmatpush.msrb.mxu2 %v1187_v4  ;;  %619 = vmatpush.msrb.mxu3 %v1160_v63  ;;  %v1809_v52 = vld [vmem:[#allocation3_spill] sm:$0xff]  ;;  %v1816_v63 = vld [vmem:[#allocation18_spill] sm:$0xff]  ;;  %v1820_v4 = vld [vmem:[#allocation13_spill] sm:$0xff] }
  0xc6   :  { %579 = vmatpush.msrb.mxu1 %v1100_v53  ;;  %560 = vmatpush.msrb.mxu0 %v1105_v54  ;;  %v1810_v53 = vld [vmem:[#allocation11_spill] sm:$0xff]  ;;  %v1811_v54 = vld [vmem:[#allocation4_spill] sm:$0xff] }
  0xc7   :  { %602 = vmatpush.msrb.mxu2 %v1211_v8  ;;  %620 = vmatpush.msrb.mxu3 %v1182_v3 }
  0xc8   :  { %580 = vmatpush.msrb.mxu1 %v1110_v55  ;;  %561 = vmatpush.msrb.mxu0 %v1125_v57  ;;  %v1812_v55 = vld [vmem:[#allocation5_spill] sm:$0xff]  ;;  %v1813_v57 = vld [vmem:[#allocation15_spill] sm:$0xff] }
  0xc9   :  { %603 = vmatpush.msrb.mxu2 %v1239_v12  ;;  %621 = vmatpush.msrb.mxu3 %v1204_v7  ;;  %v1822_v7 = vld [vmem:[#allocation27_spill] sm:$0xff]  ;;  %v1825_v12 = vld [vmem:[#allocation28_spill] sm:$0xff] }
  0xca   :  { %581 = vmatpush.msrb.mxu1 %v1130_v58  ;;  %562 = vmatpush.msrb.mxu0 %v1148_v61  ;;  %v1814_v58 = vld [vmem:[#allocation6_spill] sm:$0xff] }
  0xcb   :  { %604 = vmatpush.msrb.mxu2 %v1263_v16  ;;  %622 = vmatpush.msrb.mxu3 %v1230_v11  ;;  %v1824_v11 = vld [vmem:[#allocation17_spill] sm:$0xff]  ;;  %v1827_v16 = vld [vmem:[#allocation20_spill] sm:$0xff] }
  0xcc   :  { %582 = vmatpush.msrb.mxu1 %v1153_v62  ;;  %563 = vmatpush.msrb.mxu0 %v1170_v1  ;;  %v1815_v62 = vld [vmem:[#allocation7_spill] sm:$0xff]  ;;  %v1818_v1 = vld [vmem:[#allocation9_spill] sm:$0xff] }
  0xcd   :  { %605 = vmatpush.msrb.mxu2 %v1287_v20  ;;  %623 = vmatpush.msrb.mxu3 %v1256_v15  ;;  %v1826_v15 = vld [vmem:[#allocation19_spill] sm:$0xff] }
  0xce   :  { %583 = vmatpush.msrb.mxu1 %v1177_v2  ;;  %564 = vmatpush.msrb.mxu0 %v1194_v5  ;;  %v1819_v2 = vld [vmem:[#allocation21_spill] sm:$0xff] }
  0xcf   :  { %606 = vmatpush.msrb.mxu2 %v1311_v24  ;;  %624 = vmatpush.msrb.mxu3 %v1280_v19  ;;  %v1828_v19 = vld [vmem:[#allocation30_spill] sm:$0xff]  ;;  %v1831_v24 = vld [vmem:[#allocation32_spill] sm:$0xff] }
  0xd0   :  { %584 = vmatpush.msrb.mxu1 %v1199_v6  ;;  %565 = vmatpush.msrb.mxu0 %v1220_v9  ;;  %v1821_v6 = vld [vmem:[#allocation14_spill] sm:$0xff]  ;;  %v1823_v9 = vld [vmem:[#allocation16_spill] sm:$0xff] }
  0xd1   :  { %607 = vmatpush.msrb.mxu2 %v1339_v30  ;;  %625 = vmatpush.msrb.mxu3 %v1304_v23  ;;  %v1830_v23 = vld [vmem:[#allocation24_spill] sm:$0xff] }
  0xd2   :  { %585 = vmatpush.msrb.mxu1 %v1225_v10  ;;  %566 = vmatpush.msrb.mxu0 %v1807_v50 }
  0xd3   :  { %608 = vmatpush.msrb.mxu2 %v1363_v34  ;;  %626 = vmatpush.msrb.mxu3 %v1810_v53 }
  0xd4   :  { %586 = vmatpush.msrb.mxu1 %v1809_v52  ;;  %567 = vmatpush.msrb.mxu0 %v1811_v54 }
  0xd5   :  { %609 = vmatpush.msrb.mxu2 %v1387_v38  ;;  %627 = vmatpush.msrb.mxu3 %v1813_v57  ;;  %v1840_v57 = vld [vmem:[#allocation22_spill] sm:$0xff] }
  0xd6   :  { %587 = vmatpush.msrb.mxu1 %v1812_v55  ;;  %568 = vmatpush.msrb.mxu0 %v1814_v58 }
  0xd7   :  { %610 = vmatpush.msrb.mxu2 %v1413_v43  ;;  %628 = vmatpush.msrb.mxu3 %v1816_v63  ;;  %v1835_v43 = vld [vmem:[#allocation12_spill] sm:$0xff] }
  0xd8   :  { %588 = vmatpush.msrb.mxu1 %v1815_v62  ;;  %569 = vmatpush.msrb.mxu0 %v1817_v0  ;;  %v1842_v62 = vld [vmem:[#allocation37_spill] sm:$0xff] }
  0xd9   :  { %611 = vmatpush.msrb.mxu2 %v1439_v49  ;;  %629 = vmatpush.msrb.mxu3 %v1819_v2 }
  0xda   :  { %589 = vmatpush.msrb.mxu1 %v1818_v1  ;;  %570 = vmatpush.msrb.mxu0 %v1820_v4  ;;  %v1843_v1 = vld [vmem:[#allocation41_spill] sm:$0xff] }
  0xdb   :  { %612 = vmatpush.msrb.mxu2 %v1453_v44  ;;  %630 = vmatpush.msrb.mxu3 %v1822_v7 }
  0xdc   :  { %590 = vmatpush.msrb.mxu1 %v1821_v6  ;;  %571 = vmatpush.msrb.mxu0 %v1823_v9 }
  0xdd   :  { %613 = vmatpush.msrb.mxu2 %v1808_v51  ;;  %631 = vmatpush.msrb.mxu3 %v1825_v12  ;;  %v1846_v12 = vld [vmem:[#allocation38_spill] sm:$0xff] }
  0xde   :  { %591 = vmatpush.msrb.mxu1 %v1824_v11  ;;  %572 = vmatpush.msrb.mxu0 %v1826_v15 }
  0xdf   :  { %632 = vmatpush.msrb.mxu3 %v1828_v19 }
  0xe0   :  { %592 = vmatpush.msrb.mxu1 %v1827_v16  ;;  %573 = vmatpush.msrb.mxu0 %v1829_v22 }
  0xe1   :  { %633 = vmatpush.msrb.mxu3 %v1831_v24 }
  0xe2   :  { %593 = vmatpush.msrb.mxu1 %v1830_v23 }
 0x134   :  { %v338_v59 = vpop.f32.mrf.mxu0 }
 0x135   :  { %v358_v61 = vpop.f32.mrf.mxu1 }
 0x136   :  { %v359_v3 = vadd.f32 %v358_v61, %v338_v59  ;;  %v1841_v59 = vld [vmem:[#allocation33_spill] sm:$0xff] }
 0x141   :  { %v378_v5 = vpop.f32.mrf.mxu2 }
 0x142   :  { %v379_v8 = vadd.f32 %v378_v5, %v359_v3  ;;  %v398_v10 = vpop.f32.mrf.mxu3  ;;  %v1844_v3 = vld [vmem:[#allocation25_spill] sm:$0xff]  ;;  %v1845_v5 = vld [vmem:[#allocation34_spill] sm:$0xff] }
 0x144   :  { %v399_v14 = vadd.f32 %v398_v10, %v379_v8 }
 0x146   :  { %v1597_v20 = vmul.f32 0.00048828125, %v399_v14 }
 0x148   :  { %915 = vmatmul.msk.f32.vlgmr.msra.gmra.mxu0 %vm402_vm1, %v1597_v20  ;;  %916 = vmatmul.msk.f32.vlgmr.msra.gmra.mxu1 %vm402_vm1, %v1597_v20 }
 0x149   :  { %917 = vmatmul.msk.f32.vlgmr.msra.gmra.mxu2 %vm402_vm1, %v1597_v20  ;;  %918 = vmatmul.msk.f32.vlgmr.msra.gmra.mxu3 %vm402_vm1, %v1597_v20 }
 0x14a   :  { %718 = vmatpush.msra.mxu2 %v1515_v17  ;;  %738 = vmatpush.msra.mxu3 %v1528_v13 }
 0x14b   :  { %678 = vmatpush.msra.mxu0 %v1533_v56  ;;  %698 = vmatpush.msra.mxu1 %v1538_v60 }
 0x1c5   :  { %v423_v25 = vpop.f32.mrf.mxu0  ;;  %v443_v28 = vpop.f32.mrf.mxu1 }
 0x1c6   :  { %v486_v30 = vperm.slane %v423_v25, 0  ;;  %v487_v31 = vperm.slane %v443_v28, 0 }
 0x1c8   :  { %v490_v34 = vsub.f32 %v1832_v32, %v486_v30  ;;  %v494_v38 = vsub.f32 %v1833_v35, %v486_v30  ;;  %v498_v42 = vsub.f32 %v1834_v40, %v486_v30  ;;  %v491_v44 = vsub.f32 %v1835_v43, %v487_v31 }
 0x1c9   :  { %v495_v46 = vsub.f32 %v1836_v45, %v487_v31  ;;  %v499_v49 = vsub.f32 %v1837_v48, %v487_v31  ;;  %v502_v37 = vsub.f32 %v1838_v36, %v486_v30  ;;  %v503_v18 = vsub.f32 %v1839_v39, %v487_v31 }
 0x1ca   :  { %v506_v21 = vmul.f32 %v490_v34, %v490_v34  ;;  %v510_v47 = vmul.f32 %v494_v38, %v494_v38  ;;  %v507_v29 = vmul.f32 %v491_v44, %v491_v44  ;;  %v514_v26 = vmul.f32 %v498_v42, %v498_v42 }
 0x1cb   :  { %v511_v41 = vmul.f32 %v495_v46, %v495_v46  ;;  %v515_v56 = vmul.f32 %v499_v49, %v499_v49  ;;  %v518_v52 = vmul.f32 %v502_v37, %v502_v37  ;;  %v519_v54 = vmul.f32 %v503_v18, %v503_v18 }
 0x1cc   :  { %v522_v27 = vadd.f32 %v510_v47, %v506_v21  ;;  %v463_v17 = vpop.f32.mrf.mxu2  ;;  %v483_v13 = vpop.f32.mrf.mxu3 }
 0x1cd   :  { %v531_v60 = vadd.f32 %v511_v41, %v507_v29  ;;  %v488_v50 = vperm.slane %v463_v17, 0  ;;  %v489_v51 = vperm.slane %v483_v13, 0 }
 0x1ce   :  { %v523_v53 = vadd.f32 %v522_v27, %v514_v26 }
 0x1cf   :  { %v532_v55 = vadd.f32 %v531_v60, %v515_v56  ;;  %v492_v58 = vsub.f32 %v1840_v57, %v488_v50  ;;  %v496_v61 = vsub.f32 %v1841_v59, %v488_v50  ;;  %v500_v63 = vsub.f32 %v1842_v62, %v488_v50 }
 0x1d0   :  { %v524_v0 = vadd.f32 %v523_v53, %v518_v52  ;;  %v504_v2 = vsub.f32 %v1843_v1, %v488_v50  ;;  %v493_v4 = vsub.f32 %v1844_v3, %v489_v51  ;;  %v497_v6 = vsub.f32 %v1845_v5, %v489_v51 }
 0x1d1   :  { %v533_v7 = vadd.f32 %v532_v55, %v519_v54  ;;  %v508_v8 = vmul.f32 %v492_v58, %v492_v58  ;;  %v512_v9 = vmul.f32 %v496_v61, %v496_v61  ;;  %v516_v11 = vmul.f32 %v500_v63, %v500_v63 }
 0x1d2   :  { %v525_v10 = vrot.slane %v524_v0, 4  ;;  %v501_v14 = vsub.f32 %v1846_v12, %v489_v51  ;;  %v505_v15 = vsub.f32 %v1509_v33, %v489_v51  ;;  %v509_v22 = vmul.f32 %v493_v4, %v493_v4 }
 0x1d3   :  { %v534_v16 = vrot.slane %v533_v7, 4  ;;  %v540_v19 = vadd.f32 %v512_v9, %v508_v8  ;;  %v513_v23 = vmul.f32 %v497_v6, %v497_v6  ;;  %v520_v24 = vmul.f32 %v504_v2, %v504_v2 }
 0x1d4   :  { %v526_v25 = vadd.f32 %v525_v10, %v524_v0  ;;  %v517_v30 = vmul.f32 %v501_v14, %v501_v14  ;;  %v521_v44 = vmul.f32 %v505_v15, %v505_v15 }
 0x1d5   :  { %v541_v28 = vadd.f32 %v540_v19, %v516_v11  ;;  %v549_v31 = vadd.f32 %v513_v23, %v509_v22  ;;  %v535_v34 = vadd.f32 %v534_v16, %v533_v7  ;;  %v639_v22 = vld [vmem:[%s1709_s4] sm:$0x1] }
 0x1d6   :  { %v527_v38 = vrot.slane %v526_v25, 2 }
 0x1d7   :  { %v542_v42 = vadd.f32 %v541_v28, %v520_v24  ;;  %v550_v46 = vadd.f32 %v549_v31, %v517_v30  ;;  %v536_v49 = vrot.slane %v535_v34, 2 }
 0x1d8   :  { %v528_v37 = vadd.f32 %v527_v38, %v526_v25  ;;  %v652_v25 = vld [vmem:[%s1710_s5] sm:$0x1] }
 0x1d9   :  { %v543_v21 = vrot.slane %v542_v42, 4  ;;  %v551_v47 = vadd.f32 %v550_v46, %v521_v44  ;;  %v537_v18 = vadd.f32 %v536_v49, %v535_v34 }
 0x1da   :  { %v529_v29 = vrot.slane %v528_v37, 1 }
 0x1db   :  { %v552_v41 = vrot.slane %v551_v47, 4  ;;  %v538_v26 = vrot.slane %v537_v18, 1  ;;  %v544_v27 = vadd.f32 %v543_v21, %v542_v42 }
 0x1dc   :  { %v530_v17 = vadd.f32 %v529_v29, %v528_v37 }
 0x1dd   :  { %v539_v13 = vadd.f32 %v538_v26, %v537_v18  ;;  %v545_v56 = vrot.slane %v544_v27, 2  ;;  %v553_v60 = vadd.f32 %v552_v41, %v551_v47 }
 0x1de   :  { %574 = vmatmul.f32.vlgmr.msrb.gmra.mxu0 %v530_v17 }
 0x1df   :  { %594 = vmatmul.f32.vlgmr.msrb.gmra.mxu1 %v539_v13  ;;  %v546_v50 = vadd.f32 %v545_v56, %v544_v27  ;;  %v554_v51 = vrot.slane %v553_v60, 2 }
 0x1e1   :  { %v547_v52 = vrot.slane %v546_v50, 1  ;;  %v555_v53 = vadd.f32 %v554_v51, %v553_v60 }
 0x1e3   :  { %v548_v54 = vadd.f32 %v547_v52, %v546_v50  ;;  %v556_v55 = vrot.slane %v555_v53, 1 }
 0x1e5   :  { %614 = vmatmul.f32.vlgmr.msrb.gmra.mxu2 %v548_v54  ;;  %v557_v58 = vadd.f32 %v556_v55, %v555_v53 }
 0x1e7   :  { %634 = vmatmul.f32.vlgmr.msrb.gmra.mxu3 %v557_v58 }
 0x25b   :  { %v575_v61 = vpop.f32.mrf.mxu0 }
 0x25c   :  { %v595_v63 = vpop.f32.mrf.mxu1 }
 0x25d   :  { %v596_v0 = vadd.f32 %v595_v63, %v575_v61 }
 0x268   :  { %v615_v2 = vpop.f32.mrf.mxu2 }
 0x269   :  { %v616_v4 = vadd.f32 %v615_v2, %v596_v0 }
 0x26a   :  { %v635_v6 = vpop.f32.mrf.mxu3 }
 0x26b   :  { %v636_v7 = vadd.f32 %v635_v6, %v616_v4 }
 0x26d   :  { %v638_v8 = vmul.f32 0.00048828125, %v636_v7 }
 0x26f   :  { %v640_v9 = vadd.f32 1e-05, %v638_v8 }
 0x271   :  { %941 = vrsqrt.f32 %v640_v9  ;;  %vm647_vm3 = vweird.f32 %v640_v9 }
 0x277   :  { %v942_v10 = vpop.eup %941 }
 0x278   :  { %v642_v11 = vmul.f32 %v942_v10, %v640_v9  ;;  %vm648_vm2 = vweird.f32 %v942_v10 }
 0x279   :  { %vm649_vm4 = vmor %vm647_vm3, %vm648_vm2 }
 0x27a   :  { %v643_v14 = vmul.f32 %v942_v10, %v642_v11 }
 0x27c   :  { %v644_v15 = vmul.f32 0.5, %v643_v14 }
 0x27e   :  { %v645_v16 = vsub.f32 1.5, %v644_v15 }
 0x280   :  { %v646_v19 = vmul.f32 %v942_v10, %v645_v16 }
 0x282   :  { %v650_v23 = vsel %vm649_vm4, %v942_v10, %v646_v19 }
 0x283   :  { %v651_v24 = vmul.f32 %v650_v23, %v639_v22 }
 0x285   :  { %v653_v28 = vmul.f32 %v651_v24, %v1597_v20 }
 0x287   :  { %v654_v30 = vsub.f32 %v652_v25, %v653_v28 }
 0x289   :  { %v656_v31 = vperm.slane %v654_v30, 0 }
 0x28b   :  { %v659_v34 = vsel %vm658_vm5, %v651_v24, %v656_v31 }
 0x28c   :  { %919 = vmatmul.msk.f32.vlgmr.msra.gmra.mxu0 %vm402_vm1, %v659_v34  ;;  %920 = vmatmul.msk.f32.vlgmr.msra.gmra.mxu1 %vm402_vm1, %v659_v34 }
 0x28d   :  { %921 = vmatmul.msk.f32.vlgmr.msra.gmra.mxu2 %vm402_vm1, %v659_v34  ;;  %922 = vmatmul.msk.f32.vlgmr.msra.gmra.mxu3 %vm402_vm1, %v659_v34 }
 0x309   :  { %v680_v38 = vpop.f32.mrf.mxu0  ;;  %v700_v42 = vpop.f32.mrf.mxu1 }
 0x30a   :  { %v743_v44 = vperm.slane %v680_v38, 0  ;;  %v744_v46 = vperm.slane %v700_v42, 0  ;;  %v763_v49 = vperm.slane %v680_v38, 1  ;;  %v764_v37 = vperm.slane %v700_v42, 1 }
 0x30c   :  { %v747_v20 = vmul.f32 %v743_v44, %v1832_v32  ;;  %v751_v21 = vmul.f32 %v743_v44, %v1833_v35  ;;  %v755_v47 = vmul.f32 %v743_v44, %v1834_v40  ;;  %v759_v18 = vmul.f32 %v743_v44, %v1838_v36 }
 0x30d   :  { %v748_v29 = vmul.f32 %v744_v46, %v1835_v43  ;;  %v752_v41 = vmul.f32 %v744_v46, %v1836_v45  ;;  %v756_v26 = vmul.f32 %v744_v46, %v1837_v48  ;;  %v760_v27 = vmul.f32 %v744_v46, %v1839_v39 }
 0x30e   :  { %v767_v17 = vadd.f32 %v763_v49, %v747_v20  ;;  %v771_v13 = vadd.f32 %v763_v49, %v751_v21  ;;  %v775_v56 = vadd.f32 %v763_v49, %v755_v47  ;;  %v779_v60 = vadd.f32 %v763_v49, %v759_v18 }
 0x30f   :  { %v768_v50 = vadd.f32 %v764_v37, %v748_v29  ;;  %v772_v32 = vadd.f32 %v764_v37, %v752_v41  ;;  %v776_v51 = vadd.f32 %v764_v37, %v756_v26  ;;  %v780_v35 = vadd.f32 %v764_v37, %v760_v27 }
 0x310   :  { %v783_v52 = vmul.f32 0.01, %v767_v17  ;;  %v787_v40 = vmul.f32 0.01, %v771_v13  ;;  %v791_v53 = vmul.f32 0.01, %v775_v56  ;;  %v720_v55 = vpop.f32.mrf.mxu2  ;;  %v740_v45 = vpop.f32.mrf.mxu3 }
 0x311   :  { %v795_v36 = vmul.f32 0.01, %v779_v60  ;;  %v784_v54 = vmul.f32 0.01, %v768_v50  ;;  %v788_v43 = vmul.f32 0.01, %v772_v32 }
 0x312   :  { %v799_v58 = vmax.f32 %v767_v17, %v783_v52  ;;  %v803_v48 = vmax.f32 %v771_v13, %v787_v40  ;;  %v807_v61 = vmax.f32 %v775_v56, %v791_v53  ;;  %v792_v39 = vmul.f32 0.01, %v776_v51 }
 0x313   :  { %v811_v63 = vmax.f32 %v779_v60, %v795_v36  ;;  %v796_v0 = vmul.f32 0.01, %v780_v35  ;;  %v800_v2 = vmax.f32 %v768_v50, %v784_v54  ;;  %v804_v4 = vmax.f32 %v772_v32, %v788_v43 }
 0x314   :  { %815 = vst [vmem:[%s1711_s6] sm:$0xff] %v799_v58  ;;  %v745_v6 = vperm.slane %v720_v55, 0  ;;  %v746_v7 = vperm.slane %v740_v45, 0  ;;  %v808_v8 = vmax.f32 %v776_v51, %v792_v39  ;;  %v765_v10 = vperm.slane %v720_v55, 1 }
 0x315   :  { %819 = vst [vmem:[%s1711_s6 + $0x20] sm:$0xff] %v803_v48  ;;  %v812_v9 = vmax.f32 %v780_v35, %v796_v0  ;;  %v766_v11 = vperm.slane %v740_v45, 1 }
 0x316   :  { %823 = vst [vmem:[%s1711_s6 + $0x40] sm:$0xff] %v807_v61  ;;  %v749_v14 = vmul.f32 %v745_v6, %v1840_v57  ;;  %v753_v15 = vmul.f32 %v745_v6, %v1841_v59  ;;  %v757_v16 = vmul.f32 %v745_v6, %v1842_v62  ;;  %v761_v19 = vmul.f32 %v745_v6, %v1843_v1 }
 0x317   :  { %827 = vst [vmem:[%s1711_s6 + $0x60] sm:$0xff] %v811_v63  ;;  %v750_v22 = vmul.f32 %v746_v7, %v1844_v3  ;;  %v754_v23 = vmul.f32 %v746_v7, %v1845_v5  ;;  %v758_v24 = vmul.f32 %v746_v7, %v1846_v12  ;;  %v762_v25 = vmul.f32 %v746_v7, %v1509_v33 }
 0x318   :  { %816 = vst [vmem:[%s1711_s6 + $0x8] sm:$0xff] %v800_v2  ;;  %v769_v57 = vadd.f32 %v765_v10, %v749_v14  ;;  %v773_v59 = vadd.f32 %v765_v10, %v753_v15  ;;  %v777_v62 = vadd.f32 %v765_v10, %v757_v16  ;;  %v781_v1 = vadd.f32 %v765_v10, %v761_v19 }
 0x319   :  { %820 = vst [vmem:[%s1711_s6 + $0x28] sm:$0xff] %v804_v4  ;;  %v770_v28 = vadd.f32 %v766_v11, %v750_v22  ;;  %v774_v3 = vadd.f32 %v766_v11, %v754_v23  ;;  %v778_v30 = vadd.f32 %v766_v11, %v758_v24  ;;  %v782_v5 = vadd.f32 %v766_v11, %v762_v25 }
 0x31a   :  { %824 = vst [vmem:[%s1711_s6 + $0x48] sm:$0xff] %v808_v8  ;;  %v785_v33 = vmul.f32 0.01, %v769_v57  ;;  %v789_v12 = vmul.f32 0.01, %v773_v59 }
 0x31b   :  { %828 = vst [vmem:[%s1711_s6 + $0x68] sm:$0xff] %v812_v9  ;;  %v793_v31 = vmul.f32 0.01, %v777_v62  ;;  %v797_v34 = vmul.f32 0.01, %v781_v1 }
 0x31c   :  { %v801_v38 = vmax.f32 %v769_v57, %v785_v33  ;;  %v805_v42 = vmax.f32 %v773_v59, %v789_v12  ;;  %v786_v44 = vmul.f32 0.01, %v770_v28  ;;  %v790_v46 = vmul.f32 0.01, %v774_v3 }
 0x31d   :  { %v809_v49 = vmax.f32 %v777_v62, %v793_v31  ;;  %v813_v37 = vmax.f32 %v781_v1, %v797_v34  ;;  %v794_v20 = vmul.f32 0.01, %v778_v30  ;;  %v798_v21 = vmul.f32 0.01, %v782_v5 }
 0x31e   :  { %817 = vst [vmem:[%s1711_s6 + $0x10] sm:$0xff] %v801_v38  ;;  %v802_v47 = vmax.f32 %v770_v28, %v786_v44  ;;  %v806_v18 = vmax.f32 %v774_v3, %v790_v46 }
 0x31f   :  { %821 = vst [vmem:[%s1711_s6 + $0x30] sm:$0xff] %v805_v42  ;;  %v810_v29 = vmax.f32 %v778_v30, %v794_v20  ;;  %v814_v41 = vmax.f32 %v782_v5, %v798_v21 }
 0x320   :  { %825 = vst [vmem:[%s1711_s6 + $0x50] sm:$0xff] %v809_v49 }
 0x321   :  { %829 = vst [vmem:[%s1711_s6 + $0x70] sm:$0xff] %v813_v37 }
 0x322   :  { %818 = vst [vmem:[%s1711_s6 + $0x18] sm:$0xff] %v802_v47 }
 0x323   :  { %822 = vst [vmem:[%s1711_s6 + $0x38] sm:$0xff] %v806_v18 }
 0x324   :  { %826 = vst [vmem:[%s1711_s6 + $0x58] sm:$0xff] %v810_v29 }
 0x325   :  { %830 = vst [vmem:[%s1711_s6 + $0x78] sm:$0xff] %v814_v41 }

</bundles_post_ra>
